<compile_context>
chip_gen: v7x
topology: tpu7x:2x2x1
jax: 0.10.0
libtpu: 0.0.40
codegen_flags: <defaults>
</compile_context>

<pallas_src>
import functools

import jax
import jax.numpy as jnp
from jax.experimental import pallas as pl
from jax.experimental.pallas import tpu as pltpu

LN_EPS = 1e-5
NEG_BIG = -1e30          # Python float (NOT a jax.Array) -> folds into the jaxpr
                         # sigmoid(-1e30) == 0.0 exactly, matching masked_fill(-inf)


# ----------------------------------------------------------------------------
# Fused decoder kernel: one grid step == (batch tile b, layer l)
# ----------------------------------------------------------------------------
def _decoder_kernel(n_heads, bf16_elem,
                    mask_ref, y_ref,
                    ln1_w, ln1_b, wqkv, bqkv, wo, bo,
                    ln2_w, ln2_b, wfc, bfc, wpr, bpr,
                    pw, pb,
                    out_ref, x_scr):
    """One ResidualAttentionBlock on the VMEM-resident activation tile; on the
    last layer also applies the Linear(D,1) head + mask + sigmoid.

    mask_ref : (Bt, 1, T) f32, 1.0 == padded key
    y_ref    : (Bt, T, D) initial activation (read only at layer 0)
    weights  : per-layer tiles (leading layer dim squeezed away)
    pw, pb   : (1, D), (1, 1) f32 projection head
    out_ref  : (Bt, 1, S_pad) lane-dense sigmoid output (written at last layer)
    x_scr    : (Bt, T, D) f32 VMEM scratch carrying the activation across layers
    """
    layer = pl.program_id(1)
    n_layers = pl.num_programs(1)

    @pl.when(layer == 0)
    def _():
        x_scr[...] = y_ref[...].astype(jnp.float32)

    x = x_scr[...]                               # (Bt, T, D) f32
    Bt, T, D = x.shape
    H = n_heads
    Dh = D // H
    BH = Bt * H
    M = Bt * T
    S = T // 2
    S_pad = out_ref.shape[-1]
    mask = mask_ref[...]                         # (Bt, 1, T) f32
    ew = jnp.bfloat16 if bf16_elem else jnp.float32   # elementwise/EUP dtype

    # ---- LayerNorm 1 (f32) ----
    mu = jnp.mean(x, axis=-1, keepdims=True)
    var = jnp.mean(jnp.square(x - mu), axis=-1, keepdims=True)
    xn = (x - mu) * jax.lax.rsqrt(var + LN_EPS)
    xn = xn * ln1_w[...] + ln1_b[...]

    # ---- Multi-head self-attention (key_padding_mask) ----
    # One fused QKV matmul over M = Bt*T rows (bf16 operands, f32 accumulate).
    qkv = jnp.dot(xn.reshape(M, D).astype(jnp.bfloat16), wqkv[...],
                  preferred_element_type=jnp.float32) + bqkv[...]       # (M, 3D)

    # TODO(synk): for real configs pad D to a multiple of 128 and repack the
    #             QKV / out-proj weights per head so these slices are
    #             lane-aligned (no relayout copies).
    q = qkv[:, 0:D]
    k = qkv[:, D:2 * D]
    v = qkv[:, 2 * D:3 * D]

    # Head split via reshape+swapaxes (no per-head slice loop); K is produced
    # once as (BH, Dh, T) so the score contraction needs no per-head transposes.
    qh = jnp.swapaxes(q.reshape(Bt, T, H, Dh), 1, 2).reshape(BH, T, Dh)
    qh = qh.astype(jnp.bfloat16)
    kt = jnp.transpose(k.reshape(Bt, T, H, Dh), (0, 2, 3, 1)).reshape(BH, Dh, T)
    kt = kt.astype(jnp.bfloat16)
    vh = jnp.swapaxes(v.reshape(Bt, T, H, Dh), 1, 2).reshape(BH, T, Dh)
    vh = vh.astype(jnp.bfloat16)

    scale = 1.0 / (Dh ** 0.5)
    # TODO(synk): flash-style KV tiling (online softmax over key blocks) before
    #             scaling T; the (BH, T, T) scores are the limiting VMEM
    #             allocation on v7x (64 MiB / TC).
    s = jnp.einsum("bqd,bdk->bqk", qh, kt,
                   preferred_element_type=jnp.float32) * scale          # (BH, T, T)
    mask_bh = jnp.broadcast_to(mask, (Bt, H, T)).reshape(BH, 1, T)
    s = jnp.where(mask_bh > 0.5, NEG_BIG, s)                            # mask padded keys
    s = s - jnp.max(s, axis=-1, keepdims=True)
    p = jnp.exp(s.astype(ew))                                           # EUP; bf16 on v6e/v7x
    l = jnp.sum(p.astype(jnp.float32), axis=-1, keepdims=True)          # f32 accumulate
    r = pl.reciprocal(l, approx=True)
    p = (p * r.astype(p.dtype)).astype(jnp.bfloat16)
    ctx = jnp.einsum("bqk,bkd->bqd", p, vh,
                     preferred_element_type=jnp.float32)                # (BH, T, Dh)

    # Merge heads -> (M, D), then ONE output projection.
    o_cat = jnp.swapaxes(ctx.reshape(Bt, H, T, Dh), 1, 2).reshape(M, D)
    attn = jnp.dot(o_cat.astype(jnp.bfloat16), wo[...],
                   preferred_element_type=jnp.float32) + bo[...]
    x = x + attn.reshape(Bt, T, D)

    # ---- LayerNorm 2 + MLP (QuickGELU) ----
    mu2 = jnp.mean(x, axis=-1, keepdims=True)
    var2 = jnp.mean(jnp.square(x - mu2), axis=-1, keepdims=True)
    x2 = (x - mu2) * jax.lax.rsqrt(var2 + LN_EPS)
    x2 = x2 * ln2_w[...] + ln2_b[...]
    # TODO(synk): tile wfc/wpr over the 4*D hidden dim (extra grid axis or
    #             pltpu.emit_pipeline) so double-buffered weights fit v7x's
    #             64 MiB VMEM at D ~ 1024.
    hdn = jnp.dot(x2.reshape(M, D).astype(jnp.bfloat16), wfc[...],
                  preferred_element_type=jnp.float32) + bfc[...]        # (M, 4D) f32
    hdn = hdn.astype(ew)
    hdn = hdn * jax.nn.sigmoid(1.702 * hdn)                             # QuickGELU (EUP)
    mlp = jnp.dot(hdn.astype(jnp.bfloat16), wpr[...],
                  preferred_element_type=jnp.float32) + bpr[...]
    x = x + mlp.reshape(Bt, T, D)

    x_scr[...] = x

    # ---- Fused projection head on the last S tokens (last layer only) ----
    @pl.when(layer == n_layers - 1)
    def _():
        x_last = x[:, T - S:, :]                                        # (Bt, S, D) f32
        # Row-form matvec keeps S on the lane axis: (1,D)·(Bt,S,D) -> (1,Bt,S).
        z = jax.lax.dot_general(pw[...], x_last,
                                dimension_numbers=(((1,), (2,)), ((), ())),
                                preferred_element_type=jnp.float32)[0]  # (Bt, S)
        z = z + pb[...]
        z = jnp.where(mask[:, 0, T - S:] > 0.5, NEG_BIG, z)             # masked_fill(-inf)
        sig = jax.nn.sigmoid(z)                                         # (Bt, S) f32
        if S_pad > S:                                                   # lane-dense store
            sig = jnp.concatenate(
                [sig, jnp.zeros((Bt, S_pad - S), sig.dtype)], axis=-1)
        out_ref[...] = sig[:, None, :].astype(out_ref.dtype)


# ----------------------------------------------------------------------------
# Wrapper helpers
# ----------------------------------------------------------------------------
_LAYER_PARAM_NAMES = ("ln1_w", "ln1_b", "wqkv", "bqkv", "wo", "bo",
                      "ln2_w", "ln2_b", "wfc", "bfc", "wpr", "bpr")


def _round_up(x, m):
    return ((x + m - 1) // m) * m


def _vmem_limit_bytes():
    # ~75% of chip VMEM: ~96 MiB on v5e/v6e (128 MiB), ~48 MiB on v7x (64 MiB).
    try:
        cap = pltpu.get_tpu_info().vmem_capacity_bytes
    except Exception:
        cap = 128 * 1024 * 1024
    return int(min(cap * 3 // 4, 100 * 1024 * 1024))


def _use_bf16_elementwise():
    # bf16 EUP (softmax exp / QuickGELU sigmoid) on v6e/v7x; keep f32 on v5e.
    try:
        kind = jax.devices()[0].device_kind.lower()
    except Exception:
        return True
    return not any(t in kind for t in ("v5 lite", "v5e", "v5litepod"))


def _pick_batch_tile(B, T, D):
    # Feed the 256-wide MXU (M = Bt*T >= 256) while keeping >= 2 blocks on the
    # parallel batch axis (v7x's 2 TensorCores) and bounding the f32 activation
    # scratch to ~8 MiB.
    target = max(1, -(-256 // T))
    cap_cores = B // 2 if B >= 2 else B
    cap_vmem = max(1, (8 * 1024 * 1024) // max(1, 4 * T * D))
    limit = max(1, min(target, cap_cores, cap_vmem, B))
    bt = 1
    for cand in range(1, limit + 1):
        if B % cand == 0:
            bt = cand
    return bt


# ----------------------------------------------------------------------------
# Full SolutionDecoder forward
# ----------------------------------------------------------------------------
def solution_decoder_forward(params, mip_features, x_features, key_padding_mask,
                             n_heads):
    B, S, D = mip_features.shape
    T = 2 * S
    L = params["wqkv"].shape[0]
    Bt = _pick_batch_tile(B, T, D)
    S_pad = _round_up(S, 128)

    y = jnp.concatenate([mip_features, x_features], axis=1)             # (B, T, D)
    mask_f = key_padding_mask.astype(jnp.float32)                       # (B, S)
    cat_mask = jnp.concatenate([mask_f, mask_f], axis=1)[:, None, :]    # (B, 1, T)

    layer_args = [params[name] for name in _LAYER_PARAM_NAMES]

    def layer_spec(p):
        blk = (pl.Squeezed(),) + p.shape[1:]                 # drop layer dim in kernel
        return pl.BlockSpec(blk, lambda b, l: (l, 0, 0))

    in_specs = (
        [pl.BlockSpec((Bt, 1, T), lambda b, l: (b, 0, 0)),    # key padding mask
         pl.BlockSpec((Bt, T, D), lambda b, l: (b, 0, 0))]    # initial activation
        + [layer_spec(p) for p in layer_args]                  # stacked layer weights
        + [pl.BlockSpec((1, D), lambda b, l: (0, 0)),          # proj w (row form)
           pl.BlockSpec((1, 1), lambda b, l: (0, 0))]          # proj b
    )

    kernel = functools.partial(_decoder_kernel, n_heads, _use_bf16_elementwise())

    out = pl.pallas_call(
        kernel,
        out_shape=jax.ShapeDtypeStruct((B, 1, S_pad), jnp.float32),
        grid=(B // Bt, L),
        in_specs=in_specs,
        out_specs=pl.BlockSpec((Bt, 1, S_pad), lambda b, l: (b, 0, 0)),
        scratch_shapes=[pltpu.VMEM((Bt, T, D), jnp.float32)],
        compiler_params=pltpu.CompilerParams(
            dimension_semantics=("parallel", "arbitrary"),
            vmem_limit_bytes=_vmem_limit_bytes(),
        ),
    )(cat_mask, y, *layer_args, params["proj_w"], params["proj_b"])

    z = out[:, 0, :S]                                                    # (B, S)
    # torch.masked_select -> data-dependent output size; done with eager
    # boolean indexing outside the kernel.
    # TODO(synk): not jit-compatible (data-dependent size); return (z, mask)
    #             or a fixed-capacity gather if this forward is ever jitted.
    sols = z[jnp.logical_not(key_padding_mask)]
    return sols


# ----------------------------------------------------------------------------
# Deterministic parameter construction (shapes follow the PyTorch module).
# Matmul weights live in bf16 (MXU-native, half the VMEM/DMA traffic);
# LN params / biases / projection head stay f32.
# NOTE: weights assume right-multiplication layout (D, 3D)/(D, D)/(D, 4D);
#       a port from trained nn.MultiheadAttention must transpose its weights.
# ----------------------------------------------------------------------------
def init_params(key, attn_dim, n_layers):
    D, L = attn_dim, n_layers
    ks = jax.random.split(key, 6)
    s = 0.05
    return {
        "ln1_w": jnp.ones((L, 1, D), jnp.float32),
        "ln1_b": jnp.zeros((L, 1, D), jnp.float32),
        "wqkv": (s * jax.random.normal(ks[0], (L, D, 3 * D))).astype(jnp.bfloat16),
        "bqkv": jnp.zeros((L, 1, 3 * D), jnp.float32),
        "wo":   (s * jax.random.normal(ks[1], (L, D, D))).astype(jnp.bfloat16),
        "bo":   jnp.zeros((L, 1, D), jnp.float32),
        "ln2_w": jnp.ones((L, 1, D), jnp.float32),
        "ln2_b": jnp.zeros((L, 1, D), jnp.float32),
        "wfc":  (s * jax.random.normal(ks[2], (L, D, 4 * D))).astype(jnp.bfloat16),
        "bfc":  jnp.zeros((L, 1, 4 * D), jnp.float32),
        "wpr":  (s * jax.random.normal(ks[3], (L, 4 * D, D))).astype(jnp.bfloat16),
        "bpr":  jnp.zeros((L, 1, D), jnp.float32),
        "proj_w": 0.05 * jax.random.normal(ks[4], (1, D), jnp.float32),
        "proj_b": 0.05 * jax.random.normal(ks[5], (1, 1), jnp.float32),
    }


# ----------------------------------------------------------------------------
# Main
# ----------------------------------------------------------------------------
if __name__ == "__main__":
    B, S, D = 2, 8, 32
    n_heads, n_layers = 4, 2

    key = jax.random.PRNGKey(0)
    k1, k2, k3 = jax.random.split(key, 3)

    mip_features = jax.random.normal(k1, (B, S, D), jnp.float32)
    x_features = jax.random.normal(k2, (B, S, D), jnp.float32)
    # batch 0: no padding, batch 1: last 2 positions padded
    lengths = jnp.array([S, S - 2])
    key_padding_mask = jnp.arange(S)[None, :] >= lengths[:, None]        # (B, S) bool

    params = init_params(k3, D, n_layers)

    sols = solution_decoder_forward(params, mip_features, x_features,
                                    key_padding_mask, n_heads)
    jax.block_until_ready(sols)

    expected_len = int(jnp.sum(jnp.logical_not(key_padding_mask)))
    assert sols.shape == (expected_len,)
    assert bool(jnp.all(jnp.isfinite(sols)))
    assert bool(jnp.all((sols >= 0.0) & (sols <= 1.0)))
    print("KERNEL_OK")
</pallas_src>

<mosaic_0001>
module attributes {stable_mosaic.version = 11 : i64} {
  func.func @_decoder_kernel(%arg0: i32, %arg1: i32, %arg2: memref<1x1x16xf32, #tpu.memory_space<vmem>>, %arg3: memref<1x16x32xf32, #tpu.memory_space<vmem>>, %arg4: memref<1x1x32xf32, #tpu.memory_space<vmem>>, %arg5: memref<1x1x32xf32, #tpu.memory_space<vmem>>, %arg6: memref<1x32x96xbf16, #tpu.memory_space<vmem>>, %arg7: memref<1x1x96xf32, #tpu.memory_space<vmem>>, %arg8: memref<1x32x32xbf16, #tpu.memory_space<vmem>>, %arg9: memref<1x1x32xf32, #tpu.memory_space<vmem>>, %arg10: memref<1x1x32xf32, #tpu.memory_space<vmem>>, %arg11: memref<1x1x32xf32, #tpu.memory_space<vmem>>, %arg12: memref<1x32x128xbf16, #tpu.memory_space<vmem>>, %arg13: memref<1x1x128xf32, #tpu.memory_space<vmem>>, %arg14: memref<1x128x32xbf16, #tpu.memory_space<vmem>>, %arg15: memref<1x1x32xf32, #tpu.memory_space<vmem>>, %arg16: memref<1x32xf32, #tpu.memory_space<vmem>>, %arg17: memref<1x1xf32, #tpu.memory_space<vmem>>, %arg18: memref<1x1x128xf32, #tpu.memory_space<vmem>>, %arg19: memref<1x16x32xf32, #tpu.memory_space<vmem>>) attributes {dimension_semantics = [#tpu.dimension_semantics<parallel>, #tpu.dimension_semantics<arbitrary>], iteration_bounds = array<i64: 2, 2>, scalar_prefetch = 0 : i64, scratch_operands = 1 : i64, tpu.core_type = #tpu.core_type<tc>, window_params = [{transform_indices = @transform_0, window_bounds = array<i64: 1, 1, 16>}, {transform_indices = @transform_1, window_bounds = array<i64: 1, 16, 32>}, {transform_indices = @transform_2, window_bounds = array<i64: 1, 1, 32>}, {transform_indices = @transform_3, window_bounds = array<i64: 1, 1, 32>}, {transform_indices = @transform_4, window_bounds = array<i64: 1, 32, 96>}, {transform_indices = @transform_5, window_bounds = array<i64: 1, 1, 96>}, {transform_indices = @transform_6, window_bounds = array<i64: 1, 32, 32>}, {transform_indices = @transform_7, window_bounds = array<i64: 1, 1, 32>}, {transform_indices = @transform_8, window_bounds = array<i64: 1, 1, 32>}, {transform_indices = @transform_9, window_bounds = array<i64: 1, 1, 32>}, {transform_indices = @transform_10, window_bounds = array<i64: 1, 32, 128>}, {transform_indices = @transform_11, window_bounds = array<i64: 1, 1, 128>}, {transform_indices = @transform_12, window_bounds = array<i64: 1, 128, 32>}, {transform_indices = @transform_13, window_bounds = array<i64: 1, 1, 32>}, {pipeline_mode = #tpu.pipeline_mode<synchronous>, transform_indices = @transform_14, window_bounds = array<i64: 1, 32>}, {pipeline_mode = #tpu.pipeline_mode<synchronous>, transform_indices = @transform_15, window_bounds = array<i64: 1, 1>}, {transform_indices = @transform_16, window_bounds = array<i64: 1, 1, 128>}]} {
    %c0_i32 = arith.constant 0 : i32
    %0 = arith.cmpi eq, %arg1, %c0_i32 : i32
    %1 = arith.extui %0 : i1 to i32
    %c0_i32_0 = arith.constant 0 : i32
    %2 = arith.cmpi ne, %1, %c0_i32_0 : i32
    scf.if %2 {
      %c0_68 = arith.constant 0 : index
      %c0_69 = arith.constant 0 : index
      %c0_70 = arith.constant 0 : index
      %155 = vector.load %arg3[%c0_68, %c0_69, %c0_70] : memref<1x16x32xf32, #tpu.memory_space<vmem>>, vector<1x16x32xf32>
      %c0_71 = arith.constant 0 : index
      %c0_72 = arith.constant 0 : index
      %c0_73 = arith.constant 0 : index
      %156 = vector.load %arg19[%c0_71, %c0_72, %c0_73] : memref<1x16x32xf32, #tpu.memory_space<vmem>>, vector<1x16x32xf32>
      tpu.vector_store %arg19[%c0_71, %c0_72, %c0_73], %155 {strides = array<i32>} : memref<1x16x32xf32, #tpu.memory_space<vmem>>, vector<1x16x32xf32>,
    } else {
    }
    %c0 = arith.constant 0 : index
    %c0_1 = arith.constant 0 : index
    %c0_2 = arith.constant 0 : index
    %3 = vector.load %arg19[%c0, %c0_1, %c0_2] : memref<1x16x32xf32, #tpu.memory_space<vmem>>, vector<1x16x32xf32>
    %c0_3 = arith.constant 0 : index
    %c0_4 = arith.constant 0 : index
    %c0_5 = arith.constant 0 : index
    %4 = vector.load %arg2[%c0_3, %c0_4, %c0_5] : memref<1x1x16xf32, #tpu.memory_space<vmem>>, vector<1x1x16xf32>
    %cst = arith.constant dense<0.000000e+00> : vector<1x16xf32>
    %5 = vector.multi_reduction <add>, %3, %cst [2] : vector<1x16x32xf32> to vector<1x16xf32>
    %6 = vector.shape_cast %5 : vector<1x16xf32> to vector<1x16x1xf32>
    %cst_6 = arith.constant 3.200000e+01 : f32
    %7 = vector.broadcast %cst_6 : f32 to vector<1x16x1xf32>
    %8 = arith.divf %6, %7 : vector<1x16x1xf32>
    %9 = vector.broadcast %8 : vector<1x16x1xf32> to vector<1x16x32xf32>
    %10 = arith.subf %3, %9 : vector<1x16x32xf32>
    %11 = arith.mulf %10, %10 : vector<1x16x32xf32>
    %cst_7 = arith.constant dense<0.000000e+00> : vector<1x16xf32>
    %12 = vector.multi_reduction <add>, %11, %cst_7 [2] : vector<1x16x32xf32> to vector<1x16xf32>
    %13 = vector.shape_cast %12 : vector<1x16xf32> to vector<1x16x1xf32>
    %cst_8 = arith.constant 3.200000e+01 : f32
    %14 = vector.broadcast %cst_8 : f32 to vector<1x16x1xf32>
    %15 = arith.divf %13, %14 : vector<1x16x1xf32>
    %16 = vector.broadcast %8 : vector<1x16x1xf32> to vector<1x16x32xf32>
    %17 = arith.subf %3, %16 : vector<1x16x32xf32>
    %cst_9 = arith.constant 9.99999974E-6 : f32
    %18 = vector.broadcast %cst_9 : f32 to vector<1x16x1xf32>
    %19 = arith.addf %15, %18 : vector<1x16x1xf32>
    %20 = math.rsqrt %19 : vector<1x16x1xf32>
    %21 = vector.broadcast %20 : vector<1x16x1xf32> to vector<1x16x32xf32>
    %22 = arith.mulf %17, %21 : vector<1x16x32xf32>
    %c0_10 = arith.constant 0 : index
    %c0_11 = arith.constant 0 : index
    %c0_12 = arith.constant 0 : index
    %23 = vector.load %arg4[%c0_10, %c0_11, %c0_12] : memref<1x1x32xf32, #tpu.memory_space<vmem>>, vector<1x1x32xf32>
    %24 = vector.shape_cast %23 : vector<1x1x32xf32> to vector<1x32xf32>
    %25 = vector.shape_cast %24 : vector<1x32xf32> to vector<1x1x32xf32>
    %26 = vector.broadcast %25 : vector<1x1x32xf32> to vector<1x16x32xf32>
    %27 = arith.mulf %22, %26 : vector<1x16x32xf32>
    %c0_13 = arith.constant 0 : index
    %c0_14 = arith.constant 0 : index
    %c0_15 = arith.constant 0 : index
    %28 = vector.load %arg5[%c0_13, %c0_14, %c0_15] : memref<1x1x32xf32, #tpu.memory_space<vmem>>, vector<1x1x32xf32>
    %29 = vector.shape_cast %28 : vector<1x1x32xf32> to vector<1x32xf32>
    %30 = vector.shape_cast %29 : vector<1x32xf32> to vector<1x1x32xf32>
    %31 = vector.broadcast %30 : vector<1x1x32xf32> to vector<1x16x32xf32>
    %32 = arith.addf %27, %31 : vector<1x16x32xf32>
    %33 = vector.shape_cast %32 : vector<1x16x32xf32> to vector<16x32xf32>
    %34 = arith.truncf %33 : vector<16x32xf32> to vector<16x32xbf16>
    %c0_16 = arith.constant 0 : index
    %c0_17 = arith.constant 0 : index
    %c0_18 = arith.constant 0 : index
    %35 = vector.load %arg6[%c0_16, %c0_17, %c0_18] : memref<1x32x96xbf16, #tpu.memory_space<vmem>>, vector<1x32x96xbf16>
    %36 = vector.shape_cast %35 : vector<1x32x96xbf16> to vector<32x96xbf16>
    %cst_19 = arith.constant dense<0.000000e+00> : vector<16x96xf32>
    %37 = tpu.matmul %34, %36, %cst_19 {dimension_numbers = #tpu.dot_dimension_numbers<[1], [0], [0], [1], [0, 0, 1, 1], [], []>} : vector<16x32xbf16>, vector<32x96xbf16>, vector<16x96xf32> -> vector<16x96xf32>
    %c0_20 = arith.constant 0 : index
    %c0_21 = arith.constant 0 : index
    %c0_22 = arith.constant 0 : index
    %38 = vector.load %arg7[%c0_20, %c0_21, %c0_22] : memref<1x1x96xf32, #tpu.memory_space<vmem>>, vector<1x1x96xf32>
    %39 = vector.shape_cast %38 : vector<1x1x96xf32> to vector<1x96xf32>
    %40 = vector.broadcast %39 : vector<1x96xf32> to vector<16x96xf32>
    %41 = arith.addf %37, %40 : vector<16x96xf32>
    %42 = vector.extract_strided_slice %41 {offsets = [0, 0], sizes = [16, 32], strides = [1, 1]} : vector<16x96xf32> to vector<16x32xf32>
    %43 = vector.extract_strided_slice %41 {offsets = [0, 32], sizes = [16, 32], strides = [1, 1]} : vector<16x96xf32> to vector<16x32xf32>
    %44 = vector.extract_strided_slice %41 {offsets = [0, 64], sizes = [16, 32], strides = [1, 1]} : vector<16x96xf32> to vector<16x32xf32>
    %45 = vector.shape_cast %42 : vector<16x32xf32> to vector<1x16x4x8xf32>
    %46 = tpu.transpose %45, [0, 2, 1, 3] : vector<1x16x4x8xf32> -> vector<1x4x16x8xf32>
    %47 = vector.shape_cast %46 : vector<1x4x16x8xf32> to vector<4x16x8xf32>
    %48 = arith.truncf %47 : vector<4x16x8xf32> to vector<4x16x8xbf16>
    %49 = vector.shape_cast %43 : vector<16x32xf32> to vector<1x16x4x8xf32>
    %50 = tpu.transpose %49, [0, 2, 3, 1] : vector<1x16x4x8xf32> -> vector<1x4x8x16xf32>
    %51 = vector.shape_cast %50 : vector<1x4x8x16xf32> to vector<4x8x16xf32>
    %52 = arith.truncf %51 : vector<4x8x16xf32> to vector<4x8x16xbf16>
    %53 = vector.shape_cast %44 : vector<16x32xf32> to vector<1x16x4x8xf32>
    %54 = tpu.transpose %53, [0, 2, 1, 3] : vector<1x16x4x8xf32> -> vector<1x4x16x8xf32>
    %55 = vector.shape_cast %54 : vector<1x4x16x8xf32> to vector<4x16x8xf32>
    %56 = arith.truncf %55 : vector<4x16x8xf32> to vector<4x16x8xbf16>
    "tpu.trace_start"() <{level = 10 : i32, message = "bqd,bdk->bqk"}> : () -> ()
    %cst_23 = arith.constant dense<0.000000e+00> : vector<4x16x16xf32>
    %57 = tpu.matmul %48, %52, %cst_23 {dimension_numbers = #tpu.dot_dimension_numbers<[2], [1], [1], [2], [0, 0, 0, 1, 1, 2], [0], [0]>} : vector<4x16x8xbf16>, vector<4x8x16xbf16>, vector<4x16x16xf32> -> vector<4x16x16xf32>
    "tpu.trace_stop"() : () -> ()
    %cst_24 = arith.constant 0.353553385 : f32
    %58 = vector.broadcast %cst_24 : f32 to vector<4x16x16xf32>
    %59 = arith.mulf %57, %58 : vector<4x16x16xf32>
    %60 = vector.shape_cast %4 : vector<1x1x16xf32> to vector<1x1x16xf32>
    %61 = vector.broadcast %60 : vector<1x1x16xf32> to vector<1x4x16xf32>
    %62 = vector.shape_cast %61 : vector<1x4x16xf32> to vector<4x1x16xf32>
    %cst_25 = arith.constant 5.000000e-01 : f32
    %63 = vector.broadcast %cst_25 : f32 to vector<4x1x16xf32>
    %64 = arith.cmpf ogt, %62, %63 : vector<4x1x16xf32>
    %cst_26 = arith.constant -1.000000e+30 : f32
    %65 = vector.shape_cast %64 : vector<4x1x16xi1> to vector<4x1x16xi1>
    %66 = vector.broadcast %65 : vector<4x1x16xi1> to vector<4x16x16xi1>
    %67 = vector.broadcast %cst_26 : f32 to vector<4x16x16xf32>
    %68 = arith.select %66, %67, %59 : vector<4x16x16xi1>, vector<4x16x16xf32>
    %cst_27 = arith.constant dense<0xFF800000> : vector<4x16xf32>
    %69 = vector.multi_reduction <maximumf>, %68, %cst_27 [2] : vector<4x16x16xf32> to vector<4x16xf32>
    %70 = vector.shape_cast %69 : vector<4x16xf32> to vector<4x16x1xf32>
    %71 = vector.broadcast %70 : vector<4x16x1xf32> to vector<4x16x16xf32>
    %72 = arith.subf %68, %71 : vector<4x16x16xf32>
    %73 = arith.truncf %72 : vector<4x16x16xf32> to vector<4x16x16xbf16>
    %74 = math.exp %73 : vector<4x16x16xbf16>
    %75 = arith.extf %74 : vector<4x16x16xbf16> to vector<4x16x16xf32>
    %cst_28 = arith.constant dense<0.000000e+00> : vector<4x16xf32>
    %76 = vector.multi_reduction <add>, %75, %cst_28 [2] : vector<4x16x16xf32> to vector<4x16xf32>
    %77 = vector.shape_cast %76 : vector<4x16xf32> to vector<4x16x1xf32>
    %78 = tpu.reciprocal %77 {approx = true} : vector<4x16x1xf32> -> vector<4x16x1xf32>
    %79 = arith.truncf %78 : vector<4x16x1xf32> to vector<4x16x1xbf16>
    %80 = vector.broadcast %79 : vector<4x16x1xbf16> to vector<4x16x16xbf16>
    %81 = arith.mulf %74, %80 : vector<4x16x16xbf16>
    "tpu.trace_start"() <{level = 10 : i32, message = "bqk,bkd->bqd"}> : () -> ()
    %cst_29 = arith.constant dense<0.000000e+00> : vector<4x16x8xf32>
    %82 = tpu.matmul %81, %56, %cst_29 {dimension_numbers = #tpu.dot_dimension_numbers<[2], [1], [1], [2], [0, 0, 0, 1, 1, 2], [0], [0]>} : vector<4x16x16xbf16>, vector<4x16x8xbf16>, vector<4x16x8xf32> -> vector<4x16x8xf32>
    "tpu.trace_stop"() : () -> ()
    %83 = vector.shape_cast %82 : vector<4x16x8xf32> to vector<1x4x16x8xf32>
    %84 = tpu.transpose %83, [0, 2, 1, 3] : vector<1x4x16x8xf32> -> vector<1x16x4x8xf32>
    %85 = vector.shape_cast %84 : vector<1x16x4x8xf32> to vector<16x32xf32>
    %86 = arith.truncf %85 : vector<16x32xf32> to vector<16x32xbf16>
    %c0_30 = arith.constant 0 : index
    %c0_31 = arith.constant 0 : index
    %c0_32 = arith.constant 0 : index
    %87 = vector.load %arg8[%c0_30, %c0_31, %c0_32] : memref<1x32x32xbf16, #tpu.memory_space<vmem>>, vector<1x32x32xbf16>
    %88 = vector.shape_cast %87 : vector<1x32x32xbf16> to vector<32x32xbf16>
    %cst_33 = arith.constant dense<0.000000e+00> : vector<16x32xf32>
    %89 = tpu.matmul %86, %88, %cst_33 {dimension_numbers = #tpu.dot_dimension_numbers<[1], [0], [0], [1], [0, 0, 1, 1], [], []>} : vector<16x32xbf16>, vector<32x32xbf16>, vector<16x32xf32> -> vector<16x32xf32>
    %c0_34 = arith.constant 0 : index
    %c0_35 = arith.constant 0 : index
    %c0_36 = arith.constant 0 : index
    %90 = vector.load %arg9[%c0_34, %c0_35, %c0_36] : memref<1x1x32xf32, #tpu.memory_space<vmem>>, vector<1x1x32xf32>
    %91 = vector.shape_cast %90 : vector<1x1x32xf32> to vector<1x32xf32>
    %92 = vector.broadcast %91 : vector<1x32xf32> to vector<16x32xf32>
    %93 = arith.addf %89, %92 : vector<16x32xf32>
    %94 = vector.shape_cast %93 : vector<16x32xf32> to vector<1x16x32xf32>
    %95 = arith.addf %3, %94 : vector<1x16x32xf32>
    %cst_37 = arith.constant dense<0.000000e+00> : vector<1x16xf32>
    %96 = vector.multi_reduction <add>, %95, %cst_37 [2] : vector<1x16x32xf32> to vector<1x16xf32>
    %97 = vector.shape_cast %96 : vector<1x16xf32> to vector<1x16x1xf32>
    %cst_38 = arith.constant 3.200000e+01 : f32
    %98 = vector.broadcast %cst_38 : f32 to vector<1x16x1xf32>
    %99 = arith.divf %97, %98 : vector<1x16x1xf32>
    %100 = vector.broadcast %99 : vector<1x16x1xf32> to vector<1x16x32xf32>
    %101 = arith.subf %95, %100 : vector<1x16x32xf32>
    %102 = arith.mulf %101, %101 : vector<1x16x32xf32>
    %cst_39 = arith.constant dense<0.000000e+00> : vector<1x16xf32>
    %103 = vector.multi_reduction <add>, %102, %cst_39 [2] : vector<1x16x32xf32> to vector<1x16xf32>
    %104 = vector.shape_cast %103 : vector<1x16xf32> to vector<1x16x1xf32>
    %cst_40 = arith.constant 3.200000e+01 : f32
    %105 = vector.broadcast %cst_40 : f32 to vector<1x16x1xf32>
    %106 = arith.divf %104, %105 : vector<1x16x1xf32>
    %107 = vector.broadcast %99 : vector<1x16x1xf32> to vector<1x16x32xf32>
    %108 = arith.subf %95, %107 : vector<1x16x32xf32>
    %cst_41 = arith.constant 9.99999974E-6 : f32
    %109 = vector.broadcast %cst_41 : f32 to vector<1x16x1xf32>
    %110 = arith.addf %106, %109 : vector<1x16x1xf32>
    %111 = math.rsqrt %110 : vector<1x16x1xf32>
    %112 = vector.broadcast %111 : vector<1x16x1xf32> to vector<1x16x32xf32>
    %113 = arith.mulf %108, %112 : vector<1x16x32xf32>
    %c0_42 = arith.constant 0 : index
    %c0_43 = arith.constant 0 : index
    %c0_44 = arith.constant 0 : index
    %114 = vector.load %arg10[%c0_42, %c0_43, %c0_44] : memref<1x1x32xf32, #tpu.memory_space<vmem>>, vector<1x1x32xf32>
    %115 = vector.shape_cast %114 : vector<1x1x32xf32> to vector<1x32xf32>
    %116 = vector.shape_cast %115 : vector<1x32xf32> to vector<1x1x32xf32>
    %117 = vector.broadcast %116 : vector<1x1x32xf32> to vector<1x16x32xf32>
    %118 = arith.mulf %113, %117 : vector<1x16x32xf32>
    %c0_45 = arith.constant 0 : index
    %c0_46 = arith.constant 0 : index
    %c0_47 = arith.constant 0 : index
    %119 = vector.load %arg11[%c0_45, %c0_46, %c0_47] : memref<1x1x32xf32, #tpu.memory_space<vmem>>, vector<1x1x32xf32>
    %120 = vector.shape_cast %119 : vector<1x1x32xf32> to vector<1x32xf32>
    %121 = vector.shape_cast %120 : vector<1x32xf32> to vector<1x1x32xf32>
    %122 = vector.broadcast %121 : vector<1x1x32xf32> to vector<1x16x32xf32>
    %123 = arith.addf %118, %122 : vector<1x16x32xf32>
    %124 = vector.shape_cast %123 : vector<1x16x32xf32> to vector<16x32xf32>
    %125 = arith.truncf %124 : vector<16x32xf32> to vector<16x32xbf16>
    %c0_48 = arith.constant 0 : index
    %c0_49 = arith.constant 0 : index
    %c0_50 = arith.constant 0 : index
    %126 = vector.load %arg12[%c0_48, %c0_49, %c0_50] : memref<1x32x128xbf16, #tpu.memory_space<vmem>>, vector<1x32x128xbf16>
    %127 = vector.shape_cast %126 : vector<1x32x128xbf16> to vector<32x128xbf16>
    %cst_51 = arith.constant dense<0.000000e+00> : vector<16x128xf32>
    %128 = tpu.matmul %125, %127, %cst_51 {dimension_numbers = #tpu.dot_dimension_numbers<[1], [0], [0], [1], [0, 0, 1, 1], [], []>} : vector<16x32xbf16>, vector<32x128xbf16>, vector<16x128xf32> -> vector<16x128xf32>
    %c0_52 = arith.constant 0 : index
    %c0_53 = arith.constant 0 : index
    %c0_54 = arith.constant 0 : index
    %129 = vector.load %arg13[%c0_52, %c0_53, %c0_54] : memref<1x1x128xf32, #tpu.memory_space<vmem>>, vector<1x1x128xf32>
    %130 = vector.shape_cast %129 : vector<1x1x128xf32> to vector<1x128xf32>
    %131 = vector.broadcast %130 : vector<1x128xf32> to vector<16x128xf32>
    %132 = arith.addf %128, %131 : vector<16x128xf32>
    %133 = arith.truncf %132 : vector<16x128xf32> to vector<16x128xbf16>
    %cst_55 = arith.constant 1.703130e+00 : bf16
    %134 = vector.broadcast %cst_55 : bf16 to vector<16x128xbf16>
    %135 = arith.mulf %134, %133 : vector<16x128xbf16>
    %136 = arith.negf %135 : vector<16x128xbf16>
    %137 = math.exp %136 : vector<16x128xbf16>
    %cst_56 = arith.constant 1.000000e+00 : bf16
    %138 = vector.broadcast %cst_56 : bf16 to vector<16x128xbf16>
    %139 = arith.addf %138, %137 : vector<16x128xbf16>
    %140 = arith.divf %138, %139 : vector<16x128xbf16>
    %141 = arith.mulf %133, %140 : vector<16x128xbf16>
    %c0_57 = arith.constant 0 : index
    %c0_58 = arith.constant 0 : index
    %c0_59 = arith.constant 0 : index
    %142 = vector.load %arg14[%c0_57, %c0_58, %c0_59] : memref<1x128x32xbf16, #tpu.memory_space<vmem>>, vector<1x128x32xbf16>
    %143 = vector.shape_cast %142 : vector<1x128x32xbf16> to vector<128x32xbf16>
    %cst_60 = arith.constant dense<0.000000e+00> : vector<16x32xf32>
    %144 = tpu.matmul %141, %143, %cst_60 {dimension_numbers = #tpu.dot_dimension_numbers<[1], [0], [0], [1], [0, 0, 1, 1], [], []>} : vector<16x128xbf16>, vector<128x32xbf16>, vector<16x32xf32> -> vector<16x32xf32>
    %c0_61 = arith.constant 0 : index
    %c0_62 = arith.constant 0 : index
    %c0_63 = arith.constant 0 : index
    %145 = vector.load %arg15[%c0_61, %c0_62, %c0_63] : memref<1x1x32xf32, #tpu.memory_space<vmem>>, vector<1x1x32xf32>
    %146 = vector.shape_cast %145 : vector<1x1x32xf32> to vector<1x32xf32>
    %147 = vector.broadcast %146 : vector<1x32xf32> to vector<16x32xf32>
    %148 = arith.addf %144, %147 : vector<16x32xf32>
    %149 = vector.shape_cast %148 : vector<16x32xf32> to vector<1x16x32xf32>
    %150 = arith.addf %95, %149 : vector<1x16x32xf32>
    %c0_64 = arith.constant 0 : index
    %c0_65 = arith.constant 0 : index
    %c0_66 = arith.constant 0 : index
    %151 = vector.load %arg19[%c0_64, %c0_65, %c0_66] : memref<1x16x32xf32, #tpu.memory_space<vmem>>, vector<1x16x32xf32>
    tpu.vector_store %arg19[%c0_64, %c0_65, %c0_66], %150 {strides = array<i32>} : memref<1x16x32xf32, #tpu.memory_space<vmem>>, vector<1x16x32xf32>,
    %c1_i32 = arith.constant 1 : i32
    %152 = arith.cmpi eq, %arg1, %c1_i32 : i32
    %153 = arith.extui %152 : i1 to i32
    %c0_i32_67 = arith.constant 0 : i32
    %154 = arith.cmpi ne, %153, %c0_i32_67 : i32
    scf.if %154 {
      %155 = vector.extract_strided_slice %150 {offsets = [0, 8, 0], sizes = [1, 8, 32], strides = [1, 1, 1]} : vector<1x16x32xf32> to vector<1x8x32xf32>
      %c0_68 = arith.constant 0 : index
      %c0_69 = arith.constant 0 : index
      %156 = vector.load %arg16[%c0_68, %c0_69] : memref<1x32xf32, #tpu.memory_space<vmem>>, vector<1x32xf32>
      %cst_70 = arith.constant dense<0.000000e+00> : vector<1x1x8xf32>
      %157 = tpu.matmul %156, %155, %cst_70 {dimension_numbers = #tpu.dot_dimension_numbers<[1], [2], [0], [0, 1], [0, 0, 1, 0, 1, 1], [], []>} : vector<1x32xf32>, vector<1x8x32xf32>, vector<1x1x8xf32> -> vector<1x1x8xf32>
      %158 = vector.shape_cast %157 : vector<1x1x8xf32> to vector<1x8xf32>
      %c0_71 = arith.constant 0 : index
      %c0_72 = arith.constant 0 : index
      %159 = vector.load %arg17[%c0_71, %c0_72] : memref<1x1xf32, #tpu.memory_space<vmem>>, vector<1x1xf32>
      %160 = vector.broadcast %159 : vector<1x1xf32> to vector<1x8xf32>
      %161 = arith.addf %158, %160 : vector<1x8xf32>
      %162 = vector.extract_strided_slice %4 {offsets = [0, 0, 8], sizes = [1, 1, 8], strides = [1, 1, 1]} : vector<1x1x16xf32> to vector<1x1x8xf32>
      %163 = vector.shape_cast %162 : vector<1x1x8xf32> to vector<1x8xf32>
      %cst_73 = arith.constant 5.000000e-01 : f32
      %164 = vector.broadcast %cst_73 : f32 to vector<1x8xf32>
      %165 = arith.cmpf ogt, %163, %164 : vector<1x8xf32>
      %cst_74 = arith.constant -1.000000e+30 : f32
      %166 = vector.broadcast %cst_74 : f32 to vector<1x8xf32>
      %167 = arith.select %165, %166, %161 : vector<1x8xi1>, vector<1x8xf32>
      %168 = arith.negf %167 : vector<1x8xf32>
      %169 = math.exp %168 : vector<1x8xf32>
      %cst_75 = arith.constant 1.000000e+00 : f32
      %170 = vector.broadcast %cst_75 : f32 to vector<1x8xf32>
      %171 = arith.addf %170, %169 : vector<1x8xf32>
      %172 = arith.divf %170, %171 : vector<1x8xf32>
      %cst_76 = arith.constant 0.000000e+00 : f32
      %173 = vector.broadcast %cst_76 : f32 to vector<1x120xf32>
      %174 = tpu.concatenate %172, %173 in 1 : vector<1x8xf32>, vector<1x120xf32> -> vector<1x128xf32>
      %175 = vector.shape_cast %174 : vector<1x128xf32> to vector<1x1x128xf32>
      %c0_77 = arith.constant 0 : index
      %c0_78 = arith.constant 0 : index
      %c0_79 = arith.constant 0 : index
      %176 = vector.load %arg18[%c0_77, %c0_78, %c0_79] : memref<1x1x128xf32, #tpu.memory_space<vmem>>, vector<1x1x128xf32>
      tpu.vector_store %arg18[%c0_77, %c0_78, %c0_79], %175 {strides = array<i32>} : memref<1x1x128xf32, #tpu.memory_space<vmem>>, vector<1x1x128xf32>,
    } else {
    }
    return
  }
  func.func @transform_0(%arg0: i32, %arg1: i32) -> (i32, i32, i32) {
    %c0_i32 = arith.constant 0 : i32
    %c0_i32_0 = arith.constant 0 : i32
    %c0_i32_1 = arith.constant 0 : i32
    return %arg0, %c0_i32, %c0_i32_0 : i32, i32, i32
  }
  func.func @transform_1(%arg0: i32, %arg1: i32) -> (i32, i32, i32) {
    %c0_i32 = arith.constant 0 : i32
    %c0_i32_0 = arith.constant 0 : i32
    %c0_i32_1 = arith.constant 0 : i32
    return %arg0, %c0_i32, %c0_i32_0 : i32, i32, i32
  }
  func.func @transform_2(%arg0: i32, %arg1: i32) -> (i32, i32, i32) {
    %c0_i32 = arith.constant 0 : i32
    %c0_i32_0 = arith.constant 0 : i32
    %c0_i32_1 = arith.constant 0 : i32
    return %arg1, %c0_i32, %c0_i32_0 : i32, i32, i32
  }
  func.func @transform_3(%arg0: i32, %arg1: i32) -> (i32, i32, i32) {
    %c0_i32 = arith.constant 0 : i32
    %c0_i32_0 = arith.constant 0 : i32
    %c0_i32_1 = arith.constant 0 : i32
    return %arg1, %c0_i32, %c0_i32_0 : i32, i32, i32
  }
  func.func @transform_4(%arg0: i32, %arg1: i32) -> (i32, i32, i32) {
    %c0_i32 = arith.constant 0 : i32
    %c0_i32_0 = arith.constant 0 : i32
    %c0_i32_1 = arith.constant 0 : i32
    return %arg1, %c0_i32, %c0_i32_0 : i32, i32, i32
  }
  func.func @transform_5(%arg0: i32, %arg1: i32) -> (i32, i32, i32) {
    %c0_i32 = arith.constant 0 : i32
    %c0_i32_0 = arith.constant 0 : i32
    %c0_i32_1 = arith.constant 0 : i32
    return %arg1, %c0_i32, %c0_i32_0 : i32, i32, i32
  }
  func.func @transform_6(%arg0: i32, %arg1: i32) -> (i32, i32, i32) {
    %c0_i32 = arith.constant 0 : i32
    %c0_i32_0 = arith.constant 0 : i32
    %c0_i32_1 = arith.constant 0 : i32
    return %arg1, %c0_i32, %c0_i32_0 : i32, i32, i32
  }
  func.func @transform_7(%arg0: i32, %arg1: i32) -> (i32, i32, i32) {
    %c0_i32 = arith.constant 0 : i32
    %c0_i32_0 = arith.constant 0 : i32
    %c0_i32_1 = arith.constant 0 : i32
    return %arg1, %c0_i32, %c0_i32_0 : i32, i32, i32
  }
  func.func @transform_8(%arg0: i32, %arg1: i32) -> (i32, i32, i32) {
    %c0_i32 = arith.constant 0 : i32
    %c0_i32_0 = arith.constant 0 : i32
    %c0_i32_1 = arith.constant 0 : i32
    return %arg1, %c0_i32, %c0_i32_0 : i32, i32, i32
  }
  func.func @transform_9(%arg0: i32, %arg1: i32) -> (i32, i32, i32) {
    %c0_i32 = arith.constant 0 : i32
    %c0_i32_0 = arith.constant 0 : i32
    %c0_i32_1 = arith.constant 0 : i32
    return %arg1, %c0_i32, %c0_i32_0 : i32, i32, i32
  }
  func.func @transform_10(%arg0: i32, %arg1: i32) -> (i32, i32, i32) {
    %c0_i32 = arith.constant 0 : i32
    %c0_i32_0 = arith.constant 0 : i32
    %c0_i32_1 = arith.constant 0 : i32
    return %arg1, %c0_i32, %c0_i32_0 : i32, i32, i32
  }
  func.func @transform_11(%arg0: i32, %arg1: i32) -> (i32, i32, i32) {
    %c0_i32 = arith.constant 0 : i32
    %c0_i32_0 = arith.constant 0 : i32
    %c0_i32_1 = arith.constant 0 : i32
    return %arg1, %c0_i32, %c0_i32_0 : i32, i32, i32
  }
  func.func @transform_12(%arg0: i32, %arg1: i32) -> (i32, i32, i32) {
    %c0_i32 = arith.constant 0 : i32
    %c0_i32_0 = arith.constant 0 : i32
    %c0_i32_1 = arith.constant 0 : i32
    return %arg1, %c0_i32, %c0_i32_0 : i32, i32, i32
  }
  func.func @transform_13(%arg0: i32, %arg1: i32) -> (i32, i32, i32) {
    %c0_i32 = arith.constant 0 : i32
    %c0_i32_0 = arith.constant 0 : i32
    %c0_i32_1 = arith.constant 0 : i32
    return %arg1, %c0_i32, %c0_i32_0 : i32, i32, i32
  }
  func.func @transform_14(%arg0: i32, %arg1: i32) -> (i32, i32) {
    %c0_i32 = arith.constant 0 : i32
    %c0_i32_0 = arith.constant 0 : i32
    %c0_i32_1 = arith.constant 0 : i32
    return %c0_i32, %c0_i32_0 : i32, i32
  }
  func.func @transform_15(%arg0: i32, %arg1: i32) -> (i32, i32) {
    %c0_i32 = arith.constant 0 : i32
    %c0_i32_0 = arith.constant 0 : i32
    %c0_i32_1 = arith.constant 0 : i32
    return %c0_i32, %c0_i32_0 : i32, i32
  }
  func.func @transform_16(%arg0: i32, %arg1: i32) -> (i32, i32, i32) {
    %c0_i32 = arith.constant 0 : i32
    %c0_i32_0 = arith.constant 0 : i32
    %c0_i32_1 = arith.constant 0 : i32
    return %arg0, %c0_i32, %c0_i32_0 : i32, i32, i32
  }
}

</mosaic_0001>

<bundles_post_ra>
// kernel: tpu_custom_call.1
= control target key start
LH: loop header
LB: loop body
LE: loop exit
PB: predicated region body
PF: predicated region fallthrough
CT: control target
= control target key end

     0   :  { %s6936_s0 = inlined_call_operand.hbm [shape: f32[2,1,16], index: 0, kind: input, shape index: {}]   ;;  %s6937_s1 = inlined_call_operand.hbm [shape: f32[2,16,32], index: 1, kind: input, shape index: {}]   ;;  %s6938_s2 = inlined_call_operand.hbm [shape: f32[2,1,32], index: 2, kind: input, shape index: {}]   ;;  %s6939_s3 = inlined_call_operand.hbm [shape: f32[2,1,32], index: 3, kind: input, shape index: {}]   ;;  %s6940_s4 = inlined_call_operand.hbm [shape: bf16[2,32,96], index: 4, kind: input, shape index: {}]   ;;  %s6941_s5 = inlined_call_operand.hbm [shape: f32[2,1,96], index: 5, kind: input, shape index: {}]   ;;  %s6942_s6 = inlined_call_operand.hbm [shape: bf16[2,32,32], index: 6, kind: input, shape index: {}]   ;;  %s6943_s7 = inlined_call_operand.hbm [shape: f32[2,1,32], index: 7, kind: input, shape index: {}]   ;;  %s6944_s8 = inlined_call_operand.hbm [shape: f32[2,1,32], index: 8, kind: input, shape index: {}]   ;;  %s6945_s9 = inlined_call_operand.hbm [shape: f32[2,1,32], index: 9, kind: input, shape index: {}]   ;;  %s6946_s10 = inlined_call_operand.hbm [shape: bf16[2,32,128], index: 10, kind: input, shape index: {}]   ;;  %s6947_s11 = inlined_call_operand.hbm [shape: f32[2,1,128], index: 11, kind: input, shape index: {}]   ;;  %s6948_s12 = inlined_call_operand.hbm [shape: bf16[2,128,32], index: 12, kind: input, shape index: {}]   ;;  %s6949_s13 = inlined_call_operand.hbm [shape: f32[2,1,32], index: 13, kind: input, shape index: {}]   ;;  %s6950_s14 = inlined_call_operand.hbm [shape: f32[1,32], index: 14, kind: input, shape index: {}]   ;;  %s6951_s15 = inlined_call_operand.<no memory space> [shape: f32[1,1], index: 15, kind: input, shape index: {}]   ;;  %s6952_s16 = inlined_call_operand.hbm [shape: f32[2,1,128], index: 16, kind: output, shape index: {}]  }
   0x1   :  { %6992 = sst [smem:[#allocation54_spill]] %s6936_s0  ;;  %v21_v0 = vstv %s6951_s15 }
   0x2   :  { %6993 = sst [smem:[#allocation55_spill]] %s6937_s1  ;;  %22 = vst [vmem:[#allocation3] sm:$0x1] %v21_v0 }
   0x3   :  { %6994 = sst [smem:[#allocation56_spill]] %s6938_s2 }
   0x4   :  { %6995 = sst [smem:[#allocation57_spill]] %s6939_s3 }
   0x5   :  { %6996 = sst [smem:[#allocation58_spill]] %s6940_s4 }
   0x6   :  { %6997 = sst [smem:[#allocation59_spill]] %s6941_s5 }
   0x7   :  { %6998 = sst [smem:[#allocation60_spill]] %s6942_s6 }
   0x8   :  { %6999 = sst [smem:[#allocation61_spill]] %s6943_s7 }
   0x9   :  { %7000 = sst [smem:[#allocation62_spill]] %s6944_s8 }
   0xa   :  { %7001 = sst [smem:[#allocation63_spill]] %s6945_s9 }
   0xb   :  { %7002 = sst [smem:[#allocation64_spill]] %s6946_s10 }
   0xc   :  { %7003 = sst [smem:[#allocation65_spill]] %s6947_s11 }
   0xd   :  { %7004 = sst [smem:[#allocation66_spill]] %s6948_s12 }
   0xe   :  { %7005 = sst [smem:[#allocation67_spill]] %s6949_s13 }
   0xf   :  { %7006 = sst [smem:[#allocation68_spill]] %s6950_s14 }
  0x10   :  { %7007 = sst [smem:[#allocation69_spill]] %s6952_s16 }
  0x11   :  { %23 = vsyncpa [#allocation5], 0 }
  0x12   :  { %25 = vsyncpa [#allocation5 + $0x1], 0 }
  0x13   :  { %26 = vsyncpa [#allocation8], 0 }
  0x14   :  { %28 = vsyncpa [#allocation8 + $0x1], 0 }
  0x15   :  { %29 = vsyncpa [#allocation11], 0 }
  0x16   :  { %31 = vsyncpa [#allocation11 + $0x1], 0 }
  0x17   :  { %32 = vsyncpa [#allocation14], 0 }
  0x18   :  { %34 = vsyncpa [#allocation14 + $0x1], 0 }
  0x19   :  { %35 = vsyncpa [#allocation17], 0 }
  0x1a   :  { %37 = vsyncpa [#allocation17 + $0x1], 0 }
  0x1b   :  { %38 = vsyncpa [#allocation20], 0 }
  0x1c   :  { %40 = vsyncpa [#allocation20 + $0x1], 0 }
  0x1d   :  { %41 = vsyncpa [#allocation23], 0 }
  0x1e   :  { %43 = vsyncpa [#allocation23 + $0x1], 0 }
  0x1f   :  { %44 = vsyncpa [#allocation26], 0 }
  0x20   :  { %46 = vsyncpa [#allocation26 + $0x1], 0 }
  0x21   :  { %47 = vsyncpa [#allocation6], 0 }
  0x22   :  { %49 = vsyncpa [#allocation6 + $0x1], 0  ;;  %s5750_s15 = smov 0   ;;  %s5752_s23 = smov 0  }
  0x23   :  { %s5754_s24 = smov 0   ;;  %s5756_s25 = smov 0  }
  0x24   :  { %s5758_s26 = smov 0   ;;  %s5760_s27 = smov 0  }
  0x25   :  { %s5762_s28 = smov 0   ;;  %s5764_s29 = smov 0  }
  0x26   :  { %s5766_s30 = smov 0   ;;  %s5768_s0 = smov 0  }
  0x27   :  { %s5770_s17 = smov 0  }
  0x28 LB: > { %7008 = sst [smem:[#allocation40_spill]] %s5585_s23  ;;  %s5806_s18 = sadd.s32 4294967295, %s5621_s17   ;;  %s5621_s17 = sphi %s5770_s17, %s55_s17   ;;  %s5617_s0 = sphi %s5768_s0, %s7090_s0   ;;  %s5613_s30 = sphi %s5766_s30, %s7089_s30   ;;  %s5609_s29 = sphi %s5764_s29, %s7088_s29   ;;  %s5605_s28 = sphi %s5762_s28, %s7087_s28   ;;  %s5601_s27 = sphi %s5760_s27, %s7082_s27   ;;  %s5597_s26 = sphi %s5758_s26, %s7086_s26   ;;  %s5593_s25 = sphi %s5756_s25, %s7085_s25   ;;  %s5589_s24 = sphi %s5754_s24, %s7080_s24   ;;  %s5585_s23 = sphi %s5752_s23, %s7079_s23   ;;  %s5581_s15 = sphi %s5750_s15, %s7078_s15  }
  0x29   : > { %7009 = sst [smem:[#allocation41_spill]] %s5589_s24  ;;  %s4587_s19 = sadd.s32 4294967294, %s5621_s17  }
  0x2a   : > { %7010 = sst [smem:[#allocation42_spill]] %s5593_s25  ;;  %s64_s20 = sadd.s32 1, %s5613_s30 }
  0x2b   : > { %7011 = sst [smem:[#allocation43_spill]] %s5601_s27  ;;  %s67_s21 = sadd.s32 1, %s5617_s0 }
  0x2c   : > { %7012 = sst [smem:[#allocation44_spill]] %s5605_s28  ;;  %p65_p0 = scmp.ge.s32.totalorder %s64_s20, 2 }
  0x2d   : > { %7013 = sst [smem:[#allocation45_spill]] %s5609_s29  ;;  %s74_s22 = sadd.s32 1, %s5601_s27 }
  0x2e   : > { %7014 = sst [smem:[#allocation46_spill]] %s5621_s17  ;;  %p6962_p1 = scmp.ne.s32.totalorder %s5601_s27, %s5597_s26 }
  0x2f   : > { %p82_p2 = scmp.eq.s32.totalorder %s5621_s17, 0  ;;  %s7092_s20 = smov (%p65_p0, %s64_s20), 0 }
  0x30   : > { %7015 = sst [smem:[#allocation47_spill]] %s7092_s20  ;;  %s7094_s21 = smov (!%p65_p0, %s67_s21), %s5617_s0 }
  0x31   : > { %p5823_p3 = por %p82_p2, %p6962_p1  ;;  %p6961_p4 = scmp.ne.s32.totalorder %s5597_s26, %s5593_s25 }
  0x32   : > { %p69_p5 = scmp.ge.s32.totalorder %s7094_s21, 2  ;;  %p6972_p6 = scmp.eq.s32.totalorder %s5806_s18, 0 }
  0x33   : > { %s7016_s16 = scalar_select %p5823_p3, 1, 0 }
  0x34   : > { %s123_s29 = ssub.s32 %s5613_s30, %s7092_s20  ;;  %s126_s28 = sadd.s32 1, %s5589_s24 }
  0x35   : > { %s7096_s21 = smov (%p69_p5, %s7094_s21), 0  ;;  %p5840_p7 = por %p6972_p6, %p6961_p4 }
  0x36   : > { %7017 = sst [smem:[#allocation48_spill]] %s7096_s21  ;;  %p124_p8 = scmp.eq.s32.totalorder %s123_s29, 0 }
  0x37   : > { %s7018_s13 = scalar_select %p5840_p7, 1, 0 }
  0x38   : > { %s71_s12 = ssub.s32 %s5617_s0, %s7096_s21  ;;  %p133_p9 = scmp.ne.s32.totalorder %s5589_s24, %s5585_s23 }
  0x39   : > { %p72_p10 = scmp.eq.s32.totalorder %s71_s12, 0  ;;  %p139_p11 = scmp.ne.s32.totalorder %s5585_s23, %s5581_s15 }
  0x3a   : > { %s5851_s20 = scalar_select %p124_p8, %s5589_s24, %s126_s28  }
  0x3b   : > { %s5854_s10 = scalar_select %p72_p10, %s5601_s27, %s74_s22  }
  0x3c   : > { %7019 = sst [smem:[#allocation49_spill]] %s5851_s20  ;;  %p5858_p12 = por %p133_p9, %p82_p2 }
  0x3d   : > { %7020 = sst [smem:[#allocation50_spill]] %s5854_s10  ;;  %p5864_p13 = por %p139_p11, %p6972_p6 }
  0x3e   : > { %s7021_s8 = scalar_select %p5858_p12, 1, 0 }
  0x3f   : > { %s7022_s6 = scalar_select %p5864_p13, 1, 0 }
  0x40   : > { %p491_p0 = scmp.eq.s32.totalorder %s5806_s18, 3  ;;  %p497_p5 = scmp.eq.s32.totalorder %s4587_s19, 3 }
  0x41   : > { %7023 = sst [smem:[#allocation51_spill]] %s7022_s6  ;;  %p4588_p4 = scmp.ge.s32.totalorder %s5621_s17, 1 }
  0x42   : > { %p504_p1 = scmp.lt.s32.totalorder %s5621_s17, 5  ;;  %p7024_p7 = scmp.ne.s32.totalorder %s5601_s27, %s5597_s26 }
  0x43   : > { %p7027_p8 = scmp.ne.s32.totalorder %s5597_s26, %s5593_s25  ;;  %s5623_s29 = smov [#allocation27]  }
  0x44   : > { %p5874_p3 = por %p491_p0, %p7024_p7  ;;  %p5885_p2 = pnand %p4588_p4, %p504_p1 }
  0x45   : > { %p5881_p10 = por %p497_p5, %p7027_p8  ;;  %s517_s19 = sshll.u32 %s5623_s29, 4  ;;  %s518_s19 = int_to_ptr.vmem [resolvable:$true] %s517_s19 }
  0x46   : > { %s7025_s12 = scalar_select %p5874_p3, 1, 0 }
  0x47   : > { %s7028_s15 = scalar_select %p5881_p10, 1, 0 }
  0x48   : > { %7026 = sst [smem:[#allocation52_spill]] %s7025_s12  ;;  %p4848_p9 = pneg %p5885_p2 }
  0x49   : > { %7029 = sst [smem:[#allocation53_spill]] %s7028_s15  ;;  %s7032_s14 = sld [smem:[#allocation68_spill]] }
  0x4a   : > { %s7030_s28 = scalar_select %p5885_p2, 1, 0 }
  0x4b   : > { %p5893_p7 = pnand %p4848_p9, %p6972_p6 }
  0x4d   : > { %p5045_p4 = pneg %p5893_p7 }
  0x4f   : > { %s5043_s20 = scalar_lea.hbm %s7032_s14, 16 }
  0x50   : > { %p5044_p1 = scmp.ne.s32.totalorder %s7032_s14, %s5043_s20  ;;  %p5050_p5 = scmp.lt.u32.totalorder %s5043_s20, %s7032_s14 }
  0x52   : > { %p5046_p11 = pnand %p5045_p4, %p5044_p1 }
  0x54   : > { %p5047_p0 = pneg %p5046_p11 }
  0x56   : > { %p5052_p8 = pnand %p5050_p5, %p5047_p0 }
  0x58   : > { %5055 = shalt.err (!%p5052_p8)
}
  0x59   : > { %s5056_s6 = scalar_lea.vmem %s518_s19, 16  ;;  %s5063_s10 = scalar_lea.vmem %s518_s19, 32 }
  0x5a   : > { %p5057_p9 = scmp.ne.s32.totalorder %s518_s19, %s5056_s6  ;;  %p5064_p3 = scmp.lt.s32.totalorder %s518_s19, %s518_s19 }
  0x5b   : > { %p5065_p13 = scmp.lt.s32.totalorder %s5063_s10, %s5056_s6 }
  0x5c   : > { %p5059_p6 = pnand %p5057_p9, %p5045_p4 }
  0x5d   : > { %p5066_p2 = por %p5065_p13, %p5064_p3 }
  0x5e   : > { %p5060_p10 = pneg %p5059_p6 }
  0x60   : > { %p5067_p12 = pnand %p5066_p2, %p5060_p10 }
  0x62   : > { %5070 = shalt.err (!%p5067_p12)
}
  0x63   : > { %4851 = dma.hbm_to_vmem [thread:$0]  (!%p5893_p7), %s7032_s14, 16, %s518_s19, [#allocation26]  }
  0x64   : > { %p4590_p1 = scmp.ge.s32.totalorder %s5621_s17, 4 }
  0x65   : > { %s5915_s20 = sand.u32 (!%p4590_p1), 1, %s5601_s27   ;;  %s5918_s6 = sand.u32 (!%p4590_p1), 1, %s5621_s17  }
  0x66   : > { %527 = sbr.rel (%p4590_p1) target bundleno = 492 (0x1ec), region = 24  ;;  %s4592_s12 = sshll.u32 (!%p4590_p1), %s5915_s20, 4 }
  0x67   : > { %s4676_s15 = sshll.u32 (!%p4590_p1), %s5617_s0, 8  ;;  %s7033_s1 = sld [smem:[#allocation55_spill]] (!%p4590_p1) }
  0x68   : > { %s552_s10 = scalar_lea.vmem (!%p4590_p1), [#allocation7], %s4592_s12  ;;  %s5930_s21 = sand.u32 (!%p4590_p1), 1, %s5589_s24  }
  0x69   : > { %s559_s25 = sshll.u32 (!%p4590_p1), %s552_s10, 4  ;;  %s6982_s14 = scalar_lea.sflag (!%p4590_p1), [#allocation8], %s5918_s6  ;;  %s5927_s25 = int_to_ptr.vmem [resolvable:$true] %s559_s25 }
  0x6a   : > { %p7034_p6 = scmp.ne.s32.totalorder (!%p4590_p1), %s7016_s16, 0 }
  0x6d   : > { %s5925_s19 = scalar_lea.hbm %s7033_s1, %s4676_s15  ;;  %s5075_s15 = scalar_lea.hbm %s7033_s1, 512 }
  0x6e   : > { %s5071_s27 = scalar_lea.hbm %s5925_s19, 256  ;;  %p5076_p10 = scmp.lt.u32.totalorder %s5925_s19, %s7033_s1 }
  0x6f   : > { %p5072_p3 = scmp.ne.s32.totalorder %s5925_s19, %s5071_s27  ;;  %p5077_p2 = scmp.lt.u32.totalorder %s5075_s15, %s5071_s27 }
  0x70   : > { %p5079_p4 = scmp.lt.u32.totalorder %s5071_s27, %s5925_s19 }
  0x71   : > { %p5073_p12 = pnand %p5072_p3, %p7034_p6  ;;  %p5078_p7 = por %p5077_p2, %p5076_p10 }
  0x73   : > { %p5074_p13 = pneg %p5073_p12  ;;  %p5080_p11 = por %p5079_p4, %p5078_p7 }
  0x75   : > { %p5081_p0 = pnand %p5080_p11, %p5074_p13 }
  0x77   : > { %5084 = shalt.err (!%p5081_p0)
}
  0x78   : > { %s5085_s12 = scalar_lea.vmem %s5927_s25, 256  ;;  %s5624_s17 = smov [#allocation7]  }
  0x79   : > { %p5086_p5 = scmp.ne.s32.totalorder %s5927_s25, %s5085_s12  ;;  %s5089_s10 = sshll.u32 %s5624_s17, 4  ;;  %s5090_s10 = int_to_ptr.vmem [resolvable:$false] %s5089_s10 }
  0x7a   : > { %s5091_s23 = scalar_lea.vmem %s5090_s10, 512  ;;  %p5092_p1 = scmp.lt.s32.totalorder %s5927_s25, %s5090_s10 }
  0x7b   : > { %p5087_p8 = pnand %p5086_p5, %p7034_p6  ;;  %p5093_p3 = scmp.lt.s32.totalorder %s5091_s23, %s5085_s12 }
  0x7d   : > { %p5088_p9 = pneg %p5087_p8  ;;  %p5094_p12 = por %p5093_p3, %p5092_p1 }
  0x7f   : > { %p5095_p10 = pnand %p5094_p12, %p5088_p9 }
  0x81   : > { %5098 = shalt.err (!%p5095_p10)
}
  0x82   : > { %s5625_s27 = smov 128   ;;  %s5626_s22 = smov 8  }
  0x83   : > { %4817 = dma.hbm_to_vmem [thread:$0]  (%p7034_p6), %s5925_s19, 256, %s5927_s25, %s6982_s14, %s5625_s27, %s5625_s27, %s5626_s22  }
  0x84   : > { %s5957_s15 = sshll.u32 %s5613_s30, 4  ;;  %s7035_s3 = sld [smem:[#allocation57_spill]] }
  0x85   : > { %s589_s10 = scalar_lea.vmem [#allocation10], %s5930_s21  ;;  %s6984_s1 = scalar_lea.sflag [#allocation11], %s5918_s6 }
  0x86   : > { %s596_s23 = sshll.u32 %s589_s10, 4  ;;  %p7036_p2 = scmp.ne.s32.totalorder %s7021_s8, 0  ;;  %s597_s23 = int_to_ptr.vmem [resolvable:$true] %s596_s23 }
  0x8a   : > { %s5963_s17 = scalar_lea.hbm %s7035_s3, %s5957_s15  ;;  %s5103_s27 = scalar_lea.hbm %s7035_s3, 32 }
  0x8b   : > { %s5099_s24 = scalar_lea.hbm %s5963_s17, 16  ;;  %p5104_p11 = scmp.lt.u32.totalorder %s5963_s17, %s7035_s3 }
  0x8c   : > { %p5100_p13 = scmp.ne.s32.totalorder %s5963_s17, %s5099_s24  ;;  %p5105_p0 = scmp.lt.u32.totalorder %s5103_s27, %s5099_s24 }
  0x8d   : > { %p5107_p8 = scmp.lt.u32.totalorder %s5099_s24, %s5963_s17 }
  0x8e   : > { %p5101_p7 = pnand %p5100_p13, %p7036_p2  ;;  %p5106_p5 = por %p5105_p0, %p5104_p11 }
  0x90   : > { %p5102_p4 = pneg %p5101_p7  ;;  %p5108_p9 = por %p5107_p8, %p5106_p5 }
  0x92   : > { %p5109_p1 = pnand %p5108_p9, %p5102_p4 }
  0x94   : > { %5112 = shalt.err (!%p5109_p1)
}
  0x95   : > { %s5113_s12 = scalar_lea.vmem %s597_s23, 16  ;;  %s5627_s10 = smov [#allocation10]  }
  0x96   : > { %p5114_p3 = scmp.ne.s32.totalorder %s597_s23, %s5113_s12  ;;  %s5117_s14 = sshll.u32 %s5627_s10, 4  ;;  %s5118_s14 = int_to_ptr.vmem [resolvable:$false] %s5117_s14 }
  0x97   : > { %s5119_s19 = scalar_lea.vmem %s5118_s14, 32  ;;  %p5120_p13 = scmp.lt.s32.totalorder %s597_s23, %s5118_s14 }
  0x98   : > { %p5115_p12 = pnand %p5114_p3, %p7036_p2  ;;  %p5121_p7 = scmp.lt.s32.totalorder %s5119_s19, %s5113_s12 }
  0x9a   : > { %p5116_p10 = pneg %p5115_p12  ;;  %p5122_p6 = por %p5121_p7, %p5120_p13 }
  0x9c   : > { %p5123_p0 = pnand %p5122_p6, %p5116_p10 }
  0x9e   : > { %5126 = shalt.err (!%p5123_p0)
}
  0x9f   : > { %4819 = dma.hbm_to_vmem [thread:$0]  (%p7036_p2), %s5963_s17, 16, %s597_s23, %s6984_s1  }
  0xa0   : > { %s7037_s5 = sld [smem:[#allocation59_spill]]  ;;  %s627_s14 = scalar_lea.vmem [#allocation13], %s5930_s21 }
  0xa1   : > { %s634_s22 = sshll.u32 %s627_s14, 4  ;;  %s6985_s29 = scalar_lea.sflag [#allocation14], %s5918_s6  ;;  %s635_s22 = int_to_ptr.vmem [resolvable:$true] %s634_s22 }
  0xa6   : > { %s5990_s27 = scalar_lea.hbm %s7037_s5, %s5957_s15  ;;  %s5131_s23 = scalar_lea.hbm %s7037_s5, 32 }
  0xa7   : > { %s5127_s12 = scalar_lea.hbm %s5990_s27, 16  ;;  %p5132_p5 = scmp.lt.u32.totalorder %s5990_s27, %s7037_s5 }
  0xa8   : > { %p5128_p6 = scmp.ne.s32.totalorder %s5990_s27, %s5127_s12  ;;  %p5133_p8 = scmp.lt.u32.totalorder %s5131_s23, %s5127_s12 }
  0xa9   : > { %p5135_p1 = scmp.lt.u32.totalorder %s5127_s12, %s5990_s27 }
  0xaa   : > { %p5129_p4 = pnand %p5128_p6, %p7036_p2  ;;  %p5134_p9 = por %p5133_p8, %p5132_p5 }
  0xac   : > { %p5130_p11 = pneg %p5129_p4  ;;  %p5136_p3 = por %p5135_p1, %p5134_p9 }
  0xae   : > { %p5137_p12 = pnand %p5136_p3, %p5130_p11 }
  0xb0   : > { %5140 = shalt.err (!%p5137_p12)
}
  0xb1   : > { %s5141_s25 = scalar_lea.vmem %s635_s22, 16  ;;  %s5628_s14 = smov [#allocation13]  }
  0xb2   : > { %p5142_p10 = scmp.ne.s32.totalorder %s635_s22, %s5141_s25  ;;  %s5145_s1 = sshll.u32 %s5628_s14, 4  ;;  %s5146_s1 = int_to_ptr.vmem [resolvable:$false] %s5145_s1 }
  0xb3   : > { %s5147_s10 = scalar_lea.vmem %s5146_s1, 32  ;;  %p5148_p0 = scmp.lt.s32.totalorder %s635_s22, %s5146_s1 }
  0xb4   : > { %p5143_p13 = pnand %p5142_p10, %p7036_p2  ;;  %p5149_p6 = scmp.lt.s32.totalorder %s5147_s10, %s5141_s25 }
  0xb6   : > { %p5144_p7 = pneg %p5143_p13  ;;  %p5150_p4 = por %p5149_p6, %p5148_p0 }
  0xb8   : > { %p5151_p5 = pnand %p5150_p4, %p5144_p7 }
  0xba   : > { %5154 = shalt.err (!%p5151_p5)
}
  0xbb   : > { %4821 = dma.hbm_to_vmem [thread:$0]  (%p7036_p2), %s5990_s27, 16, %s635_s22, %s6985_s29  }
  0xbc   : > { %s7038_s7 = sld [smem:[#allocation61_spill]]  ;;  %s665_s1 = scalar_lea.vmem [#allocation16], %s5930_s21 }
  0xbd   : > { %s672_s19 = sshll.u32 %s665_s1, 4  ;;  %s6986_s24 = scalar_lea.sflag [#allocation17], %s5918_s6  ;;  %s673_s19 = int_to_ptr.vmem [resolvable:$true] %s672_s19 }
  0xc2   : > { %s6017_s23 = scalar_lea.hbm %s7038_s7, %s5957_s15  ;;  %s5159_s22 = scalar_lea.hbm %s7038_s7, 32 }
  0xc3   : > { %s5155_s25 = scalar_lea.hbm %s6017_s23, 16  ;;  %p5160_p1 = scmp.lt.u32.totalorder %s6017_s23, %s7038_s7 }
  0xc4   : > { %p5156_p11 = scmp.ne.s32.totalorder %s6017_s23, %s5155_s25  ;;  %p5161_p3 = scmp.lt.u32.totalorder %s5159_s22, %s5155_s25 }
  0xc5   : > { %p5163_p10 = scmp.lt.u32.totalorder %s5155_s25, %s6017_s23 }
  0xc6   : > { %p5157_p8 = pnand %p5156_p11, %p7036_p2  ;;  %p5162_p12 = por %p5161_p3, %p5160_p1 }
  0xc8   : > { %p5158_p9 = pneg %p5157_p8  ;;  %p5164_p13 = por %p5163_p10, %p5162_p12 }
  0xca   : > { %p5165_p7 = pnand %p5164_p13, %p5158_p9 }
  0xcc   : > { %5168 = shalt.err (!%p5165_p7)
}
  0xcd   : > { %s5169_s17 = scalar_lea.vmem %s673_s19, 16  ;;  %s5629_s1 = smov [#allocation16]  }
  0xce   : > { %p5170_p0 = scmp.ne.s32.totalorder %s673_s19, %s5169_s17  ;;  %s5173_s29 = sshll.u32 %s5629_s1, 4  ;;  %s5174_s29 = int_to_ptr.vmem [resolvable:$false] %s5173_s29 }
  0xcf   : > { %s5175_s14 = scalar_lea.vmem %s5174_s29, 32  ;;  %p5176_p5 = scmp.lt.s32.totalorder %s673_s19, %s5174_s29 }
  0xd0   : > { %p5171_p6 = pnand %p5170_p0, %p7036_p2  ;;  %p5177_p11 = scmp.lt.s32.totalorder %s5175_s14, %s5169_s17 }
  0xd2   : > { %p5172_p4 = pneg %p5171_p6  ;;  %p5178_p8 = por %p5177_p11, %p5176_p5 }
  0xd4   : > { %p5179_p1 = pnand %p5178_p8, %p5172_p4 }
  0xd6   : > { %5182 = shalt.err (!%p5179_p1)
}
  0xd7   : > { %4823 = dma.hbm_to_vmem [thread:$0]  (%p7036_p2), %s6017_s23, 16, %s673_s19, %s6986_s24  }
  0xd8   : > { %s7039_s9 = sld [smem:[#allocation63_spill]]  ;;  %s699_s29 = scalar_lea.vmem [#allocation19], %s5930_s21 }
  0xd9   : > { %s706_s10 = sshll.u32 %s699_s29, 4  ;;  %s6987_s12 = scalar_lea.sflag [#allocation20], %s5918_s6  ;;  %s707_s10 = int_to_ptr.vmem [resolvable:$true] %s706_s10 }
  0xde   : > { %s6044_s22 = scalar_lea.hbm %s7039_s9, %s5957_s15  ;;  %s5187_s19 = scalar_lea.hbm %s7039_s9, 32 }
  0xdf   : > { %s5183_s17 = scalar_lea.hbm %s6044_s22, 16  ;;  %p5188_p10 = scmp.lt.u32.totalorder %s6044_s22, %s7039_s9 }
  0xe0   : > { %p5184_p9 = scmp.ne.s32.totalorder %s6044_s22, %s5183_s17  ;;  %p5189_p13 = scmp.lt.u32.totalorder %s5187_s19, %s5183_s17 }
  0xe1   : > { %p5191_p0 = scmp.lt.u32.totalorder %s5183_s17, %s6044_s22 }
  0xe2   : > { %p5185_p3 = pnand %p5184_p9, %p7036_p2  ;;  %p5190_p7 = por %p5189_p13, %p5188_p10 }
  0xe4   : > { %p5186_p12 = pneg %p5185_p3  ;;  %p5192_p6 = por %p5191_p0, %p5190_p7 }
  0xe6   : > { %p5193_p4 = pnand %p5192_p6, %p5186_p12 }
  0xe8   : > { %5196 = shalt.err (!%p5193_p4)
}
  0xe9   : > { %s5197_s27 = scalar_lea.vmem %s707_s10, 16  ;;  %s5630_s29 = smov [#allocation19]  }
  0xea   : > { %p5198_p5 = scmp.ne.s32.totalorder %s707_s10, %s5197_s27  ;;  %s5201_s24 = sshll.u32 %s5630_s29, 4  ;;  %s5202_s24 = int_to_ptr.vmem [resolvable:$false] %s5201_s24 }
  0xeb   : > { %s5203_s1 = scalar_lea.vmem %s5202_s24, 32  ;;  %p5204_p1 = scmp.lt.s32.totalorder %s707_s10, %s5202_s24 }
  0xec   : > { %p5199_p11 = pnand %p5198_p5, %p7036_p2  ;;  %p5205_p9 = scmp.lt.s32.totalorder %s5203_s1, %s5197_s27 }
  0xee   : > { %p5200_p8 = pneg %p5199_p11  ;;  %p5206_p3 = por %p5205_p9, %p5204_p1 }
  0xf0   : > { %p5207_p10 = pnand %p5206_p3, %p5200_p8 }
  0xf2   : > { %5210 = shalt.err (!%p5207_p10)
}
  0xf3   : > { %4825 = dma.hbm_to_vmem [thread:$0]  (%p7036_p2), %s6044_s22, 16, %s707_s10, %s6987_s12  }
  0xf4   : > { %s7040_s11 = sld [smem:[#allocation65_spill]]  ;;  %s737_s24 = scalar_lea.vmem [#allocation22], %s5930_s21 }
  0xf5   : > { %s744_s14 = sshll.u32 %s737_s24, 4  ;;  %s6988_s25 = scalar_lea.sflag [#allocation23], %s5918_s6  ;;  %s745_s14 = int_to_ptr.vmem [resolvable:$true] %s744_s14 }
  0xfa   : > { %s6071_s19 = scalar_lea.hbm %s7040_s11, %s5957_s15  ;;  %s5215_s10 = scalar_lea.hbm %s7040_s11, 32 }
  0xfb   : > { %s5211_s27 = scalar_lea.hbm %s6071_s19, 16  ;;  %p5216_p0 = scmp.lt.u32.totalorder %s6071_s19, %s7040_s11 }
  0xfc   : > { %p5212_p12 = scmp.ne.s32.totalorder %s6071_s19, %s5211_s27  ;;  %p5217_p6 = scmp.lt.u32.totalorder %s5215_s10, %s5211_s27 }
  0xfd   : > { %p5219_p5 = scmp.lt.u32.totalorder %s5211_s27, %s6071_s19 }
  0xfe   : > { %p5213_p13 = pnand %p5212_p12, %p7036_p2  ;;  %p5218_p4 = por %p5217_p6, %p5216_p0 }
 0x100   : > { %p5214_p7 = pneg %p5213_p13  ;;  %p5220_p11 = por %p5219_p5, %p5218_p4 }
 0x102   : > { %p5221_p8 = pnand %p5220_p11, %p5214_p7 }
 0x104   : > { %5224 = shalt.err (!%p5221_p8)
}
 0x105   : > { %s5225_s23 = scalar_lea.vmem %s745_s14, 16  ;;  %s5631_s24 = smov [#allocation22]  }
 0x106   : > { %p5226_p1 = scmp.ne.s32.totalorder %s745_s14, %s5225_s23  ;;  %s5229_s12 = sshll.u32 %s5631_s24, 4  ;;  %s5230_s12 = int_to_ptr.vmem [resolvable:$false] %s5229_s12 }
 0x107   : > { %s5231_s29 = scalar_lea.vmem %s5230_s12, 32  ;;  %p5232_p10 = scmp.lt.s32.totalorder %s745_s14, %s5230_s12 }
 0x108   : > { %p5227_p9 = pnand %p5226_p1, %p7036_p2  ;;  %p5233_p12 = scmp.lt.s32.totalorder %s5231_s29, %s5225_s23 }
 0x10a   : > { %p5228_p3 = pneg %p5227_p9  ;;  %p5234_p13 = por %p5233_p12, %p5232_p10 }
 0x10c   : > { %p5235_p0 = pnand %p5234_p13, %p5228_p3 }
 0x10e   : > { %5238 = shalt.err (!%p5235_p0)
}
 0x10f   : > { %4827 = dma.hbm_to_vmem [thread:$0]  (%p7036_p2), %s6071_s19, 16, %s745_s14, %s6988_s25  }
 0x110   : > { %s4591_s27 = sshll.u32 %s5617_s0, 4  ;;  %s534_s22 = scalar_lea.vmem [#allocation4], %s5915_s20 }
 0x111   : > { %s541_s10 = sshll.u32 %s534_s22, 4  ;;  %s7041_s12 = sld [smem:[#allocation54_spill]]  ;;  %s542_s10 = int_to_ptr.vmem [resolvable:$true] %s541_s10 }
 0x112   : > { %s532_s24 = scalar_lea.sflag [#allocation5], %s5915_s20  ;;  %p7042_p6 = scmp.ne.s32.totalorder %s7016_s16, 0 }
 0x117   : > { %s6099_s23 = scalar_lea.hbm %s7041_s12, %s4591_s27  ;;  %s5243_s22 = scalar_lea.hbm %s7041_s12, 32 }
 0x118   : > { %s5239_s29 = scalar_lea.hbm %s6099_s23, 16  ;;  %p5244_p11 = scmp.lt.u32.totalorder %s6099_s23, %s7041_s12 }
 0x119   : > { %p5240_p7 = scmp.ne.s32.totalorder %s6099_s23, %s5239_s29  ;;  %p5245_p8 = scmp.lt.u32.totalorder %s5243_s22, %s5239_s29 }
 0x11a   : > { %p5247_p9 = scmp.lt.u32.totalorder %s5239_s29, %s6099_s23 }
 0x11b   : > { %p5241_p4 = pnand %p5240_p7, %p7042_p6  ;;  %p5246_p1 = por %p5245_p8, %p5244_p11 }
 0x11d   : > { %p5242_p5 = pneg %p5241_p4  ;;  %p5248_p3 = por %p5247_p9, %p5246_p1 }
 0x11f   : > { %p5249_p10 = pnand %p5248_p3, %p5242_p5 }
 0x121   : > { %5252 = shalt.err (!%p5249_p10)
}
 0x122   : > { %s5253_s20 = scalar_lea.vmem %s542_s10, 16  ;;  %s5632_s27 = smov [#allocation4]  }
 0x123   : > { %p5254_p12 = scmp.ne.s32.totalorder %s542_s10, %s5253_s20  ;;  %s5257_s1 = sshll.u32 %s5632_s27, 4  ;;  %s5258_s1 = int_to_ptr.vmem [resolvable:$false] %s5257_s1 }
 0x124   : > { %s5259_s17 = scalar_lea.vmem %s5258_s1, 32  ;;  %p5260_p7 = scmp.lt.s32.totalorder %s542_s10, %s5258_s1 }
 0x125   : > { %p5255_p13 = pnand %p5254_p12, %p7042_p6  ;;  %p5261_p4 = scmp.lt.s32.totalorder %s5259_s17, %s5253_s20 }
 0x127   : > { %p5256_p0 = pneg %p5255_p13  ;;  %p5262_p2 = por %p5261_p4, %p5260_p7 }
 0x129   : > { %p5263_p8 = pnand %p5262_p2, %p5256_p0 }
 0x12b   : > { %5266 = shalt.err (!%p5263_p8)
}
 0x12c   : > { %4816 = dma.hbm_to_vmem [thread:$0]  (%p7042_p6), %s6099_s23, 16, %s542_s10, %s532_s24  }
 0x12d   : > { %s7043_s2 = sld [smem:[#allocation56_spill]]  ;;  %s572_s19 = scalar_lea.vmem [#allocation9], %s5930_s21 }
 0x12e   : > { %s579_s14 = sshll.u32 %s572_s19, 4  ;;  %s6127_s22 = sshll.u32 %s5930_s21, 4  ;;  %s580_s14 = int_to_ptr.vmem [resolvable:$true] %s579_s14 }
 0x12f   : > { %p7044_p5 = scmp.ne.s32.totalorder %s7021_s8, 0 }
 0x133   : > { %s6123_s29 = scalar_lea.hbm %s7043_s2, %s5957_s15  ;;  %s5271_s24 = scalar_lea.hbm %s7043_s2, 32 }
 0x134   : > { %s5267_s16 = scalar_lea.hbm %s6123_s29, 16  ;;  %p5272_p6 = scmp.lt.u32.totalorder %s6123_s29, %s7043_s2 }
 0x135   : > { %p5268_p2 = scmp.ne.s32.totalorder %s6123_s29, %s5267_s16  ;;  %p5273_p9 = scmp.lt.u32.totalorder %s5271_s24, %s5267_s16 }
 0x136   : > { %p5275_p10 = scmp.lt.u32.totalorder %s5267_s16, %s6123_s29 }
 0x137   : > { %p5269_p11 = pnand %p5268_p2, %p7044_p5  ;;  %p5274_p3 = por %p5273_p9, %p5272_p6 }
 0x139   : > { %p5270_p1 = pneg %p5269_p11  ;;  %p5276_p12 = por %p5275_p10, %p5274_p3 }
 0x13b   : > { %p5277_p13 = pnand %p5276_p12, %p5270_p1 }
 0x13d   : > { %5280 = shalt.err (!%p5277_p13)
}
 0x13e   : > { %s5281_s1 = scalar_lea.vmem %s580_s14, 16  ;;  %s5633_s17 = smov [#allocation9]  }
 0x13f   : > { %p5282_p0 = scmp.ne.s32.totalorder %s580_s14, %s5281_s1  ;;  %s5285_s3 = sshll.u32 %s5633_s17, 4  ;;  %s5286_s3 = int_to_ptr.vmem [resolvable:$false] %s5285_s3 }
 0x140   : > { %s5287_s25 = scalar_lea.vmem %s5286_s3, 32  ;;  %p5288_p8 = scmp.lt.s32.totalorder %s580_s14, %s5286_s3 }
 0x141   : > { %p5283_p7 = pnand %p5282_p0, %p7044_p5  ;;  %p5289_p2 = scmp.lt.s32.totalorder %s5287_s25, %s5281_s1 }
 0x143   : > { %p5284_p4 = pneg %p5283_p7  ;;  %p5290_p11 = por %p5289_p2, %p5288_p8 }
 0x145   : > { %p5291_p6 = pnand %p5290_p11, %p5284_p4 }
 0x147   : > { %5294 = shalt.err (!%p5291_p6)
}
 0x148   : > { %s7045_s19 = scalar_lea.sflag [#allocation8], %s5918_s6  ;;  %s6149_s16 = sshll.u32 %s5613_s30, 8 }
 0x149   : > { %4818 = dma.hbm_to_vmem [thread:$0]  (%p7044_p5), %s6123_s29, 16, %s580_s14, %s7045_s19  }
 0x14a   : > { %s607_s10 = scalar_lea.vmem [#allocation12], %s6127_s22  ;;  %s7046_s4 = sld [smem:[#allocation58_spill]] }
 0x14b   : > { %s614_s23 = sshll.u32 %s607_s10, 4  ;;  %s6158_s23 = int_to_ptr.vmem [resolvable:$true] %s614_s23 }
 0x150   : > { %s6156_s27 = scalar_lea.hbm %s7046_s4, %s6149_s16  ;;  %s5299_s17 = scalar_lea.hbm %s7046_s4, 512 }
 0x151   : > { %s5295_s1 = scalar_lea.hbm %s6156_s27, 256  ;;  %p5300_p10 = scmp.lt.u32.totalorder %s6156_s27, %s7046_s4 }
 0x152   : > { %p5296_p1 = scmp.ne.s32.totalorder %s6156_s27, %s5295_s1  ;;  %p5301_p12 = scmp.lt.u32.totalorder %s5299_s17, %s5295_s1 }
 0x153   : > { %p5303_p0 = scmp.lt.u32.totalorder %s5295_s1, %s6156_s27 }
 0x154   : > { %p5297_p9 = pnand %p5296_p1, %p7044_p5  ;;  %p5302_p13 = por %p5301_p12, %p5300_p10 }
 0x156   : > { %p5298_p3 = pneg %p5297_p9  ;;  %p5304_p7 = por %p5303_p0, %p5302_p13 }
 0x158   : > { %p5305_p4 = pnand %p5304_p7, %p5298_p3 }
 0x15a   : > { %5308 = shalt.err (!%p5305_p4)
}
 0x15b   : > { %s5309_s19 = scalar_lea.vmem %s6158_s23, 256  ;;  %s5634_s10 = smov [#allocation12]  }
 0x15c   : > { %p5310_p8 = scmp.ne.s32.totalorder %s6158_s23, %s5309_s19  ;;  %s5313_s24 = sshll.u32 %s5634_s10, 4  ;;  %s5314_s24 = int_to_ptr.vmem [resolvable:$false] %s5313_s24 }
 0x15d   : > { %s5315_s20 = scalar_lea.vmem %s5314_s24, 512  ;;  %p5316_p6 = scmp.lt.s32.totalorder %s6158_s23, %s5314_s24 }
 0x15e   : > { %p5311_p2 = pnand %p5310_p8, %p7044_p5  ;;  %p5317_p1 = scmp.lt.s32.totalorder %s5315_s20, %s5309_s19 }
 0x160   : > { %p5312_p11 = pneg %p5311_p2  ;;  %p5318_p9 = por %p5317_p1, %p5316_p6 }
 0x162   : > { %p5319_p10 = pnand %p5318_p9, %p5312_p11 }
 0x164   : > { %5322 = shalt.err (!%p5319_p10)
}
 0x165   : > { %s5635_s1 = smov 64   ;;  %s5636_s29 = smov 4  }
 0x166   : > { %s7047_s14 = scalar_lea.sflag [#allocation11], %s5918_s6  ;;  %s7048_s25 = sld [smem:[#allocation60_spill]] }
 0x167   : > { %4820 = dma.hbm_to_vmem [thread:$0]  (%p7044_p5), %s6156_s27, 256, %s6158_s23, %s7047_s14, %s5635_s1, %s5635_s1, %s5636_s29  }
 0x168   : > { %s645_s24 = scalar_lea.vmem [#allocation15], %s6127_s22  ;;  %s7050_s5 = sld [smem:[#allocation62_spill]] }
 0x169   : > { %s652_s20 = sshll.u32 %s645_s24, 4  ;;  %s6193_s20 = int_to_ptr.vmem [resolvable:$true] %s652_s20 }
 0x16c   : > { %s7049_s19 = smov %s7048_s25  ;;  %s6190_s10 = scalar_lea.hbm %s7048_s25, %s6149_s16 }
 0x16d   : > { %s5323_s9 = scalar_lea.hbm %s6190_s10, 256  ;;  %s5327_s14 = scalar_lea.hbm %s7049_s19, 512 }
 0x16e   : > { %s6199_s7 = scalar_lea.hbm %s7050_s5, %s5957_s15  ;;  %p5324_p3 = scmp.ne.s32.totalorder %s6190_s10, %s5323_s9 }
 0x16f   : > { %p5328_p0 = scmp.lt.u32.totalorder %s6190_s10, %s7049_s19  ;;  %p5329_p7 = scmp.lt.u32.totalorder %s5327_s14, %s5323_s9 }
 0x170   : > { %p5325_p12 = pnand %p5324_p3, %p7044_p5  ;;  %p5331_p8 = scmp.lt.u32.totalorder %s5323_s9, %s6190_s10 }
 0x171   : > { %p5330_p4 = por %p5329_p7, %p5328_p0 }
 0x172   : > { %p5326_p13 = pneg %p5325_p12 }
 0x173   : > { %p5332_p2 = por %p5331_p8, %p5330_p4 }
 0x175   : > { %p5333_p11 = pnand %p5332_p2, %p5326_p13 }
 0x177   : > { %5336 = shalt.err (!%p5333_p11)
}
 0x178   : > { %s5337_s2 = scalar_lea.vmem %s6193_s20, 256  ;;  %s5637_s4 = smov [#allocation15]  }
 0x179   : > { %p5338_p6 = scmp.ne.s32.totalorder %s6193_s20, %s5337_s2  ;;  %s5341_s25 = sshll.u32 %s5637_s4, 4  ;;  %s5342_s25 = int_to_ptr.vmem [resolvable:$false] %s5341_s25 }
 0x17a   : > { %s5343_s24 = scalar_lea.vmem %s5342_s25, 512  ;;  %p5344_p10 = scmp.lt.s32.totalorder %s6193_s20, %s5342_s25 }
 0x17b   : > { %p5339_p1 = pnand %p5338_p6, %p7044_p5  ;;  %p5345_p3 = scmp.lt.s32.totalorder %s5343_s24, %s5337_s2 }
 0x17d   : > { %p5340_p9 = pneg %p5339_p1  ;;  %p5346_p12 = por %p5345_p3, %p5344_p10 }
 0x17f   : > { %p5347_p0 = pnand %p5346_p12, %p5340_p9 }
 0x181   : > { %5350 = shalt.err (!%p5347_p0)
}
 0x182   : > { %s7051_s9 = scalar_lea.sflag [#allocation14], %s5918_s6  ;;  %s682_s23 = scalar_lea.vmem [#allocation18], %s5930_s21 }
 0x183   : > { %4822 = dma.hbm_to_vmem [thread:$0]  (%p7044_p5), %s6190_s10, 256, %s6193_s20, %s7051_s9, %s5635_s1, %s5635_s1, %s5636_s29  }
 0x184   : > { %s689_s27 = sshll.u32 %s682_s23, 4  ;;  %s7052_s3 = sld [smem:[#allocation64_spill]]  ;;  %s690_s27 = int_to_ptr.vmem [resolvable:$true] %s689_s27 }
 0x185   : > { %s5351_s4 = scalar_lea.hbm %s6199_s7, 16  ;;  %s5355_s11 = scalar_lea.hbm %s7050_s5, 32 }
 0x186   : > { %p5352_p13 = scmp.ne.s32.totalorder %s6199_s7, %s5351_s4  ;;  %p5356_p8 = scmp.lt.u32.totalorder %s6199_s7, %s7050_s5 }
 0x187   : > { %p5357_p2 = scmp.lt.u32.totalorder %s5355_s11, %s5351_s4  ;;  %p5359_p6 = scmp.lt.u32.totalorder %s5351_s4, %s6199_s7 }
 0x188   : > { %p5353_p7 = pnand %p5352_p13, %p7044_p5 }
 0x189   : > { %p5358_p11 = por %p5357_p2, %p5356_p8 }
 0x18a   : > { %s6232_s2 = scalar_lea.hbm %s7052_s3, %s6149_s16  ;;  %p5354_p4 = pneg %p5353_p7 }
 0x18b   : > { %p5360_p1 = por %p5359_p6, %p5358_p11 }
 0x18d   : > { %p5361_p9 = pnand %p5360_p1, %p5354_p4 }
 0x18f   : > { %5364 = shalt.err (!%p5361_p9)
}
 0x190   : > { %s5365_s16 = scalar_lea.vmem %s690_s27, 16  ;;  %s5638_s10 = smov [#allocation18]  }
 0x191   : > { %p5366_p10 = scmp.ne.s32.totalorder %s690_s27, %s5365_s16  ;;  %s5369_s20 = sshll.u32 %s5638_s10, 4  ;;  %s5370_s20 = int_to_ptr.vmem [resolvable:$false] %s5369_s20 }
 0x192   : > { %s5371_s9 = scalar_lea.vmem %s5370_s20, 32  ;;  %p5372_p0 = scmp.lt.s32.totalorder %s690_s27, %s5370_s20 }
 0x193   : > { %p5367_p3 = pnand %p5366_p10, %p7044_p5  ;;  %p5373_p13 = scmp.lt.s32.totalorder %s5371_s9, %s5365_s16 }
 0x195   : > { %p5368_p12 = pneg %p5367_p3  ;;  %p5374_p7 = por %p5373_p13, %p5372_p0 }
 0x197   : > { %p5375_p2 = pnand %p5374_p7, %p5368_p12 }
 0x199   : > { %5378 = shalt.err (!%p5375_p2)
}
 0x19a   : > { %s7053_s11 = scalar_lea.sflag [#allocation17], %s5918_s6  ;;  %s717_s12 = scalar_lea.vmem [#allocation21], %s6127_s22 }
 0x19b   : > { %4824 = dma.hbm_to_vmem [thread:$0]  (%p7044_p5), %s6199_s7, 16, %s690_s27, %s7053_s11  }
 0x19c   : > { %s724_s19 = sshll.u32 %s717_s12, 4  ;;  %s4611_s23 = sshll.u32 %s5930_s21, 6  ;;  %s6255_s19 = int_to_ptr.vmem [resolvable:$true] %s724_s19 }
 0x19d   : > { %s5379_s14 = scalar_lea.hbm %s6232_s2, 256  ;;  %s5383_s25 = scalar_lea.hbm %s7052_s3, 512 }
 0x19e   : > { %p5380_p4 = scmp.ne.s32.totalorder %s6232_s2, %s5379_s14  ;;  %p5384_p6 = scmp.lt.u32.totalorder %s6232_s2, %s7052_s3 }
 0x19f   : > { %p5385_p1 = scmp.lt.u32.totalorder %s5383_s25, %s5379_s14  ;;  %p5387_p10 = scmp.lt.u32.totalorder %s5379_s14, %s6232_s2 }
 0x1a0   : > { %p5381_p8 = pnand %p5380_p4, %p7044_p5 }
 0x1a1   : > { %p5386_p9 = por %p5385_p1, %p5384_p6 }
 0x1a2   : > { %p5382_p11 = pneg %p5381_p8 }
 0x1a3   : > { %p5388_p3 = por %p5387_p10, %p5386_p9 }
 0x1a5   : > { %p5389_p12 = pnand %p5388_p3, %p5382_p11 }
 0x1a7   : > { %5392 = shalt.err (!%p5389_p12)
}
 0x1a8   : > { %s5393_s7 = scalar_lea.vmem %s6255_s19, 256  ;;  %s5639_s22 = smov [#allocation21]  }
 0x1a9   : > { %p5394_p0 = scmp.ne.s32.totalorder %s6255_s19, %s5393_s7  ;;  %s5397_s27 = sshll.u32 %s5639_s22, 4  ;;  %s5398_s27 = int_to_ptr.vmem [resolvable:$false] %s5397_s27 }
 0x1aa   : > { %s5399_s10 = scalar_lea.vmem %s5398_s27, 512  ;;  %p5400_p2 = scmp.lt.s32.totalorder %s6255_s19, %s5398_s27 }
 0x1ab   : > { %p5395_p13 = pnand %p5394_p0, %p7044_p5  ;;  %p5401_p4 = scmp.lt.s32.totalorder %s5399_s10, %s5393_s7 }
 0x1ad   : > { %p5396_p7 = pneg %p5395_p13  ;;  %p5402_p8 = por %p5401_p4, %p5400_p2 }
 0x1af   : > { %p5403_p6 = pnand %p5402_p8, %p5396_p7 }
 0x1b1   : > { %5406 = shalt.err (!%p5403_p6)
}
 0x1b2   : > { %s7054_s20 = scalar_lea.sflag [#allocation20], %s5918_s6  ;;  %s4680_s9 = sshll.u32 %s5613_s30, 10 }
 0x1b3   : > { %4826 = dma.hbm_to_vmem [thread:$0]  (%p7044_p5), %s6232_s2, 256, %s6255_s19, %s7054_s20, %s5635_s1, %s5635_s1, %s5636_s29  }
 0x1b4   : > { %s755_s11 = scalar_lea.vmem [#allocation24], %s4611_s23  ;;  %s7055_s4 = sld [smem:[#allocation66_spill]] }
 0x1b5   : > { %s762_s12 = sshll.u32 %s755_s11, 4  ;;  %s6291_s12 = int_to_ptr.vmem [resolvable:$true] %s762_s12 }
 0x1ba   : > { %s6289_s25 = scalar_lea.hbm %s7055_s4, %s4680_s9  ;;  %s5411_s23 = scalar_lea.hbm %s7055_s4, 2048 }
 0x1bb   : > { %s5407_s24 = scalar_lea.hbm %s6289_s25, 1024  ;;  %p5412_p10 = scmp.lt.u32.totalorder %s6289_s25, %s7055_s4 }
 0x1bc   : > { %p5408_p11 = scmp.ne.s32.totalorder %s6289_s25, %s5407_s24  ;;  %p5413_p3 = scmp.lt.u32.totalorder %s5411_s23, %s5407_s24 }
 0x1bd   : > { %p5415_p0 = scmp.lt.u32.totalorder %s5407_s24, %s6289_s25 }
 0x1be   : > { %p5409_p1 = pnand %p5408_p11, %p7044_p5  ;;  %p5414_p12 = por %p5413_p3, %p5412_p10 }
 0x1c0   : > { %p5410_p9 = pneg %p5409_p1  ;;  %p5416_p13 = por %p5415_p0, %p5414_p12 }
 0x1c2   : > { %p5417_p7 = pnand %p5416_p13, %p5410_p9 }
 0x1c4   : > { %5420 = shalt.err (!%p5417_p7)
}
 0x1c5   : > { %s5421_s22 = scalar_lea.vmem %s6291_s12, 1024  ;;  %s5640_s27 = smov [#allocation24]  }
 0x1c6   : > { %p5422_p2 = scmp.ne.s32.totalorder %s6291_s12, %s5421_s22  ;;  %s5425_s10 = sshll.u32 %s5640_s27, 4  ;;  %s5426_s10 = int_to_ptr.vmem [resolvable:$false] %s5425_s10 }
 0x1c7   : > { %s5427_s20 = scalar_lea.vmem %s5426_s10, 2048  ;;  %p5428_p6 = scmp.lt.s32.totalorder %s6291_s12, %s5426_s10 }
 0x1c8   : > { %p5423_p4 = pnand %p5422_p2, %p7044_p5  ;;  %p5429_p11 = scmp.lt.s32.totalorder %s5427_s20, %s5421_s22 }
 0x1ca   : > { %p5424_p8 = pneg %p5423_p4  ;;  %p5430_p1 = por %p5429_p11, %p5428_p6 }
 0x1cc   : > { %p5431_p10 = pnand %p5430_p1, %p5424_p8 }
 0x1ce   : > { %5434 = shalt.err (!%p5431_p10)
}
 0x1cf   : > { %s7056_s9 = scalar_lea.sflag [#allocation23], %s5918_s6  ;;  %s7057_s17 = sld [smem:[#allocation67_spill]] }
 0x1d0   : > { %4828 = dma.hbm_to_vmem [thread:$0]  (%p7044_p5), %s6289_s25, 1024, %s6291_s12, %s7056_s9, %s5635_s1, %s5635_s1, %s5636_s29  }
 0x1d1   : > { %s775_s19 = scalar_lea.vmem [#allocation25], %s5930_s21  ;;  %s773_s16 = scalar_lea.sflag [#allocation26], %s5918_s6 }
 0x1d2   : > { %s782_s23 = sshll.u32 %s775_s19, 4  ;;  %s783_s23 = int_to_ptr.vmem [resolvable:$true] %s782_s23 }
 0x1d5   : > { %s7058_s2 = smov %s7057_s17  ;;  %s6323_s24 = scalar_lea.hbm %s7057_s17, %s5957_s15 }
 0x1d6   : > { %s5435_s7 = scalar_lea.hbm %s6323_s24, 16  ;;  %s5439_s29 = scalar_lea.hbm %s7058_s2, 32 }
 0x1d7   : > { %p5436_p9 = scmp.ne.s32.totalorder %s6323_s24, %s5435_s7  ;;  %p5440_p0 = scmp.lt.u32.totalorder %s6323_s24, %s7058_s2 }
 0x1d8   : > { %p5441_p13 = scmp.lt.u32.totalorder %s5439_s29, %s5435_s7  ;;  %p5443_p2 = scmp.lt.u32.totalorder %s5435_s7, %s6323_s24 }
 0x1d9   : > { %p5437_p3 = pnand %p5436_p9, %p7044_p5 }
 0x1da   : > { %p5442_p7 = por %p5441_p13, %p5440_p0 }
 0x1db   : > { %p5438_p12 = pneg %p5437_p3 }
 0x1dc   : > { %p5444_p4 = por %p5443_p2, %p5442_p7 }
 0x1de   : > { %p5445_p8 = pnand %p5444_p4, %p5438_p12 }
 0x1e0   : > { %5448 = shalt.err (!%p5445_p8)
}
 0x1e1   : > { %s5449_s6 = scalar_lea.vmem %s783_s23, 16  ;;  %s5641_s21 = smov [#allocation25]  }
 0x1e2   : > { %p5450_p6 = scmp.ne.s32.totalorder %s783_s23, %s5449_s6  ;;  %s5453_s25 = sshll.u32 %s5641_s21, 4  ;;  %s5454_s25 = int_to_ptr.vmem [resolvable:$false] %s5453_s25 }
 0x1e3   : > { %s5455_s27 = scalar_lea.vmem %s5454_s25, 32  ;;  %p5456_p10 = scmp.lt.s32.totalorder %s783_s23, %s5454_s25 }
 0x1e4   : > { %p5451_p11 = pnand %p5450_p6, %p7044_p5  ;;  %p5457_p9 = scmp.lt.s32.totalorder %s5455_s27, %s5449_s6 }
 0x1e6   : > { %p5452_p1 = pneg %p5451_p11  ;;  %p5458_p3 = por %p5457_p9, %p5456_p10 }
 0x1e8   : > { %p5459_p0 = pnand %p5458_p3, %p5452_p1 }
 0x1ea   : > { %5462 = shalt.err (!%p5459_p0)
}
 0x1eb   : > { %4829 = dma.hbm_to_vmem [thread:$0]  (%p7044_p5), %s6323_s24, 16, %s783_s23, %s773_s16  }
 0x1ec PF: > { %p7059_p12 = scmp.ne.s32.totalorder %s7030_s28, 0 }
 0x1ed   : > { %s6347_s10 = sand.u32 (!%p7059_p12), 1, %s5597_s26   ;;  %p7060_p13 = scmp.ne.s32.totalorder (!%p7059_p12), %s7018_s13, 0 }
 0x1ee   : > { %791 = sbr.rel (%p7059_p12) target bundleno = 4152 (0x1038), region = 84  ;;  %s794_s20 = scalar_lea.sflag (!%p7059_p12), [#allocation5], %s6347_s10 }
 0x1ef   : > { %s796_s9 = scalar_lea.vmem (!%p7059_p12), [#allocation4], %s6347_s10 }
 0x1f5   : > { %5536 = dma.done.wait (%p7060_p13), %s794_s20, 16  }
 0x1f6   : > { %5538 = vsyncadd (%p7060_p13), %s794_s20, 4294967280  ;;  %s6356_s8 = sand.u32 1, %s5806_s18   ;;  %s4616_s28 = sshll.u32 %s6347_s10, 4 }
 0x1f7   : > { %s802_s11 = scalar_lea.sflag [#allocation8], %s6356_s8  ;;  %s6360_s14 = scalar_lea.vmem [#allocation7], %s4616_s28 }
 0x1f8   : > { %5540 = dma.done.wait (%p7060_p13), %s802_s11, 256  }
 0x1f9   : > { %5542 = vsyncadd (%p7060_p13), %s802_s11, 4294967040  ;;  %s7061_s17 = sld [smem:[#allocation40_spill]]  ;;  %s7062_s24 = sld [smem:[#allocation51_spill]] }
 0x1ff   : > { %s6367_s19 = sand.u32 1, %s7061_s17   ;;  %p7063_p5 = scmp.ne.s32.totalorder %s7062_s24, 0 }
 0x200   : > { %s813_s23 = scalar_lea.vmem [#allocation9], %s6367_s19 }
 0x201   : > { %5544 = dma.done.wait (%p7063_p5), %s802_s11, 16  }
 0x202   : > { %5546 = vsyncadd (%p7063_p5), %s802_s11, 4294967280  ;;  %s819_s16 = scalar_lea.sflag [#allocation11], %s6356_s8  ;;  %s821_s7 = scalar_lea.vmem [#allocation10], %s6367_s19 }
 0x203   : > { %5548 = dma.done.wait (%p7063_p5), %s819_s16, 272  }
 0x204   : > { %5550 = vsyncadd (%p7063_p5), %s819_s16, 4294967024  ;;  %s6381_s13 = sshll.u32 %s6367_s19, 4  ;;  %s836_s1 = scalar_lea.sflag [#allocation14], %s6356_s8 }
 0x205   : > { %s830_s22 = scalar_lea.vmem [#allocation12], %s6381_s13  ;;  %s838_s29 = scalar_lea.vmem [#allocation13], %s6367_s19 }
 0x206   : > { %5552 = dma.done.wait (%p7063_p5), %s836_s1, 272  }
 0x207   : > { %5554 = vsyncadd (%p7063_p5), %s836_s1, 4294967024  ;;  %s847_s12 = scalar_lea.vmem [#allocation15], %s6381_s13  ;;  %s853_s15 = scalar_lea.sflag [#allocation17], %s6356_s8 }
 0x208   : > { %s855_s6 = scalar_lea.vmem [#allocation16], %s6367_s19 }
 0x209   : > { %5556 = dma.done.wait (%p7063_p5), %s853_s15, 32  }
 0x20a   : > { %5558 = vsyncadd (%p7063_p5), %s853_s15, 4294967264  ;;  %s863_s21 = scalar_lea.vmem [#allocation18], %s6367_s19  ;;  %s869_s25 = scalar_lea.sflag [#allocation20], %s6356_s8 }
 0x20b   : > { %s871_s27 = scalar_lea.vmem [#allocation19], %s6367_s19 }
 0x20c   : > { %5560 = dma.done.wait (%p7063_p5), %s869_s25, 272  }
 0x20d   : > { %5562 = vsyncadd (%p7063_p5), %s869_s25, 4294967024  ;;  %s880_s20 = scalar_lea.vmem [#allocation21], %s6381_s13  ;;  %s886_s28 = scalar_lea.sflag [#allocation23], %s6356_s8 }
 0x20e   : > { %s888_s11 = scalar_lea.vmem [#allocation22], %s6367_s19 }
 0x20f   : > { %5564 = dma.done.wait (%p7063_p5), %s886_s28, 1040  }
 0x210   : > { %5566 = vsyncadd (%p7063_p5), %s886_s28, 4294966256  ;;  %s4620_s17 = sshll.u32 %s6367_s19, 6  ;;  %s903_s1 = scalar_lea.sflag [#allocation26], %s6356_s8 }
 0x211   : > { %s6412_s16 = scalar_lea.vmem [#allocation24], %s4620_s17  ;;  %s905_s15 = scalar_lea.vmem [#allocation25], %s6367_s19 }
 0x212   : > { %5568 = dma.done.wait (%p7063_p5), %s903_s1, 16  }
 0x213   : > { %5570 = vsyncadd (%p7063_p5), %s903_s1, 4294967280  ;;  %p7064_p7 = scmp.eq.s32.totalorder %s5806_s18, 0 }
 0x215   : > { %5572 = dma.done.wait (%p7064_p7), [#allocation26], 16   ;;  %p7065_p2 = pmov %p7064_p7 }
 0x216   : > { %s1012_s25 = scalar_lea.vmem [#allocation28], %s6347_s10  ;;  %s7066_s28 = sld [smem:[#allocation44_spill]] }
 0x217   : > { %5574 = vsyncadd (%p7065_p2), [#allocation26], 4294967280 }
 0x21c   : > { %p4622_p4 = scmp.ne.s32.totalorder %s7066_s28, 0 }
 0x21d   : > { %v1020_v1 = vld [vmem:[%s6360_s14] sm:$0xff] (!%p4622_p4)  ;;  %vm1022_vm0 = vcmask (!%p4622_p4), 261120   ;;  %v1021_v2 = vld [vmem:[%s6360_s14 + $0x8] sm:$0xff] (!%p4622_p4) }
 0x21e   : > { %1019 = sbr.rel (%p4622_p4) target bundleno = 549 (0x225), region = 148  ;;  %1023 = vst.msk [vmem:[#allocation2] sm:$0xff] (!%p4622_p4), %vm1022_vm0, %v1020_v1  ;;  %1024 = vst.msk [vmem:[#allocation2 + $0x8] sm:$0xff] (!%p4622_p4), %vm1022_vm0, %v1021_v2 }
 0x225 PF: > { %v1025_v3 = vld [vmem:[#allocation2] sm:$0xff]  ;;  %vm1028_vm1 = vcmask 261120   ;;  %v1026_v4 = vld [vmem:[#allocation2 + $0x8] sm:$0xff]  ;;  %v5642_v18 = vmov 0.0   ;;  %vm5643_vm2 = vmmov 0   ;;  %s5644_s18 = smov 112   ;;  %v1167_v54 = vlaneseq }
 0x226   : > { %v1029_v5 = vsel %vm1028_vm1, %v1025_v3, 0.0  ;;  %v1032_v6 = vsel %vm1028_vm1, %v1026_v4, 0.0  ;;  %v4986_v17 = vld [vmem:[%s830_s22] sm:$0xff]   ;;  %4717 = vmatprep.subr.bf16.mxu1 %v5642_v18  ;;  %4737 = vmatprep.subr.bf16.mxu0 %v5642_v18  ;;  %v4987_v19 = vld [vmem:[%s830_s22 + $0x8] sm:$0xff]   ;;  %s5645_s8 = smov 120   ;;  %s5646_s14 = smov 104  }
 0x227   : > { %1030 = vadd.xlane.f32.xlu0 %v1029_v5  ;;  %4718 = vmatpush3.bf16.msra.mxu1 %v4986_v17  ;;  %v4623_v28 = vld [vmem:[%s813_s23] ss:$0 sm:$0xff]  ;;  %s5647_s24 = smov 96   ;;  %v5648_v52 = vmov 1983009808   ;;  %v6483_v58 = vshrl.u32 %v1167_v54, 7 }
 0x228   : > { %4721 = vmatprep.mubr.msk.bf16.mxu1 %vm5643_vm2, %v5642_v18  ;;  %4719 = vmatprep.subr.bf16.mxu1 %v5642_v18  ;;  %v4624_v32 = vld [vmem:[%s821_s7] ss:$0 sm:$0xff]  ;;  %v1165_v53 = vunpack.c.l.s4 %v5648_v52  ;;  %v5649_v59 = vmov 1934713408   ;;  %vm3014_vm3 = vcmask 1043456   ;;  %vm3010_vm4 = vcmask 64512  }
 0x229   : > { %4739 = vmatprep.mubr.msk.bf16.mxu0 %vm5643_vm2, %v5642_v18  ;;  %v4625_v37 = vld [vmem:[%s838_s29] ss:$0 sm:$0xff]  ;;  %v1197_v60 = vunpack.c.l.s4 %v5649_v59  ;;  %vm3223_vm7 = vcmask 130048   ;;  %s5652_s23 = smov 16   ;;  %s5653_s7 = smov 8   ;;  %vm3796_vm8 = vcmask 195584  }
 0x22a   : > { %v1166_v57 = vunpack.c.0.s8 %v1165_v53  ;;  %s5654_s22 = smov 24   ;;  %s7069_s13 = sld [smem:[#allocation44_spill]] }
 0x22b   : > { %1033 = vadd.xlane.f32.xlu0 %v1032_v6  ;;  %4720 = vmatpush3.bf16.msra.mxu1 %v4987_v19  ;;  %v1198_v1 = vunpack.c.0.s8 %v1197_v60 }
 0x22c   : > { %4725 = vmatprep.subr.bf16.mxu1 %v5642_v18  ;;  %v6486_v0 = vsub.s32 %v1166_v57, %v6483_v58 }
 0x230   : > { %p4669_p8 = scmp.ne.s32.totalorder %s7069_s13, 1 }
 0x231   : > { %vm5656_vm9 = vmmov (!%p4669_p8), 0   ;;  %s5659_s19 = smov (!%p4669_p8), 8   ;;  %s5660_s29 = smov (!%p4669_p8), 120  }
 0x2b4   : > { %v1031_v7 = vpop.xlane.xlu0 %1030 }
 0x2b5   : > { %v1036_v8 = vmul.f32 0.03125, %v1031_v7 }
 0x2b7   : > { %v1038_v9 = vsub.f32 %v1025_v3, %v1036_v8 }
 0x2b8   : > { %v1034_v10 = vpop.xlane.xlu0 %1033 }
 0x2b9   : > { %v1037_v11 = vmul.f32 0.03125, %v1034_v10  ;;  %v1040_v12 = vmul.f32 %v1038_v9, %v1038_v9  ;;  %v6493_v10 = vsub.s32 %v1198_v1, %v6483_v58 }
 0x2bb   : > { %v1039_v13 = vsub.f32 %v1026_v4, %v1037_v11  ;;  %v1042_v14 = vsel %vm1028_vm1, %v1040_v12, 0.0 }
 0x2bc   : > { %1043 = vadd.xlane.f32.xlu1 %v1042_v14 }
 0x2bd   : > { %v1041_v15 = vmul.f32 %v1039_v13, %v1039_v13 }
 0x2bf   : > { %v1045_v16 = vsel %vm1028_vm1, %v1041_v15, 0.0 }
 0x2c0   : > { %1046 = vadd.xlane.f32.xlu1 %v1045_v16 }
 0x349   : > { %v1044_v20 = vpop.xlane.xlu1 %1043 }
 0x34a   : > { %v1048_v21 = vmul.f32 0.03125, %v1044_v20 }
 0x34c   : > { %v1050_v22 = vadd.f32 1e-05, %v1048_v21 }
 0x34d   : > { %v1047_v23 = vpop.xlane.xlu1 %1046 }
 0x34e   : > { %5000 = vrsqrt.f32 %v1050_v22  ;;  %v1049_v24 = vmul.f32 0.03125, %v1047_v23 }
 0x350   : > { %v1051_v25 = vadd.f32 1e-05, %v1049_v24 }
 0x352   : > { %5002 = vrsqrt.f32 %v1051_v25 }
 0x358   : > { %v5001_v26 = vpop.eup %5000 }
 0x359   : > { %v1054_v27 = vmul.f32 %v5001_v26, %v1038_v9 }
 0x35b   : > { %v1063_v31 = vmul.f32 %v4623_v28, %v1054_v27 }
 0x35c   : > { %v5003_v29 = vpop.eup %5002 }
 0x35d   : > { %v1055_v30 = vmul.f32 %v5003_v29, %v1039_v13  ;;  %v1072_v34 = vadd.f32 %v4624_v32, %v1063_v31 }
 0x35f   : > { %v1064_v33 = vmul.f32 %v4623_v28, %v1055_v30 }
 0x361   : > { %v1073_v35 = vadd.f32 %v4624_v32, %v1064_v33 }
 0x363   : > { %v1074_v36 = vpack.c.bf16 %v1073_v35, %v1072_v34 }
 0x365   : > { %4722 = vmatmul.mubr.msk.bf16.vlgmr.msra.gmra.mrb[0].mxu1 %vm1028_vm1, %v1074_v36 }
 0x366   : > { %4727 = vmatprep.mubr.msk.bf16.mxu1 %vm5643_vm2, %v5642_v18 }
 0x438   : > { %v1135_v38 = vpop.f32.mrb[0].mxu1 }
 0x439   : > { %v6453_v39 = vadd.f32 %v4625_v37, %v1135_v38  ;;  %v4723_v40 = vpop.f32.mrb[1].mxu1 }
 0x43a   : > { %v1138_v41 = vpop.f32.mrb[2].mxu1 }
 0x43b   : > { %1150 = vrot.lane.b32.xlu1 %v6453_v39, %s5644_s18  ;;  %1144 = vrot.lane.b32.xlu0 %v6453_v39, %s5645_s8  ;;  %v4724_v42 = vpop.f32.mrb[3].mxu1  ;;  %v6457_v43 = vadd.f32 %v4625_v37, %v1138_v41 }
 0x43f   : > { %1156 = vrot.lane.b32.xlu1 %v6453_v39, %s5646_s14  ;;  %1152 = vrot.lane.b32.xlu0 %v6457_v43, %s5644_s18 }
 0x443   : > { %1438 = vrot.lane.b32.xlu0 %v6453_v39, %s5647_s24  ;;  %1146 = vrot.lane.b32.xlu1 %v6457_v43, %s5645_s8 }
 0x447   : > { %1440 = vrot.lane.b32.xlu0 %v6457_v43, %s5647_s24  ;;  %1158 = vrot.lane.b32.xlu1 %v6457_v43, %s5646_s14 }
 0x4ad   : > { %v6465_v44 = vpop.permute.xlu1 %1150  ;;  %v6467_v45 = vpop.permute.xlu0 %1144 }
 0x4ae   : > { %1446 = vrot.lane.b32.xlu0 %v6465_v44, %s5647_s24  ;;  %1442 = vrot.lane.b32.xlu1 %v6467_v45, %s5647_s24 }
 0x4b1   : > { %v6471_v46 = vpop.permute.xlu1 %1156  ;;  %v6473_v47 = vpop.permute.xlu0 %1152 }
 0x4b2   : > { %1448 = vrot.lane.b32.xlu0 %v6473_v47, %s5647_s24  ;;  %1450 = vrot.lane.b32.xlu1 %v6471_v46, %s5647_s24 }
 0x4b5   : > { %v6477_v48 = vpop.permute.xlu1 %1146  ;;  %v1439_v50 = vpop.permute.xlu0 %1438 }
 0x4b6   : > { %1444 = vrot.lane.b32.xlu1 %v6477_v48, %s5647_s24 }
 0x4b9   : > { %v6480_v49 = vpop.permute.xlu1 %1158  ;;  %v1441_v51 = vpop.permute.xlu0 %1440 }
 0x4ba   : > { %1452 = vrot.lane.b32.xlu1 %v6480_v49, %s5647_s24 }
 0x520   : > { %v1443_v55 = vpop.permute.xlu1 %1442  ;;  %v1447_v56 = vpop.permute.xlu0 %1446 }
 0x521   : > { %v1462_v61 = vcombine.low %v1439_v50, %v1447_v56  ;;  %v1463_v62 = vcombine.high %v1439_v50, %v1447_v56 }
 0x523   : > { %v1470_v4 = vrot.slane %v1462_v61, %v6486_v0  ;;  %v1477_v5 = vrot.slane %v1463_v62, %v6486_v0 }
 0x524   : > { %v1451_v63 = vpop.permute.xlu1 %1450  ;;  %v1449_v6 = vpop.permute.xlu0 %1448 }
 0x525   : > { %v1478_v2 = vcombine.low %v1443_v55, %v1451_v63  ;;  %v1479_v3 = vcombine.high %v1443_v55, %v1451_v63  ;;  %v1530_v13 = vcombine.low %v1441_v51, %v1449_v6  ;;  %v1531_v26 = vcombine.high %v1441_v51, %v1449_v6 }
 0x527   : > { %v1486_v7 = vrot.slane %v1478_v2, %v6486_v0  ;;  %v1493_v8 = vrot.slane %v1479_v3, %v6486_v0  ;;  %v1538_v20 = vrot.slane %v1530_v13, %v6486_v0  ;;  %v1545_v32 = vrot.slane %v1531_v26, %v6486_v0 }
 0x528   : > { %v1445_v9 = vpop.permute.xlu1 %1444 }
 0x529   : > { %v1511_v11 = vcombine.high %v1477_v5, %v1493_v8  ;;  %v1494_v12 = vcombine.low %v1470_v4, %v1486_v7  ;;  %v1495_v16 = vcombine.high %v1470_v4, %v1486_v7  ;;  %v1510_v21 = vcombine.low %v1477_v5, %v1493_v8 }
 0x52b   : > { %v1525_v14 = vrot.slane %v1511_v11, %v6493_v10  ;;  %v1502_v15 = vrot.slane %v1494_v12, %v6493_v10  ;;  %v1509_v24 = vrot.slane %v1495_v16, %v6493_v10  ;;  %v1518_v29 = vrot.slane %v1510_v21, %v6493_v10 }
 0x52c   : > { %v1453_v17 = vpop.permute.xlu1 %1452 }
 0x52d   : > { %v1546_v19 = vcombine.low %v1445_v9, %v1453_v17  ;;  %1790 = vxpose.xlu1.b32.start.end [1/1] (short) (narrow) %v1525_v14, 8  ;;  %1598 = vxpose.xlu0.b32.start.end [1/1] (short) (narrow) %v1502_v15, 8  ;;  %v1547_v22 = vcombine.high %v1445_v9, %v1453_v17  ;;  %v1526_v25 = vcombine.high %v1502_v15, %v5642_v18 }
 0x52e   : > { %v1527_v33 = vcombine.high %v1509_v24, %v5642_v18  ;;  %v1528_v36 = vcombine.high %v1518_v29, %v5642_v18  ;;  %v1529_v40 = vcombine.high %v1525_v14, %v5642_v18 }
 0x52f   : > { %v1554_v23 = vrot.slane %v1546_v19, %v6486_v0  ;;  %v1561_v28 = vrot.slane %v1547_v22, %v6486_v0 }
 0x531   : > { %1662 = vxpose.xlu0.b32.start.end [1/1] (short) (narrow) %v1509_v24, 8  ;;  %1630 = vxpose.xlu1.b32.start.end [1/1] (short) (narrow) %v1526_v25, 8  ;;  %v1562_v27 = vcombine.low %v1538_v20, %v1554_v23  ;;  %v1563_v31 = vcombine.high %v1538_v20, %v1554_v23  ;;  %v1578_v35 = vcombine.low %v1545_v32, %v1561_v28 }
 0x532   : > { %v1579_v38 = vcombine.high %v1545_v32, %v1561_v28 }
 0x533   : > { %v1570_v30 = vrot.slane %v1562_v27, %v6493_v10  ;;  %v1577_v34 = vrot.slane %v1563_v31, %v6493_v10  ;;  %v1586_v37 = vrot.slane %v1578_v35, %v6493_v10 }
 0x534   : > { %v1593_v41 = vrot.slane %v1579_v38, %v6493_v10 }
 0x535   : > { %1726 = vxpose.xlu0.b32.start.end [1/1] (short) (narrow) %v1518_v29, 8  ;;  %1854 = vxpose.xlu1.b32.start.end [1/1] (short) (narrow) %v1570_v30, 8  ;;  %v1594_v42 = vcombine.high %v1570_v30, %v5642_v18  ;;  %v1595_v50 = vcombine.high %v1577_v34, %v5642_v18  ;;  %v1596_v51 = vcombine.high %v1586_v37, %v5642_v18 }
 0x536   : > { %v1597_v52 = vcombine.high %v1593_v41, %v5642_v18 }
 0x539   : > { %1694 = vxpose.xlu0.b32.start.end [1/1] (short) (narrow) %v1527_v33, 8  ;;  %1918 = vxpose.xlu1.b32.start.end [1/1] (short) (narrow) %v1577_v34, 8 }
 0x53d   : > { %1758 = vxpose.xlu0.b32.start.end [1/1] (short) (narrow) %v1528_v36, 8  ;;  %1982 = vxpose.xlu1.b32.start.end [1/1] (short) (narrow) %v1586_v37, 8 }
 0x541   : > { %1822 = vxpose.xlu0.b32.start.end [1/1] (short) (narrow) %v1529_v40, 8  ;;  %2046 = vxpose.xlu1.b32.start.end [1/1] (short) (narrow) %v1593_v41, 8 }
 0x545   : > { %1886 = vxpose.xlu0.b32.start.end [1/1] (short) (narrow) %v1594_v42, 8 }
 0x549   : > { %1950 = vxpose.xlu0.b32.start.end [1/1] (short) (narrow) %v1595_v50, 8 }
 0x54d   : > { %2014 = vxpose.xlu0.b32.start.end [1/1] (short) (narrow) %v1596_v51, 8 }
 0x551   : > { %2078 = vxpose.xlu0.b32.start.end [1/1] (short) (narrow) %v1597_v52, 8 }
 0x5ad   : > { %v6515_v53 = vpop.trf.xlu0  ;;  %v1806_v55 = vpop.trf.xlu1 }
 0x5b1   : > { %v6517_v54 = vpop.trf.xlu0  ;;  %v1646_v57 = vpop.trf.xlu1 }
 0x5b2   : > { %v2110_v63 = vcombine.low %v6515_v53, %v6517_v54  ;;  %v2111_v41 = vcombine.high %v6515_v53, %v6517_v54 }
 0x5b4   : > { %v2118_v5 = vrot.slane %v2110_v63, %v6486_v0  ;;  %v2125_v53 = vrot.slane %v2111_v41, %v6486_v0  ;;  %v1179_v41 = vcombine.high %v6467_v45, %v6471_v46 }
 0x5b5   : > { %v1742_v56 = vpop.trf.xlu0  ;;  %v6519_v60 = vpop.trf.xlu1 }
 0x5b6   : > { %v2142_v1 = vcombine.low %v1742_v56, %v1806_v55  ;;  %v2143_v35 = vcombine.high %v1742_v56, %v1806_v55 }
 0x5b8   : > { %v2150_v7 = vrot.slane %v2142_v1, %v6486_v0  ;;  %v2157_v63 = vrot.slane %v2143_v35, %v6486_v0 }
 0x5b9   : > { %v1710_v59 = vpop.trf.xlu0  ;;  %v6524_v4 = vpop.trf.xlu1 }
 0x5ba   : > { %v2126_v61 = vcombine.low %v1646_v57, %v1710_v59  ;;  %v2246_v23 = vcombine.low %v6519_v60, %v6524_v4  ;;  %v2127_v36 = vcombine.high %v1646_v57, %v1710_v59  ;;  %v2247_v54 = vcombine.high %v6519_v60, %v6524_v4 }
 0x5bc   : > { %v2134_v2 = vrot.slane %v2126_v61, %v6486_v0  ;;  %v2254_v27 = vrot.slane %v2246_v23, %v6486_v0  ;;  %v2141_v55 = vrot.slane %v2127_v36, %v6486_v0 }
 0x5bd   : > { %v1774_v62 = vpop.trf.xlu0  ;;  %v1998_v13 = vpop.trf.xlu1 }
 0x5be   : > { %v2174_v9 = vcombine.low %v2118_v5, %v2134_v2  ;;  %v2175_v37 = vcombine.high %v2118_v5, %v2134_v2 }
 0x5c0   : > { %v2182_v14 = vrot.slane %v2174_v9, %v6493_v10  ;;  %v2189_v56 = vrot.slane %v2175_v37, %v6493_v10  ;;  %v1246_v37 = vcombine.low %v6477_v48, %v6480_v49 }
 0x5c1   : > { %v1838_v3 = vpop.trf.xlu0  ;;  %v2062_v22 = vpop.trf.xlu1 }
 0x5c2   : > { %v2158_v6 = vcombine.low %v1774_v62, %v1838_v3  ;;  %v2278_v25 = vcombine.low %v1998_v13, %v2062_v22  ;;  %v2159_v32 = vcombine.high %v1774_v62, %v1838_v3  ;;  %v2279_v1 = vcombine.high %v1998_v13, %v2062_v22 }
 0x5c3   : > { %v2261_v13 = vrot.slane %v2247_v54, %v6486_v0 }
 0x5c4   : > { %v2166_v8 = vrot.slane %v2158_v6, %v6486_v0  ;;  %v2286_v30 = vrot.slane %v2278_v25, %v6486_v0  ;;  %v2173_v42 = vrot.slane %v2159_v32, %v6486_v0 }
 0x5c5   : > { %v1902_v11 = vpop.trf.xlu0 }
 0x5c6   : > { %v2206_v12 = vcombine.low %v2150_v7, %v2166_v8  ;;  %v2207_v33 = vcombine.high %v2150_v7, %v2166_v8  ;;  %v2222_v2 = vcombine.low %v2157_v63, %v2173_v42  ;;  %v2190_v8 = vcombine.low %v2125_v53, %v2141_v55 }
 0x5c7   : > { %v2223_v22 = vcombine.high %v2157_v63, %v2173_v42  ;;  %v1230_v42 = vcombine.low %v6457_v43, %v6473_v47 }
 0x5c8   : > { %v2214_v15 = vrot.slane %v2206_v12, %v6493_v10  ;;  %v2221_v50 = vrot.slane %v2207_v33, %v6493_v10 }
 0x5c9   : > { %v1966_v16 = vpop.trf.xlu0 }
 0x5ca   : > { %v2239_v17 = vcombine.high %v2182_v14, %v2214_v15  ;;  %v2238_v19 = vcombine.low %v2182_v14, %v2214_v15  ;;  %v2262_v20 = vcombine.low %v1902_v11, %v1966_v16  ;;  %v2263_v57 = vcombine.high %v1902_v11, %v1966_v16 }
 0x5cb   : > { %v2241_v5 = vcombine.high %v2189_v56, %v2221_v50  ;;  %v2240_v6 = vcombine.low %v2189_v56, %v2221_v50  ;;  %v2293_v11 = vrot.slane %v2279_v1, %v6486_v0  ;;  %v2230_v15 = vrot.slane %v2222_v2, %v6493_v10 }
 0x5cc   : > { %2414 = vxpose.xlu0.b32.start [1/2] (short) (narrow) %v2239_v17, 8  ;;  %2382 = vxpose.xlu1.b32.start [1/2] (short) (narrow) %v2238_v19, 8  ;;  %v2270_v24 = vrot.slane %v2262_v20, %v6486_v0  ;;  %v2277_v9 = vrot.slane %v2263_v57, %v6486_v0  ;;  %v2198_v17 = vrot.slane %v2190_v8, %v6493_v10 }
 0x5cd   : > { %v2030_v21 = vpop.trf.xlu0  ;;  %v1231_v50 = vcombine.high %v6457_v43, %v6473_v47  ;;  %v1238_v56 = vrot.slane %v1230_v42, %v6486_v0 }
 0x5ce   : > { %v2310_v29 = vcombine.low %v2254_v27, %v2270_v24  ;;  %v2311_v59 = vcombine.high %v2254_v27, %v2270_v24  ;;  %v2326_v16 = vcombine.low %v2261_v13, %v2277_v9  ;;  %v2243_v19 = vcombine.high %v2198_v17, %v2230_v15 }
 0x5cf   : > { %v2242_v20 = vcombine.low %v2198_v17, %v2230_v15  ;;  %v2191_v24 = vcombine.high %v2125_v53, %v2141_v55  ;;  %v1193_v55 = vrot.slane %v1179_v41, %v6486_v0  ;;  %v1245_v57 = vrot.slane %v1231_v50, %v6486_v0 }
 0x5d0   : > { %v2318_v38 = vrot.slane %v2310_v29, %v6493_v10  ;;  %v2325_v12 = vrot.slane %v2311_v59, %v6493_v10  ;;  %v2334_v23 = vrot.slane %v2326_v16, %v6493_v10  ;;  %v2327_v29 = vcombine.high %v2261_v13, %v2277_v9 }
 0x5d1   : > { %v2094_v26 = vpop.trf.xlu0 }
 0x5d2   : > { %v2294_v28 = vcombine.low %v2030_v21, %v2094_v26  ;;  %v2295_v51 = vcombine.high %v2030_v21, %v2094_v26 }
 0x5d4   : > { %v2302_v31 = vrot.slane %v2294_v28, %v6486_v0  ;;  %v2309_v3 = vrot.slane %v2295_v51, %v6486_v0  ;;  %v2237_v28 = vrot.slane %v2223_v22, %v6493_v10  ;;  %v1162_v51 = vcombine.low %v6453_v39, %v6465_v44 }
 0x5d6   : > { %v2342_v34 = vcombine.low %v2286_v30, %v2302_v31  ;;  %v2343_v52 = vcombine.high %v2286_v30, %v2302_v31  ;;  %v2358_v14 = vcombine.low %v2293_v11, %v2309_v3  ;;  %v2359_v25 = vcombine.high %v2293_v11, %v2309_v3 }
 0x5d7   : > { %v2205_v30 = vrot.slane %v2191_v24, %v6493_v10  ;;  %v1170_v53 = vrot.slane %v1162_v51, %v6486_v0 }
 0x5d8   : > { %v2350_v40 = vrot.slane %v2342_v34, %v6493_v10  ;;  %v2357_v7 = vrot.slane %v2343_v52, %v6493_v10  ;;  %v2366_v21 = vrot.slane %v2358_v14, %v6493_v10  ;;  %v2373_v33 = vrot.slane %v2359_v25, %v6493_v10 }
 0x5d9   : > { %v2245_v31 = vcombine.high %v2205_v30, %v2237_v28  ;;  %v2244_v32 = vcombine.low %v2205_v30, %v2237_v28  ;;  %v2341_v34 = vrot.slane %v2327_v29, %v6493_v10  ;;  %v1163_v52 = vcombine.high %v6453_v39, %v6465_v44 }
 0x5da   : > { %v2375_v61 = vcombine.high %v2318_v38, %v2350_v40  ;;  %v2374_v62 = vcombine.low %v2318_v38, %v2350_v40  ;;  %v2377_v60 = vcombine.high %v2325_v12, %v2357_v7  ;;  %v2376_v4 = vcombine.low %v2325_v12, %v2357_v7 }
 0x5db   : > { %v2379_v26 = vcombine.high %v2334_v23, %v2366_v21  ;;  %v2378_v27 = vcombine.low %v2334_v23, %v2366_v21  ;;  %v2381_v35 = vcombine.high %v2341_v34, %v2373_v33  ;;  %v2380_v36 = vcombine.low %v2341_v34, %v2373_v33 }
 0x5dc   : > { %2415 = vxpose.xlu0.b32.end [2/2] (short) (narrow) %v2375_v61, 8  ;;  %2383 = vxpose.xlu1.b32.end [2/2] (short) (narrow) %v2374_v62, 8  ;;  %v1247_v38 = vcombine.high %v6477_v48, %v6480_v49  ;;  %v1178_v40 = vcombine.low %v6467_v45, %v6471_v46  ;;  %v1254_v61 = vrot.slane %v1246_v37, %v6486_v0 }
 0x5dd   : > { %v1177_v54 = vrot.slane %v1163_v52, %v6486_v0 }
 0x5de   : > { %v1261_v62 = vrot.slane %v1247_v38, %v6486_v0  ;;  %v1186_v63 = vrot.slane %v1178_v40, %v6486_v0  ;;  %v1262_v2 = vcombine.low %v1238_v56, %v1254_v61  ;;  %v1263_v3 = vcombine.high %v1238_v56, %v1254_v61 }
 0x5df   : > { %v1210_v9 = vcombine.low %v1177_v54, %v1193_v55  ;;  %v1211_v11 = vcombine.high %v1177_v54, %v1193_v55 }
 0x5e0   : > { %2478 = vxpose.xlu0.b32.start [1/2] (short) (narrow) %v2241_v5, 8  ;;  %2446 = vxpose.xlu1.b32.start [1/2] (short) (narrow) %v2240_v6, 8  ;;  %v1278_v5 = vcombine.low %v1245_v57, %v1261_v62  ;;  %v1279_v6 = vcombine.high %v1245_v57, %v1261_v62  ;;  %v1194_v7 = vcombine.low %v1170_v53, %v1186_v63 }
 0x5e1   : > { %v1195_v8 = vcombine.high %v1170_v53, %v1186_v63  ;;  %v1270_v12 = vrot.slane %v1262_v2, %v6493_v10  ;;  %v1277_v13 = vrot.slane %v1263_v3, %v6493_v10 }
 0x5e2   : > { %v1286_v14 = vrot.slane %v1278_v5, %v6493_v10  ;;  %v1202_v16 = vrot.slane %v1194_v7, %v6493_v10 }
 0x5e3   : > { %v1209_v17 = vrot.slane %v1195_v8, %v6493_v10  ;;  %v1366_v21 = vcombine.low %v1270_v12, %v1277_v13  ;;  %v4631_v22 = vcombine.high %v1270_v12, %v1277_v13 }
 0x5e4   : > { %2479 = vxpose.xlu0.b32.end [2/2] (short) (narrow) %v2377_v60, 8  ;;  %2447 = vxpose.xlu1.b32.end [2/2] (short) (narrow) %v2376_v4, 8  ;;  %v1293_v60 = vrot.slane %v1279_v6, %v6493_v10 }
 0x5e5   : > { %v1298_v29 = vcombine.low %v1202_v16, %v1209_v17  ;;  %v4629_v30 = vcombine.high %v1202_v16, %v1209_v17  ;;  %v1373_v33 = vrot.slane %v1366_v21, %v6486_v0  ;;  %v1381_v34 = vrot.slane %v4631_v22, %v6486_v0 }
 0x5e6   : > { %v1382_v23 = vcombine.low %v1286_v14, %v1293_v60  ;;  %v4632_v24 = vcombine.high %v1286_v14, %v1293_v60 }
 0x5e7   : > { %v1305_v40 = vrot.slane %v1298_v29, %v6486_v0  ;;  %v1313_v41 = vrot.slane %v4629_v30, %v6486_v0  ;;  %v1398_v63 = vcombine.low %v1373_v33, %v1381_v34  ;;  %v1399_v56 = vcombine.high %v1373_v33, %v1381_v34 }
 0x5e8   : > { %2542 = vxpose.xlu0.b32.start [1/2] (short) (narrow) %v2243_v19, 8  ;;  %2510 = vxpose.xlu1.b32.start [1/2] (short) (narrow) %v2242_v20, 8  ;;  %v1218_v19 = vrot.slane %v1210_v9, %v6493_v10  ;;  %v1225_v20 = vrot.slane %v1211_v11, %v6493_v10 }
 0x5e9   : > { %v1330_v2 = vcombine.low %v1305_v40, %v1313_v41  ;;  %v1331_v5 = vcombine.high %v1305_v40, %v1313_v41  ;;  %v1406_v9 = vrot.slane %v1398_v63, %v6493_v10  ;;  %v1413_v12 = vrot.slane %v1399_v56, %v6493_v10 }
 0x5ea   : > { %v5650_v63 = vmov 0  }
 0x5eb   : > { %v1338_v16 = vrot.slane %v1330_v2, %v6493_v10 }
 0x5ec   : > { %2543 = vxpose.xlu0.b32.end [2/2] (short) (narrow) %v2379_v26, 8  ;;  %2511 = vxpose.xlu1.b32.end [2/2] (short) (narrow) %v2378_v27, 8 }
 0x5f0   : > { %2606 = vxpose.xlu0.b32.start [1/2] (short) (narrow) %v2245_v31, 8  ;;  %2574 = vxpose.xlu1.b32.start [1/2] (short) (narrow) %v2244_v32, 8  ;;  %v1314_v31 = vcombine.low %v1218_v19, %v1225_v20  ;;  %v4630_v32 = vcombine.high %v1218_v19, %v1225_v20  ;;  %v1345_v19 = vrot.slane %v1331_v5, %v6493_v10 }
 0x5f2   : > { %v1321_v42 = vrot.slane %v1314_v31, %v6486_v0  ;;  %v1329_v50 = vrot.slane %v4630_v32, %v6486_v0 }
 0x5f4   : > { %2607 = vxpose.xlu0.b32.end [2/2] (short) (narrow) %v2381_v35, 8  ;;  %2575 = vxpose.xlu1.b32.end [2/2] (short) (narrow) %v2380_v36, 8  ;;  %v1389_v35 = vrot.slane %v1382_v23, %v6486_v0  ;;  %v1397_v36 = vrot.slane %v4632_v24, %v6486_v0  ;;  %v1346_v3 = vcombine.low %v1321_v42, %v1329_v50 }
 0x5f5   : > { %v1347_v8 = vcombine.high %v1321_v42, %v1329_v50 }
 0x5f6   : > { %v1414_v55 = vcombine.low %v1389_v35, %v1397_v36  ;;  %v1415_v57 = vcombine.high %v1389_v35, %v1397_v36  ;;  %v1354_v17 = vrot.slane %v1346_v3, %v6493_v10 }
 0x5f7   : > { %v1361_v22 = vrot.slane %v1347_v8, %v6493_v10 }
 0x5f8   : > { %v1422_v11 = vrot.slane %v1414_v55, %v6493_v10  ;;  %v1429_v13 = vrot.slane %v1415_v57, %v6493_v10 }
 0x5f9   : > { %v1364_v31 = vcombine.low %v1345_v19, %v1361_v22 }
 0x5fa   : > { %v1433_v50 = vcombine.high %v1413_v12, %v1429_v13 }
 0x658   : > { %v2430_v59 = vpop.trf.xlu0  ;;  %v2398_v1 = vpop.trf.xlu1 }
 0x660   : > { %v2494_v4 = vpop.trf.xlu0  ;;  %v2462_v15 = vpop.trf.xlu1 }
 0x661   : > { %v2646_v27 = vcombine.low %v2430_v59, %v2494_v4  ;;  %v2638_v28 = vcombine.low %v2398_v1, %v2462_v15 }
 0x663   : > { %v2653_v37 = vrot.slane %v2646_v27, %v6486_v0  ;;  %v2645_v38 = vrot.slane %v2638_v28, %v6486_v0  ;;  %v1432_v27 = vcombine.low %v1413_v12, %v1429_v13  ;;  %v1362_v28 = vcombine.low %v1338_v16, %v1354_v17 }
 0x665   : > { %v2670_v59 = vcombine.low %v2645_v38, %v2653_v37  ;;  %v2671_v1 = vcombine.high %v2645_v38, %v2653_v37  ;;  %v1436_v34 = vpack.c.bf16 %v1432_v27, %v1364_v31  ;;  %v1431_v37 = vcombine.high %v1406_v9, %v1422_v11 }
 0x666   : > { %v1363_v38 = vcombine.high %v1338_v16, %v1354_v17 }
 0x667   : > { %v2678_v14 = vrot.slane %v2670_v59, %v6493_v10  ;;  %v2685_v4 = vrot.slane %v2671_v1, %v6493_v10 }
 0x668   : > { %v2558_v25 = vpop.trf.xlu0  ;;  %v2526_v26 = vpop.trf.xlu1  ;;  %v1435_v41 = vpack.c.bf16 %v1431_v37, %v1363_v38 }
 0x670   : > { %v2622_v51 = vpop.trf.xlu0  ;;  %v2590_v52 = vpop.trf.xlu1 }
 0x671   : > { %v2662_v61 = vcombine.low %v2558_v25, %v2622_v51  ;;  %v2654_v62 = vcombine.low %v2526_v26, %v2590_v52  ;;  %v1430_v26 = vcombine.low %v1406_v9, %v1422_v11  ;;  %v1365_v51 = vcombine.high %v1345_v19, %v1361_v22 }
 0x673   : > { %v2669_v53 = vrot.slane %v2662_v61, %v6486_v0  ;;  %v2661_v54 = vrot.slane %v2654_v62, %v6486_v0  ;;  %v1434_v33 = vpack.c.bf16 %v1430_v26, %v1362_v28  ;;  %v1437_v52 = vpack.c.bf16 %v1433_v50, %v1365_v51  ;;  %v6641_v61 = vld [vmem:[%s796_s9] sm:$0x1]  ;;  %s5651_s9 = smov 64  }
 0x674   : > { %vm3208_vm5 = vcmp.gt.f32.partialorder %v6641_v61, 0.5  ;;  %v6645_v62 = vsub.s32 0, %v6483_v58 }
 0x675   : > { %v2686_v6 = vcombine.low %v2661_v54, %v2669_v53  ;;  %v2687_v7 = vcombine.high %v2661_v54, %v2669_v53  ;;  %v3209_v55 = vsel %vm3208_vm5, 1, %v5650_v63 }
 0x676   : > { %v3213_v56 = vrot.slane %v3209_v55, %v6645_v62 }
 0x677   : > { %v2694_v60 = vrot.slane %v2686_v6, %v6493_v10  ;;  %v2701_v15 = vrot.slane %v2687_v7, %v6493_v10 }
 0x678   : > { %vm6650_vm6 = vcmp.eq.s32.totalorder %v3213_v56, 1 }
 0x679   : > { %v2702_v20 = vcombine.low %v2678_v14, %v2694_v60  ;;  %v2704_v21 = vcombine.low %v2685_v4, %v2701_v15  ;;  %v2703_v23 = vcombine.high %v2678_v14, %v2694_v60  ;;  %v2705_v36 = vcombine.high %v2685_v4, %v2701_v15 }
 0x67b   : > { %v2706_v24 = vpack.c.bf16 %v2702_v20, %v2702_v20  ;;  %v2708_v25 = vpack.c.bf16 %v2704_v21, %v2704_v21  ;;  %v2707_v32 = vpack.c.bf16 %v2703_v23, %v2703_v23  ;;  %v2709_v40 = vpack.c.bf16 %v2705_v36, %v2705_v36 }
 0x67d   : > { %v3016_v29 = vsel %vm3014_vm3, %v2706_v24, 0  ;;  %v3110_v30 = vsel %vm3014_vm3, %v2708_v25, 0  ;;  %v3063_v35 = vsel %vm3014_vm3, %v2707_v32, 0  ;;  %v3157_v42 = vsel %vm3014_vm3, %v2709_v40, 0 }
 0x67e   : > { %4726 = vmatpush3.bf16.msra.mxu1 %v3016_v29  ;;  %4738 = vmatpush3.bf16.msra.mxu0 %v3110_v30 }
 0x67f   : > { %4731 = vmatprep.subr.bf16.mxu1 %v5642_v18  ;;  %4749 = vmatprep.subr.bf16.mxu0 %v5642_v18 }
 0x681   : > { %4728 = vmatmul.mubr.msk.bf16.vlgmr.msra.gmra.mrb[4].mxu1 %vm3010_vm4, %v1434_v33  ;;  %4740 = vmatmul.mubr.msk.bf16.vlgmr.msra.gmra.mrb[0].mxu0 %vm3010_vm4, %v1436_v34 }
 0x682   : > { %4732 = vmatpush3.bf16.msra.mxu1 %v3063_v35  ;;  %4733 = vmatprep.mubr.msk.bf16.mxu1 %vm5643_vm2, %v5642_v18 }
 0x683   : > { %4743 = vmatprep.subr.bf16.mxu1 %v5642_v18  ;;  %4751 = vmatprep.mubr.msk.bf16.mxu0 %vm5643_vm2, %v5642_v18 }
 0x689   : > { %4734 = vmatmul.mubr.msk.bf16.vlgmr.msra.gmra.mrb[8].mxu1 %vm3010_vm4, %v1435_v41 }
 0x68a   : > { %4744 = vmatpush3.bf16.msra.mxu1 %v3157_v42  ;;  %4745 = vmatprep.mubr.msk.bf16.mxu1 %vm5643_vm2, %v5642_v18 }
 0x68b   : > { %4755 = vmatprep.subr.bf16.mxu1 %v5642_v18 }
 0x691   : > { %4746 = vmatmul.mubr.msk.bf16.vlgmr.msra.gmra.mrb[12].mxu1 %vm3010_vm4, %v1437_v52 }
 0x692   : > { %4757 = vmatprep.mubr.msk.bf16.mxu1 %vm5643_vm2, %v5642_v18 }
 0x754   : > { %v3052_v57 = vpop.f32.mrb[4].mxu1  ;;  %v3146_v59 = vpop.f32.mrb[0].mxu0 }
 0x755   : > { %v3200_v1 = vmul.f32 0.35355338, %v3052_v57  ;;  %v4729_v53 = vpop.f32.mrb[5].mxu1  ;;  %v4741_v54 = vpop.f32.mrb[1].mxu0  ;;  %v3204_v3 = vmul.f32 0.35355338, %v3146_v59 }
 0x756   : > { %v3055_v5 = vpop.f32.mrb[6].mxu1  ;;  %v3149_v6 = vpop.f32.mrb[2].mxu0 }
 0x757   : > { %v3201_v7 = vmul.f32 0.35355338, %v3055_v5  ;;  %v3205_v8 = vmul.f32 0.35355338, %v3149_v6  ;;  %v4730_v9 = vpop.f32.mrb[7].mxu1  ;;  %v4742_v11 = vpop.f32.mrb[3].mxu0 }
 0x758   : > { %v3215_v12 = vsel %vm6650_vm6, -1e+30, %v3200_v1  ;;  %v3219_v15 = vsel %vm6650_vm6, -1e+30, %v3204_v3 }
 0x759   : > { %v3224_v13 = vsel %vm3223_vm7, %v3215_v12, -inf  ;;  %v3216_v14 = vsel %vm6650_vm6, -1e+30, %v3201_v7  ;;  %v3220_v4 = vsel %vm6650_vm6, -1e+30, %v3205_v8  ;;  %v3236_v22 = vsel %vm3223_vm7, %v3219_v15, -inf }
 0x75a   : > { %3225 = vmax.xlane.f32.xlu1 %v3224_v13  ;;  %v3227_v60 = vsel %vm3223_vm7, %v3216_v14, -inf  ;;  %v3239_v19 = vsel %vm3223_vm7, %v3220_v4, -inf }
 0x75b   : > { %3228 = vmax.xlane.f32.xlu0 %v3227_v60 }
 0x75c   : > { %v3099_v16 = vpop.f32.mrb[8].mxu1 }
 0x75d   : > { %v3202_v17 = vmul.f32 0.35355338, %v3099_v16  ;;  %v4735_v20 = vpop.f32.mrb[9].mxu1 }
 0x75e   : > { %3240 = vmax.xlane.f32.xlu1 %v3239_v19  ;;  %v3102_v21 = vpop.f32.mrb[10].mxu1 }
 0x75f   : > { %v3203_v23 = vmul.f32 0.35355338, %v3102_v21  ;;  %3237 = vmax.xlane.f32.xlu0 %v3236_v22  ;;  %v4736_v24 = vpop.f32.mrb[11].mxu1  ;;  %v3217_v25 = vsel %vm6650_vm6, -1e+30, %v3202_v17 }
 0x760   : > { %v3230_v26 = vsel %vm3223_vm7, %v3217_v25, -inf }
 0x761   : > { %v3218_v27 = vsel %vm6650_vm6, -1e+30, %v3203_v23 }
 0x762   : > { %3231 = vmax.xlane.f32.xlu1 %v3230_v26  ;;  %v3233_v30 = vsel %vm3223_vm7, %v3218_v27, -inf }
 0x764   : > { %v3193_v28 = vpop.f32.mrb[12].mxu1 }
 0x765   : > { %v3206_v29 = vmul.f32 0.35355338, %v3193_v28  ;;  %v4747_v31 = vpop.f32.mrb[13].mxu1 }
 0x766   : > { %3234 = vmax.xlane.f32.xlu1 %v3233_v30  ;;  %v3196_v32 = vpop.f32.mrb[14].mxu1 }
 0x767   : > { %v3207_v33 = vmul.f32 0.35355338, %v3196_v32  ;;  %v4748_v34 = vpop.f32.mrb[15].mxu1  ;;  %v3221_v35 = vsel %vm6650_vm6, -1e+30, %v3206_v29 }
 0x768   : > { %v3242_v36 = vsel %vm3223_vm7, %v3221_v35, -inf }
 0x769   : > { %3243 = vmax.xlane.f32.xlu0 %v3242_v36  ;;  %v3222_v37 = vsel %vm6650_vm6, -1e+30, %v3207_v33 }
 0x76a   : > { %v3245_v38 = vsel %vm3223_vm7, %v3222_v37, -inf }
 0x777   : > { %2712 = vrot.lane.b32.xlu1 %v6457_v43, %s5651_s9 }
 0x77b   : > { %2714 = vrot.lane.b32.xlu1 %v6467_v45, %s5651_s9 }
 0x77f   : > { %2716 = vrot.lane.b32.xlu1 %v6477_v48, %s5651_s9  ;;  %2710 = vrot.lane.b32.xlu0 %v6453_v39, %s5651_s9 }
 0x783   : > { %2718 = vrot.lane.b32.xlu0 %v6465_v44, %s5651_s9 }
 0x787   : > { %2722 = vrot.lane.b32.xlu0 %v6471_v46, %s5651_s9 }
 0x7a3   : > { %3246 = vmax.xlane.f32.xlu1 %v3245_v38 }
 0x7b4   : > { %2720 = vrot.lane.b32.xlu1 %v6473_v47, %s5651_s9 }
 0x7e7   : > { %v3226_v43 = vpop.xlane.xlu1 %3225 }
 0x7e8   : > { %v3229_v45 = vpop.xlane.xlu0 %3228  ;;  %v3248_v40 = vsub.f32 %v3215_v12, %v3226_v43 }
 0x7e9   : > { %v3249_v41 = vsub.f32 %v3216_v14, %v3229_v45 }
 0x7eb   : > { %v3256_v48 = vpack.c.bf16 %v3249_v41, %v3248_v40  ;;  %v3241_v42 = vpop.xlane.xlu1 %3240 }
 0x7ec   : > { %v3238_v50 = vpop.xlane.xlu0 %3237  ;;  %v3253_v44 = vsub.f32 %v3220_v4, %v3241_v42 }
 0x7ed   : > { %v3261_v39 = vmul.bf16 1069105081, %v3256_v48  ;;  %v3252_v51 = vsub.f32 %v3219_v15, %v3238_v50 }
 0x7ef   : > { %5004 = vpow.bf16 %v3261_v39  ;;  %v3232_v52 = vpop.xlane.xlu1 %3231  ;;  %v3258_v63 = vpack.c.bf16 %v3253_v44, %v3252_v51 }
 0x7f0   : > { %v3250_v55 = vsub.f32 %v3217_v25, %v3232_v52 }
 0x7f1   : > { %v3267_v57 = vmul.bf16 1069105081, %v3258_v63 }
 0x7f3   : > { %v3235_v46 = vpop.xlane.xlu1 %3234  ;;  %5006 = vpow.bf16 %v3267_v57 }
 0x7f4   : > { %v3251_v56 = vsub.f32 %v3218_v27, %v3235_v46 }
 0x7f6   : > { %v3257_v59 = vpack.c.bf16 %v3251_v56, %v3250_v55  ;;  %v3244_v15 = vpop.xlane.xlu0 %3243 }
 0x7f7   : > { %v2713_v14 = vpop.permute.xlu1 %2712  ;;  %v3254_v17 = vsub.f32 %v3221_v35, %v3244_v15 }
 0x7f8   : > { %v3264_v1 = vmul.bf16 1069105081, %v3257_v59 }
 0x7fa   : > { %v6692_v47 = vpop.eup %5004  ;;  %5008 = vpow.bf16 %v3264_v1  ;;  %v2711_v28 = vpop.permute.xlu0 %2710 }
 0x7fb   : > { %v3272_v53 = vunpack.c.l.bf16 %v6692_v47  ;;  %v3273_v54 = vunpack.c.h.bf16 %v6692_v47  ;;  %v2715_v60 = vpop.permute.xlu1 %2714 }
 0x7fd   : > { %v3280_v2 = vsel %vm3223_vm7, %v3272_v53, 0.0  ;;  %v3283_v3 = vsel %vm3223_vm7, %v3273_v54, 0.0 }
 0x7fe   : > { %3281 = vadd.xlane.f32.xlu0 %v3280_v2  ;;  %3284 = vadd.xlane.f32.xlu1 %v3283_v3  ;;  %v6698_v5 = vpop.eup %5006  ;;  %v2719_v29 = vpop.permute.xlu0 %2718 }
 0x7ff   : > { %v3276_v12 = vunpack.c.l.bf16 %v6698_v5  ;;  %v2717_v4 = vpop.permute.xlu1 %2716  ;;  %v3277_v22 = vunpack.c.h.bf16 %v6698_v5  ;;  %v2734_v32 = vcombine.low %v2711_v28, %v2719_v29  ;;  %v2735_v34 = vcombine.high %v2711_v28, %v2719_v29 }
 0x801   : > { %v3292_v13 = vsel %vm3223_vm7, %v3276_v12, 0.0  ;;  %v3295_v23 = vsel %vm3223_vm7, %v3277_v22, 0.0  ;;  %v2742_v36 = vrot.slane %v2734_v32, %v6486_v0  ;;  %v2749_v43 = vrot.slane %v2735_v34, %v6486_v0 }
 0x802   : > { %v2723_v30 = vpop.permute.xlu0 %2722 }
 0x803   : > { %v2750_v31 = vcombine.low %v2715_v60, %v2723_v30  ;;  %v2751_v33 = vcombine.high %v2715_v60, %v2723_v30 }
 0x805   : > { %v6700_v6 = vpop.eup %5008  ;;  %v2758_v35 = vrot.slane %v2750_v31, %v6486_v0 }
 0x806   : > { %v3274_v7 = vunpack.c.l.bf16 %v6700_v6  ;;  %v3275_v8 = vunpack.c.h.bf16 %v6700_v6 }
 0x807   : > { %v2766_v45 = vcombine.low %v2742_v36, %v2758_v35  ;;  %v2767_v40 = vcombine.high %v2742_v36, %v2758_v35 }
 0x808   : > { %v3286_v9 = vsel %vm3223_vm7, %v3274_v7, 0.0  ;;  %v3289_v11 = vsel %vm3223_vm7, %v3275_v8, 0.0 }
 0x809   : > { %3287 = vadd.xlane.f32.xlu0 %v3286_v9  ;;  %3290 = vadd.xlane.f32.xlu1 %v3289_v11  ;;  %v2774_v50 = vrot.slane %v2766_v45, %v6493_v10  ;;  %v2781_v39 = vrot.slane %v2767_v40, %v6493_v10 }
 0x80b   : > { %v2870_v46 = vcombine.low %v2774_v50, %v2781_v39  ;;  %v4633_v57 = vcombine.high %v2774_v50, %v2781_v39 }
 0x80d   : > { %3293 = vadd.xlane.f32.xlu0 %v3292_v13  ;;  %v2877_v7 = vrot.slane %v2870_v46, %v6486_v0  ;;  %v2885_v13 = vrot.slane %v4633_v57, %v6486_v0 }
 0x81a   : > { %2724 = vrot.lane.b32.xlu1 %v6480_v49, %s5651_s9 }
 0x830   : > { %v3247_v16 = vpop.xlane.xlu1 %3246 }
 0x831   : > { %v3255_v19 = vsub.f32 %v3222_v37, %v3247_v16  ;;  %v2765_v37 = vrot.slane %v2751_v33, %v6486_v0 }
 0x833   : > { %v3259_v20 = vpack.c.bf16 %v3255_v19, %v3254_v17  ;;  %v2782_v41 = vcombine.low %v2749_v43, %v2765_v37  ;;  %v2783_v48 = vcombine.high %v2749_v43, %v2765_v37 }
 0x834   : > { %v2721_v38 = vpop.permute.xlu1 %2720 }
 0x835   : > { %v3270_v21 = vmul.bf16 1069105081, %v3259_v20  ;;  %v2790_v51 = vrot.slane %v2782_v41, %v6493_v10  ;;  %v2797_v44 = vrot.slane %v2783_v48, %v6493_v10  ;;  %v2802_v55 = vcombine.low %v2713_v14, %v2721_v38 }
 0x836   : > { %v2803_v56 = vcombine.high %v2713_v14, %v2721_v38 }
 0x837   : > { %5010 = vpow.bf16 %v3270_v21  ;;  %v2886_v59 = vcombine.low %v2790_v51, %v2797_v44  ;;  %v4634_v1 = vcombine.high %v2790_v51, %v2797_v44  ;;  %v2810_v8 = vrot.slane %v2802_v55, %v6486_v0 }
 0x838   : > { %v2817_v9 = vrot.slane %v2803_v56, %v6486_v0 }
 0x839   : > { %v2893_v14 = vrot.slane %v2886_v59, %v6486_v0  ;;  %v2901_v60 = vrot.slane %v4634_v1, %v6486_v0 }
 0x83e   : > { %3296 = vadd.xlane.f32.xlu1 %v3295_v23  ;;  %v2902_v23 = vcombine.low %v2877_v7, %v2885_v13 }
 0x840   : > { %v2910_v37 = vrot.slane %v2902_v23, %v6493_v10 }
 0x842   : > { %v6712_v24 = vpop.eup %5010 }
 0x843   : > { %v3278_v25 = vunpack.c.l.bf16 %v6712_v24  ;;  %v3279_v26 = vunpack.c.h.bf16 %v6712_v24 }
 0x845   : > { %v3298_v49 = vsel %vm3223_vm7, %v3278_v25, 0.0  ;;  %v3301_v27 = vsel %vm3223_vm7, %v3279_v26, 0.0  ;;  %v2918_v25 = vcombine.low %v2893_v14, %v2901_v60  ;;  %v2919_v26 = vcombine.high %v2893_v14, %v2901_v60 }
 0x846   : > { %3299 = vadd.xlane.f32.xlu0 %v3298_v49  ;;  %v2903_v49 = vcombine.high %v2877_v7, %v2885_v13 }
 0x847   : > { %v2926_v38 = vrot.slane %v2918_v25, %v6493_v10  ;;  %v2933_v45 = vrot.slane %v2919_v26, %v6493_v10 }
 0x848   : > { %v2917_v43 = vrot.slane %v2903_v49, %v6493_v10 }
 0x849   : > { %v2934_v46 = vcombine.low %v2910_v37, %v2926_v38  ;;  %v2935_v55 = vcombine.high %v2910_v37, %v2926_v38 }
 0x84a   : > { %3302 = vadd.xlane.f32.xlu0 %v3301_v27  ;;  %v2936_v56 = vcombine.low %v2917_v43, %v2933_v45  ;;  %v2937_v57 = vcombine.high %v2917_v43, %v2933_v45 }
 0x88b   : > { %v3285_v42 = vpop.xlane.xlu1 %3284  ;;  %v3282_v52 = vpop.xlane.xlu0 %3281 }
 0x88c   : > { %5012 = vrcp.f32 %v3282_v52 }
 0x88d   : > { %5014 = vrcp.f32 %v3285_v42 }
 0x896   : > { %v3291_v63 = vpop.xlane.xlu1 %3290  ;;  %v3288_v53 = vpop.xlane.xlu0 %3287 }
 0x897   : > { %5016 = vrcp.f32 %v3288_v53  ;;  %v5013_v31 = vpop.eup %5012 }
 0x898   : > { %5018 = vrcp.f32 %v3291_v63  ;;  %v5015_v36 = vpop.eup %5014 }
 0x89a   : > { %v2725_v54 = vpop.permute.xlu1 %2724 }
 0x89b   : > { %v2818_v2 = vcombine.low %v2717_v4, %v2725_v54  ;;  %v2819_v3 = vcombine.high %v2717_v4, %v2725_v54 }
 0x89d   : > { %v2826_v11 = vrot.slane %v2818_v2, %v6486_v0  ;;  %v2833_v12 = vrot.slane %v2819_v3, %v6486_v0  ;;  %v3312_v2 = vpack.c.bf16 %v5015_v36, %v5013_v31 }
 0x89f   : > { %v2834_v4 = vcombine.low %v2810_v8, %v2826_v11  ;;  %v2835_v15 = vcombine.high %v2810_v8, %v2826_v11  ;;  %v2850_v16 = vcombine.low %v2817_v9, %v2833_v12  ;;  %v2851_v17 = vcombine.high %v2817_v9, %v2833_v12 }
 0x8a0   : > { %v3316_v12 = vmul.bf16 %v6692_v47, %v3312_v2  ;;  %v3294_v47 = vpop.xlane.xlu0 %3293 }
 0x8a1   : > { %v2842_v19 = vrot.slane %v2834_v4, %v6493_v10  ;;  %v2849_v20 = vrot.slane %v2835_v15, %v6493_v10  ;;  %v2858_v21 = vrot.slane %v2850_v16, %v6493_v10  ;;  %v2865_v22 = vrot.slane %v2851_v17, %v6493_v10  ;;  %v5017_v40 = vpop.eup %5016 }
 0x8a2   : > { %v5019_v39 = vpop.eup %5018  ;;  %5020 = vrcp.f32 %v3294_v47 }
 0x8a3   : > { %v2938_v27 = vcombine.low %v2842_v19, %v2849_v20  ;;  %v4635_v28 = vcombine.high %v2842_v19, %v2849_v20  ;;  %v2954_v29 = vcombine.low %v2858_v21, %v2865_v22  ;;  %v4636_v30 = vcombine.high %v2858_v21, %v2865_v22 }
 0x8a4   : > { %v3313_v3 = vpack.c.bf16 %v5019_v39, %v5017_v40 }
 0x8a5   : > { %v2945_v32 = vrot.slane %v2938_v27, %v6486_v0  ;;  %v2953_v33 = vrot.slane %v4635_v28, %v6486_v0  ;;  %v2961_v34 = vrot.slane %v2954_v29, %v6486_v0  ;;  %v2969_v35 = vrot.slane %v4636_v30, %v6486_v0 }
 0x8a6   : > { %v3317_v13 = vmul.bf16 %v6700_v6, %v3313_v3 }
 0x8a7   : > { %v2970_v41 = vcombine.low %v2945_v32, %v2953_v33  ;;  %v2986_v48 = vcombine.low %v2961_v34, %v2969_v35  ;;  %v2971_v42 = vcombine.high %v2945_v32, %v2953_v33  ;;  %v2987_v50 = vcombine.high %v2961_v34, %v2969_v35 }
 0x8a9   : > { %v2978_v51 = vrot.slane %v2970_v41, %v6493_v10  ;;  %v2994_v44 = vrot.slane %v2986_v48, %v6493_v10  ;;  %v2985_v52 = vrot.slane %v2971_v42, %v6493_v10  ;;  %v3001_v63 = vrot.slane %v2987_v50, %v6493_v10 }
 0x8ab   : > { %v3002_v59 = vcombine.low %v2978_v51, %v2994_v44  ;;  %v3003_v1 = vcombine.high %v2978_v51, %v2994_v44  ;;  %v3004_v53 = vcombine.low %v2985_v52, %v3001_v63  ;;  %v3005_v54 = vcombine.high %v2985_v52, %v3001_v63 }
 0x8ac   : > { %v5021_v60 = vpop.eup %5020 }
 0x8ad   : > { %v3006_v7 = vpack.c.bf16 %v3002_v59, %v2934_v46  ;;  %v3007_v8 = vpack.c.bf16 %v3003_v1, %v2935_v55  ;;  %v3008_v9 = vpack.c.bf16 %v3004_v53, %v2936_v56  ;;  %v3009_v11 = vpack.c.bf16 %v3005_v54, %v2937_v57 }
 0x8af   : > { %4750 = vmatpush3.bf16.msra.mxu0 %v3006_v7  ;;  %4756 = vmatpush3.bf16.msra.mxu1 %v3007_v8 }
 0x8b0   : > { %4761 = vmatprep.subr.bf16.mxu0 %v5642_v18  ;;  %4767 = vmatprep.subr.bf16.mxu1 %v5642_v18 }
 0x8b2   : > { %4752 = vmatmul.mubr.msk.bf16.vlgmr.msra.gmra.mrb[4].mxu0 %vm3223_vm7, %v3316_v12  ;;  %4758 = vmatmul.mubr.msk.bf16.vlgmr.msra.gmra.mrb[16].mxu1 %vm3223_vm7, %v3317_v13 }
 0x8b3   : > { %4762 = vmatpush3.bf16.msra.mxu0 %v3008_v9  ;;  %4768 = vmatpush3.bf16.msra.mxu1 %v3009_v11 }
 0x8b4   : > { %4763 = vmatprep.mubr.msk.bf16.mxu0 %vm5643_vm2, %v5642_v18  ;;  %4769 = vmatprep.mubr.msk.bf16.mxu1 %vm5643_vm2, %v5642_v18 }
 0x8b5   : > { %4773 = vmatprep.subr.bf16.mxu0 %v5642_v18  ;;  %4781 = vmatprep.subr.bf16.mxu1 %v5642_v18 }
 0x8cb   : > { %v3297_v6 = vpop.xlane.xlu1 %3296 }
 0x8cc   : > { %5022 = vrcp.f32 %v3297_v6 }
 0x8d3   : > { %v3300_v14 = vpop.xlane.xlu0 %3299 }
 0x8d4   : > { %5024 = vrcp.f32 %v3300_v14 }
 0x8d6   : > { %v5023_v4 = vpop.eup %5022 }
 0x8d7   : > { %v3303_v15 = vpop.xlane.xlu0 %3302  ;;  %v3314_v16 = vpack.c.bf16 %v5023_v4, %v5021_v60 }
 0x8d8   : > { %5026 = vrcp.f32 %v3303_v15 }
 0x8d9   : > { %v3318_v17 = vmul.bf16 %v6698_v5, %v3314_v16 }
 0x8db   : > { %4764 = vmatmul.mubr.msk.bf16.vlgmr.msra.gmra.mrb[8].mxu0 %vm3223_vm7, %v3318_v17 }
 0x8dc   : > { %4777 = vmatprep.mubr.msk.bf16.mxu0 %vm5643_vm2, %v5642_v18 }
 0x8de   : > { %v5025_v19 = vpop.eup %5024 }
 0x8e2   : > { %v5027_v20 = vpop.eup %5026 }
 0x8e3   : > { %v3315_v21 = vpack.c.bf16 %v5027_v20, %v5025_v19 }
 0x8e5   : > { %v3319_v22 = vmul.bf16 %v6712_v24, %v3315_v21 }
 0x8e7   : > { %4770 = vmatmul.mubr.msk.bf16.vlgmr.msra.gmra.mrb[20].mxu1 %vm3223_vm7, %v3319_v22 }
 0x8e8   : > { %4785 = vmatprep.mubr.msk.bf16.mxu1 %vm5643_vm2, %v5642_v18 }
 0x985   : > { %v3357_v23 = vpop.f32.mrb[4].mxu0  ;;  %v3401_v25 = vpop.f32.mrb[16].mxu1 }
 0x986   : > { %v4753_v49 = vpop.f32.mrb[5].mxu0  ;;  %v4759_v26 = vpop.f32.mrb[17].mxu1 }
 0x987   : > { %v3360_v5 = vpop.f32.mrb[6].mxu0  ;;  %v3404_v27 = vpop.f32.mrb[18].mxu1  ;;  %v4988_v49 = vld [vmem:[%s847_s12] sm:$0xff]  }
 0x988   : > { %v4754_v28 = vpop.f32.mrb[7].mxu0  ;;  %v4760_v29 = vpop.f32.mrb[19].mxu1  ;;  %4774 = vmatpush3.bf16.msra.mxu0 %v4988_v49 }
 0x989   : > { %4775 = vmatprep.subr.bf16.mxu0 %v5642_v18 }
 0x9ae   : > { %v3445_v30 = vpop.f32.mrb[8].mxu0 }
 0x9af   : > { %v3496_v31 = vcombine.low %v3357_v23, %v3445_v30  ;;  %v3497_v32 = vcombine.high %v3357_v23, %v3445_v30  ;;  %v4765_v33 = vpop.f32.mrb[9].mxu0 }
 0x9b0   : > { %v3448_v34 = vpop.f32.mrb[10].mxu0 }
 0x9b1   : > { %v3564_v35 = vcombine.low %v3360_v5, %v3448_v34  ;;  %v3565_v24 = vcombine.high %v3360_v5, %v3448_v34  ;;  %v4766_v36 = vpop.f32.mrb[11].mxu0  ;;  %v3504_v40 = vrot.slane %v3496_v31, %v6486_v0  ;;  %v3511_v41 = vrot.slane %v3497_v32, %v6486_v0 }
 0x9b3   : > { %v3572_v56 = vrot.slane %v3564_v35, %v6486_v0  ;;  %v3579_v57 = vrot.slane %v3565_v24, %v6486_v0 }
 0x9ba   : > { %v3489_v37 = vpop.f32.mrb[20].mxu1 }
 0x9bb   : > { %v3512_v38 = vcombine.low %v3401_v25, %v3489_v37  ;;  %v3513_v43 = vcombine.high %v3401_v25, %v3489_v37  ;;  %v4771_v45 = vpop.f32.mrb[21].mxu1 }
 0x9bc   : > { %v3492_v48 = vpop.f32.mrb[22].mxu1  ;;  %v4989_v45 = vld [vmem:[%s847_s12 + $0x8] sm:$0xff]  }
 0x9bd   : > { %v3520_v42 = vrot.slane %v3512_v38, %v6486_v0  ;;  %v3527_v50 = vrot.slane %v3513_v43, %v6486_v0  ;;  %v3580_v39 = vcombine.low %v3404_v27, %v3492_v48  ;;  %v3581_v51 = vcombine.high %v3404_v27, %v3492_v48  ;;  %v4772_v44 = vpop.f32.mrb[23].mxu1  ;;  %4776 = vmatpush3.bf16.msra.mxu0 %v4989_v45 }
 0x9be   : > { %4789 = vmatprep.subr.bf16.mxu0 %v5642_v18 }
 0x9bf   : > { %v3528_v52 = vcombine.low %v3504_v40, %v3520_v42  ;;  %v3529_v63 = vcombine.high %v3504_v40, %v3520_v42  ;;  %v3544_v46 = vcombine.low %v3511_v41, %v3527_v50  ;;  %v3545_v55 = vcombine.high %v3511_v41, %v3527_v50 }
 0x9c0   : > { %v3588_v59 = vrot.slane %v3580_v39, %v6486_v0  ;;  %v3595_v1 = vrot.slane %v3581_v51, %v6486_v0 }
 0x9c1   : > { %v3536_v53 = vrot.slane %v3528_v52, %v6493_v10  ;;  %v3543_v54 = vrot.slane %v3529_v63, %v6493_v10  ;;  %v3552_v2 = vrot.slane %v3544_v46, %v6493_v10  ;;  %v3559_v3 = vrot.slane %v3545_v55, %v6493_v10 }
 0x9c2   : > { %v3596_v7 = vcombine.low %v3572_v56, %v3588_v59  ;;  %v3597_v8 = vcombine.high %v3572_v56, %v3588_v59  ;;  %v3612_v9 = vcombine.low %v3579_v57, %v3595_v1  ;;  %v3613_v11 = vcombine.high %v3579_v57, %v3595_v1 }
 0x9c3   : > { %v3632_v12 = vcombine.low %v3536_v53, %v3543_v54  ;;  %v4645_v13 = vcombine.high %v3536_v53, %v3543_v54  ;;  %v3648_v47 = vcombine.low %v3552_v2, %v3559_v3  ;;  %v4646_v6 = vcombine.high %v3552_v2, %v3559_v3 }
 0x9c4   : > { %v3604_v14 = vrot.slane %v3596_v7, %v6493_v10  ;;  %v3611_v60 = vrot.slane %v3597_v8, %v6493_v10  ;;  %v3620_v4 = vrot.slane %v3612_v9, %v6493_v10  ;;  %v3627_v15 = vrot.slane %v3613_v11, %v6493_v10 }
 0x9c5   : > { %v3639_v16 = vrot.slane %v3632_v12, %v6486_v0  ;;  %v3647_v17 = vrot.slane %v4645_v13, %v6486_v0  ;;  %v3655_v19 = vrot.slane %v3648_v47, %v6486_v0  ;;  %v3663_v20 = vrot.slane %v4646_v6, %v6486_v0 }
 0x9c6   : > { %v3700_v21 = vcombine.low %v3604_v14, %v3611_v60  ;;  %v4647_v22 = vcombine.high %v3604_v14, %v3611_v60  ;;  %v3716_v23 = vcombine.low %v3620_v4, %v3627_v15  ;;  %v4648_v25 = vcombine.high %v3620_v4, %v3627_v15  ;;  %v4649_v60 = vld [vmem:[%s855_s6] ss:$0 sm:$0xff] }
 0x9c7   : > { %v3665_v26 = vcombine.high %v3639_v16, %v3647_v17  ;;  %v3681_v5 = vcombine.high %v3655_v19, %v3663_v20  ;;  %v3664_v27 = vcombine.low %v3639_v16, %v3647_v17  ;;  %v3680_v28 = vcombine.low %v3655_v19, %v3663_v20  ;;  %v5036_v19 = vld [vmem:[#allocation2] sm:$0xff] }
 0x9c8   : > { %v3707_v29 = vrot.slane %v3700_v21, %v6486_v0  ;;  %v3715_v30 = vrot.slane %v4647_v22, %v6486_v0  ;;  %v3723_v31 = vrot.slane %v3716_v23, %v6486_v0  ;;  %v3731_v32 = vrot.slane %v4648_v25, %v6486_v0  ;;  %v5037_v23 = vld [vmem:[#allocation2 + $0x8] sm:$0xff] }
 0x9c9   : > { %v3679_v33 = vrot.slane %v3665_v26, %v6493_v10  ;;  %v3695_v34 = vrot.slane %v3681_v5, %v6493_v10  ;;  %v3672_v35 = vrot.slane %v3664_v27, %v6493_v10  ;;  %v3688_v24 = vrot.slane %v3680_v28, %v6493_v10 }
 0x9ca   : > { %v3733_v36 = vcombine.high %v3707_v29, %v3715_v30  ;;  %v3749_v37 = vcombine.high %v3723_v31, %v3731_v32  ;;  %v3732_v38 = vcombine.low %v3707_v29, %v3715_v30  ;;  %v3748_v43 = vcombine.low %v3723_v31, %v3731_v32 }
 0x9cb   : > { %v3698_v40 = vcombine.low %v3679_v33, %v3695_v34  ;;  %v3696_v41 = vcombine.low %v3672_v35, %v3688_v24  ;;  %v3697_v0 = vcombine.high %v3672_v35, %v3688_v24  ;;  %v3699_v48 = vcombine.high %v3679_v33, %v3695_v34  ;;  %v4990_v24 = vld [vmem:[%s880_s20] sm:$0xff]  }
 0x9cc   : > { %v3747_v42 = vrot.slane %v3733_v36, %v6493_v10  ;;  %v3763_v50 = vrot.slane %v3749_v37, %v6493_v10  ;;  %v3740_v39 = vrot.slane %v3732_v38, %v6493_v10  ;;  %v3756_v51 = vrot.slane %v3748_v43, %v6493_v10  ;;  %4782 = vmatpush3.bf16.msra.mxu1 %v4990_v24  ;;  %v4991_v36 = vld [vmem:[%s880_s20 + $0x8] sm:$0xff]  }
 0x9cd   : > { %4783 = vmatprep.subr.bf16.mxu1 %v5642_v18 }
 0x9ce   : > { %v3766_v44 = vcombine.low %v3747_v42, %v3763_v50  ;;  %v3765_v52 = vcombine.high %v3740_v39, %v3756_v51  ;;  %v3764_v63 = vcombine.low %v3740_v39, %v3756_v51  ;;  %v3767_v46 = vcombine.high %v3747_v42, %v3763_v50  ;;  %v4653_v42 = vld [vmem:[%s863_s21] ss:$0 sm:$0xff] }
 0x9d0   : > { %v4976_v55 = vpack.i.bf16 %v3766_v44, %v3698_v40  ;;  %v4971_v56 = vpack.i.bf16 %v3765_v52, %v3697_v0  ;;  %v4981_v57 = vpack.i.bf16 %v3767_v46, %v3699_v48  ;;  %4784 = vmatpush3.bf16.msra.mxu1 %v4991_v36  ;;  %v4654_v44 = vld [vmem:[%s871_s27] ss:$0 sm:$0xff] }
 0x9d2   : > { %4977 = vrot.lane.b32.xlu1 %v4976_v55, %s5652_s23  ;;  %4972 = vrot.lane.b32.xlu0 %v4971_v56, %s5653_s7  ;;  %v4992_v56 = vld [vmem:[%s6412_s16] sm:$0xff]  }
 0x9d6   : > { %4982 = vrot.lane.b32.xlu1 %v4981_v57, %s5654_s22  ;;  %v4993_v57 = vld [vmem:[%s6412_s16 + $0x8] sm:$0xff]  }
 0xa44   : > { %v4978_v59 = vpop.permute.xlu1 %4977  ;;  %v4973_v1 = vpop.permute.xlu0 %4972 }
 0xa45   : > { %v4975_v53 = vunpack.i.h.bf16 %v4973_v1  ;;  %v4974_v10 = vunpack.i.l.bf16 %v4973_v1  ;;  %v4980_v54 = vunpack.i.h.bf16 %v4978_v59  ;;  %v4979_v2 = vunpack.i.l.bf16 %v4978_v59  ;;  %v4994_v59 = vld [vmem:[%s6412_s16 + $0x10] sm:$0xff]   ;;  %v4995_v1 = vld [vmem:[%s6412_s16 + $0x18] sm:$0xff]  }
 0xa47   : > { %v3792_v3 = vsel %vm3010_vm4, %v3696_v41, %v4974_v10  ;;  %v3793_v7 = vsel %vm3010_vm4, %v3764_v63, %v4975_v53  ;;  %v4996_v53 = vld [vmem:[%s6412_s16 + $0x20] sm:$0xff]   ;;  %v4997_v10 = vld [vmem:[%s6412_s16 + $0x28] sm:$0xff]  }
 0xa48   : > { %v4983_v8 = vpop.permute.xlu1 %4982  ;;  %v3794_v12 = vsel %vm3223_vm7, %v3792_v3, %v4979_v2  ;;  %v3795_v13 = vsel %vm3223_vm7, %v3793_v7, %v4980_v54  ;;  %v4998_v54 = vld [vmem:[%s6412_s16 + $0x30] sm:$0xff]   ;;  %v4999_v2 = vld [vmem:[%s6412_s16 + $0x38] sm:$0xff]  }
 0xa49   : > { %v4985_v9 = vunpack.i.h.bf16 %v4983_v8  ;;  %v4984_v11 = vunpack.i.l.bf16 %v4983_v8  ;;  %v4655_v3 = vld [vmem:[%s888_s11] ss:$0 sm:$0xff] }
 0xa4b   : > { %v3797_v47 = vsel %vm3796_vm8, %v3794_v12, %v4984_v11  ;;  %v3798_v6 = vsel %vm3796_vm8, %v3795_v13, %v4985_v9 }
 0xa4c   : > { %v3799_v14 = vpack.c.bf16 %v3798_v6, %v3797_v47 }
 0xa4e   : > { %4778 = vmatmul.mubr.msk.bf16.vlgmr.msra.gmra.mrb[12].mxu0 %vm1028_vm1, %v3799_v14 }
 0xa4f   : > { %4805 = vmatprep.mubr.msk.bf16.mxu0 %vm5643_vm2, %v5642_v18  ;;  %4790 = vmatpush3.bf16.msra.mxu0 %v4992_v56 }
 0xa50   : > { %4791 = vmatprep.subr.bf16.mxu0 %v5642_v18 }
 0xa53   : > { %4792 = vmatpush3.bf16.msra.mxu0 %v4993_v57 }
 0xa54   : > { %4793 = vmatprep.subr.bf16.mxu0 %v5642_v18 }
 0xa57   : > { %4794 = vmatpush3.bf16.msra.mxu0 %v4994_v59 }
 0xa58   : > { %4795 = vmatprep.subr.bf16.mxu0 %v5642_v18 }
 0xa5b   : > { %4796 = vmatpush3.bf16.msra.mxu0 %v4995_v1 }
 0xa5c   : > { %4797 = vmatprep.subr.bf16.mxu0 %v5642_v18 }
 0xa5f   : > { %4798 = vmatpush3.bf16.msra.mxu0 %v4996_v53 }
 0xa60   : > { %4799 = vmatprep.subr.bf16.mxu0 %v5642_v18 }
 0xa63   : > { %4800 = vmatpush3.bf16.msra.mxu0 %v4997_v10 }
 0xa64   : > { %4801 = vmatprep.subr.bf16.mxu0 %v5642_v18 }
 0xa67   : > { %4802 = vmatpush3.bf16.msra.mxu0 %v4998_v54 }
 0xa68   : > { %4803 = vmatprep.subr.bf16.mxu0 %v5642_v18 }
 0xa6b   : > { %4804 = vmatpush3.bf16.msra.mxu0 %v4999_v2 }
 0xb21   : > { %v3860_v4 = vpop.f32.mrb[12].mxu0 }
 0xb22   : > { %v3861_v15 = vadd.f32 %v4649_v60, %v3860_v4  ;;  %v4779_v16 = vpop.f32.mrb[13].mxu0 }
 0xb23   : > { %v3863_v17 = vpop.f32.mrb[14].mxu0 }
 0xb24   : > { %v6817_v20 = vadd.f32 %v5036_v19, %v3861_v15  ;;  %v3864_v21 = vadd.f32 %v4649_v60, %v3863_v17  ;;  %v4780_v22 = vpop.f32.mrb[15].mxu0  ;;  %v4660_v17 = vld [vmem:[%s905_s15] ss:$0 sm:$0xff] }
 0xb26   : > { %v6819_v25 = vadd.f32 %v5037_v23, %v3864_v21  ;;  %v3869_v49 = vsel %vm1028_vm1, %v6817_v20, 0.0 }
 0xb27   : > { %3870 = vadd.xlane.f32.xlu1 %v3869_v49 }
 0xb28   : > { %v3872_v26 = vsel %vm1028_vm1, %v6819_v25, 0.0 }
 0xb29   : > { %3873 = vadd.xlane.f32.xlu0 %v3872_v26 }
 0xbb4   : > { %v3871_v5 = vpop.xlane.xlu1 %3870 }
 0xbb5   : > { %v3875_v27 = vmul.f32 0.03125, %v3871_v5 }
 0xbb6   : > { %v3874_v28 = vpop.xlane.xlu0 %3873 }
 0xbb7   : > { %v3877_v29 = vsub.f32 %v6817_v20, %v3875_v27  ;;  %v3876_v30 = vmul.f32 0.03125, %v3874_v28  ;;  %v5655_v28 = vmov (!%p4669_p8), 0.0  }
 0xbb8   : > { %4809 = vmatprep.subr.mxu0 (!%p4669_p8), %v5655_v28 }
 0xbb9   : > { %v3878_v31 = vsub.f32 %v6819_v25, %v3876_v30  ;;  %v3879_v32 = vmul.f32 %v3877_v29, %v3877_v29  ;;  %v4111_v30 = vld [vmem:[#allocation27] sm:$0x1] (!%p4669_p8) }
 0xbbb   : > { %v3881_v33 = vsel %vm1028_vm1, %v3879_v32, 0.0  ;;  %v3880_v34 = vmul.f32 %v3878_v31, %v3878_v31 }
 0xbbc   : > { %3882 = vadd.xlane.f32.xlu0 %v3881_v33 }
 0xbbd   : > { %v3884_v35 = vsel %vm1028_vm1, %v3880_v34, 0.0 }
 0xbc0   : > { %3885 = vadd.xlane.f32.xlu0 %v3884_v35 }
 0xc49   : > { %v3883_v37 = vpop.xlane.xlu0 %3882 }
 0xc4a   : > { %v3887_v38 = vmul.f32 0.03125, %v3883_v37 }
 0xc4c   : > { %v3889_v43 = vadd.f32 1e-05, %v3887_v38 }
 0xc4d   : > { %v3886_v45 = vpop.xlane.xlu0 %3885 }
 0xc4e   : > { %5028 = vrsqrt.f32 %v3889_v43  ;;  %v3888_v40 = vmul.f32 0.03125, %v3886_v45 }
 0xc50   : > { %v3890_v41 = vadd.f32 1e-05, %v3888_v40 }
 0xc52   : > { %5030 = vrsqrt.f32 %v3890_v41 }
 0xc58   : > { %v5029_v0 = vpop.eup %5028 }
 0xc59   : > { %v3893_v48 = vmul.f32 %v5029_v0, %v3877_v29  ;;  %v4112_v29 = vld [vmem:[#allocation3] sm:$0x1] (!%p4669_p8) }
 0xc5b   : > { %v3902_v39 = vmul.f32 %v4653_v42, %v3893_v48 }
 0xc5c   : > { %v5031_v50 = vpop.eup %5030 }
 0xc5d   : > { %v3894_v51 = vmul.f32 %v5031_v50, %v3878_v31  ;;  %v3911_v63 = vadd.f32 %v4654_v44, %v3902_v39  ;;  %v5658_v31 = vmov (!%p4669_p8), 1966171168  }
 0xc5f   : > { %v3903_v52 = vmul.f32 %v4653_v42, %v3894_v51 }
 0xc61   : > { %v3912_v46 = vadd.f32 %v4654_v44, %v3903_v52 }
 0xc63   : > { %v3913_v55 = vpack.c.bf16 %v3912_v46, %v3911_v63 }
 0xc65   : > { %4786 = vmatmul.mubr.msk.bf16.vlgmr.msra.gmra.mrb[24].mxu1 %vm1028_vm1, %v3913_v55 }
 0xd38   : > { %v3974_v7 = vpop.f32.mrb[24].mxu1 }
 0xd39   : > { %v4787_v8 = vpop.f32.mrb[25].mxu1  ;;  %v3975_v11 = vadd.f32 %v4655_v3, %v3974_v7 }
 0xd3a   : > { %v3977_v9 = vpop.f32.mrb[26].mxu1 }
 0xd3b   : > { %v3978_v12 = vadd.f32 %v4655_v3, %v3977_v9  ;;  %v4788_v13 = vpop.f32.mrb[27].mxu1 }
 0xd3d   : > { %v3981_v47 = vpack.c.bf16 %v3978_v12, %v3975_v11 }
 0xd3f   : > { %v4659_v6 = vmul.bf16 3218784218, %v3981_v47 }
 0xd41   : > { %v3985_v14 = vmul.bf16 1069105081, %v4659_v6 }
 0xd43   : > { %5032 = vpow.bf16 %v3985_v14 }
 0xd4e   : > { %v5033_v60 = vpop.eup %5032 }
 0xd4f   : > { %v3987_v4 = vadd.bf16 1065369472, %v5033_v60 }
 0xd51   : > { %5034 = vrcp.bf16 %v3987_v4 }
 0xd5c   : > { %v5035_v15 = vpop.eup %5034 }
 0xd5d   : > { %v3989_v18 = vmul.bf16 1065369472, %v5035_v15 }
 0xd5f   : > { %v3990_v16 = vmul.bf16 %v3989_v18, %v3981_v47 }
 0xd61   : > { %4806 = vmatmul.mubr.bf16.vlgmr.msra.gmra.mrb[16].mxu0 %v3990_v16 }
 0xd62   : > { %4811 = vmatprep.mubr.msk.f32.mxu0 (!%p4669_p8), %vm5656_vm9, %v5655_v28 }
 0xe34   : > { %v4096_v19 = vpop.f32.mrb[16].mxu0 }
 0xe35   : > { %v4097_v21 = vadd.f32 %v4660_v17, %v4096_v19  ;;  %v4807_v22 = vpop.f32.mrb[17].mxu0  ;;  %4110 = sbr.rel (%p4669_p8) target bundleno = 4125 (0x101d), region = 152 }
 0xe36   : > { %v4099_v23 = vpop.f32.mrb[18].mxu0 }
 0xe37   : > { %v4103_v49 = vadd.f32 %v4097_v21, %v6817_v20  ;;  %v4100_v26 = vadd.f32 %v4660_v17, %v4099_v23  ;;  %v4808_v5 = vpop.f32.mrb[19].mxu0  ;;  %v5657_v20 = vmov (!%p4669_p8), 0  }
 0xe38   : > { %5038 = vset.pattern.permute.xlu0 (!%p4669_p8), %v5657_v20 }
 0xe39   : > { %4105 = vst.msk [vmem:[#allocation2] sm:$0xff] %vm1028_vm1, %v4103_v49  ;;  %v4104_v27 = vadd.f32 %v4100_v26, %v6819_v25  ;;  %4115 = vperm.xlu0 (!%p4669_p8), %5038, %v4112_v29   ;;  %v4200_v25 = vunpack.c.l.s4 (!%p4669_p8), %v5658_v31 }
 0xe3b   : > { %4106 = vst.msk [vmem:[#allocation2 + $0x8] sm:$0xff] %vm1028_vm1, %v4104_v27  ;;  %4810 = vmatpush3.xpose.msk.msra.mxu0 (!%p4669_p8), %vm1028_vm1, %v4104_v27  ;;  %v4201_v33 = vunpack.c.0.s8 (!%p4669_p8), %v4200_v25 }
 0xe3d   : > { %v4204_v35 = vsub.s32 %v4201_v33, %v6483_v58 }
 0xe3e   : > { %4812 = vmatmul.mubr.msk.f32.vlgmr.msra.gmra.mrb[0].mxu0 %vm1028_vm1, %v4111_v30 }
 0xeb8   : > { %v4116_v32 = vpop.permute.xlu0 %4115 }
 0xeb9   : > { %v4121_v34 = vrot.slane %v4116_v32, %v6645_v62 }
 0xf11   : > { %v4194_v24 = vpop.f32.mrb[0].mxu0 }
 0xf12   : > { %v4195_v36 = vadd.f32 %v4194_v24, %v4121_v34  ;;  %v4813_v37 = vpop.f32.mrb[1].mxu0 }
 0xf14   : > { %v4205_v38 = vrot.slane %v4195_v36, %v4204_v35 }
 0xf16   : > { %v4212_v43 = vrot.slane %v4205_v38, %v4204_v35 }
 0xf18   : > { %4213 = vrot.lane.b32.xlu0 %v4212_v43, %s5659_s19 }
 0xf8a   : > { %v4214_v45 = vpop.permute.xlu0 %4213 }
 0xf8b   : > { %v4216_v40 = vsel %vm3208_vm5, -1e+30, %v4214_v45 }
 0xf8c   : > { %v4672_v41 = vmul.f32 -1.442695, %v4216_v40 }
 0xf8e   : > { %5039 = vpow2.f32 %v4672_v41 }
 0xf98   : > { %v5040_v0 = vpop.eup %5039 }
 0xf99   : > { %v4220_v48 = vadd.f32 1.0, %v5040_v0 }
 0xf9b   : > { %5041 = vrcp.f32 %v4220_v48 }
 0xfa5   : > { %v5042_v42 = vpop.eup %5041 }
 0xfa6   : > { %v4227_v58 = vrot.slane %v5042_v42, %v6645_v62 }
 0xfa8   : > { %4228 = vrot.lane.b32.xlu1 %v4227_v58, %s5660_s29 }
0x101a   : > { %v4229_v50 = vpop.permute.xlu1 %4228 }
0x101b   : > { %v4231_v39 = vsel %vm3010_vm4, %v4229_v50, 0.0 }
0x101c   : > { %4232 = vst [vmem:[%s1012_s25] sm:$0x1] %v4231_v39 }
0x101d PF: > { %s7070_s12 = sld [smem:[#allocation45_spill]]  ;;  %s7071_s6 = sld [smem:[#allocation52_spill]] }
0x101e   : > { %s7072_s11 = sld [smem:[#allocation69_spill]]  ;;  %s4246_s16 = sshll.u32 %s1012_s25, 4  ;;  %s4247_s16 = int_to_ptr.vmem [resolvable:$true] %s4246_s16 }
0x101f   : > { %s4234_s1 = scalar_lea.sflag [#allocation6], %s6347_s10  ;;  %s5463_s15 = scalar_lea.vmem %s4247_s16, 16 }
0x1020   : > { %p5464_p6 = scmp.ne.s32.totalorder %s4247_s16, %s5463_s15  ;;  %s5661_s28 = smov [#allocation28]  }
0x1021   : > { %s5467_s18 = sshll.u32 %s5661_s28, 4  ;;  %s5468_s18 = int_to_ptr.vmem [resolvable:$false] %s5467_s18 }
0x1022   : > { %s5469_s8 = scalar_lea.vmem %s5468_s18, 32  ;;  %p5470_p9 = scmp.lt.s32.totalorder %s4247_s16, %s5468_s18 }
0x1023   : > { %s4673_s21 = sshll.u32 %s7070_s12, 4  ;;  %p7073_p11 = scmp.ne.s32.totalorder %s7071_s6, 0 }
0x1024   : > { %s6877_s17 = scalar_lea.hbm %s7072_s11, %s4673_s21  ;;  %p5471_p3 = scmp.lt.s32.totalorder %s5469_s8, %s5463_s15 }
0x1025   : > { %p5465_p1 = pnand %p5464_p6, %p7073_p11 }
0x1026   : > { %p5472_p0 = por %p5471_p3, %p5470_p9 }
0x1027   : > { %p5466_p10 = pneg %p5465_p1 }
0x1029   : > { %p5473_p12 = pnand %p5472_p0, %p5466_p10 }
0x102b   : > { %5476 = shalt.err (!%p5473_p12)
}
0x102c   : > { %s5477_s10 = scalar_lea.hbm %s6877_s17, 16  ;;  %s5481_s24 = scalar_lea.hbm %s7072_s11, 32 }
0x102d   : > { %p5478_p13 = scmp.ne.s32.totalorder %s6877_s17, %s5477_s10  ;;  %p5482_p2 = scmp.lt.u32.totalorder %s6877_s17, %s7072_s11 }
0x102e   : > { %p5483_p4 = scmp.lt.u32.totalorder %s5481_s24, %s5477_s10  ;;  %p5485_p6 = scmp.lt.u32.totalorder %s5477_s10, %s6877_s17 }
0x102f   : > { %p5479_p5 = pnand %p5478_p13, %p7073_p11 }
0x1030   : > { %p5484_p8 = por %p5483_p4, %p5482_p2 }
0x1031   : > { %p5480_p7 = pneg %p5479_p5 }
0x1032   : > { %p5486_p1 = por %p5485_p6, %p5484_p8 }
0x1034   : > { %p5487_p10 = pnand %p5486_p1, %p5480_p7 }
0x1036   : > { %5490 = shalt.err (!%p5487_p10)
}
0x1037   : > { %4846 = dma.vmem_to_hbm [thread:$0]  (%p7073_p11), %s4247_s16, 16, %s6877_s17, %s4234_s1  }
0x1038 PF: > { %s7074_s7 = sld [smem:[#allocation46_spill]]  ;;  %s7075_s22 = sld [smem:[#allocation42_spill]] }
0x1039   : > { %s7076_s13 = sld [smem:[#allocation53_spill]] }
0x103e   : > { %p4858_p9 = scmp.ge.s32.totalorder %s7074_s7, 2  ;;  %s4258_s19 = sand.u32 1, %s7075_s22  }
0x103f   : > { %p7077_p3 = scmp.ne.s32.totalorder %s7076_s13, 0  ;;  %s4259_s29 = scalar_lea.sflag [#allocation6], %s4258_s19 }
0x1041   : > { %p4853_p0 = pnand %p4858_p9, %p7077_p3 }
0x1043   : > { %5576 = dma.done.wait (!%p4853_p0), %s4259_s29, 16  }
0x1044   : > { %5578 = vsyncadd (!%p4853_p0), %s4259_s29, 4294967280  ;;  %s55_s17 = sadd.s32 1, %s7074_s7   ;;  %s7078_s15 = sld [smem:[#allocation40_spill]] }
0x1045   : > { %p52_p12 = scmp.ge.s32.totalorder %s55_s17, 6   ;;  %s7079_s23 = sld [smem:[#allocation41_spill]] }
0x1046   : > { %s7080_s24 = sld [smem:[#allocation49_spill]]  ;;  %s7081_s12 = sld [smem:[#allocation43_spill]] }
0x1047   : > { %s7082_s27 = sld [smem:[#allocation50_spill]]  ;;  %s7083_s6 = sld [smem:[#allocation47_spill]] }
0x1048   : > { %s7084_s21 = sld [smem:[#allocation48_spill]]  ;;  %s7085_s25 = smov %s5597_s26 }
0x1049   : > { %s7087_s28 = smov %s5613_s30  ;;  %s7088_s29 = smov %s5617_s0 }
0x104a   :  { %54 = sbr.rel (!%p52_p12) target bundleno = 40 (0x28), region = 298 }
0x104c   : > { %s7086_s26 = smov %s7081_s12 }
0x104d   : > { %s7089_s30 = smov %s7083_s6 }
0x104e   : > { %s7090_s0 = smov %s7084_s21 }
0x1051   :  { %4263 = vsyncpa [#allocation5], 1 }
0x1052   :  { %4265 = vsyncpa [#allocation5 + $0x1], 1 }
0x1053   :  { %4266 = vsyncpa [#allocation8], 1 }
0x1054   :  { %4268 = vsyncpa [#allocation8 + $0x1], 1 }
0x1055   :  { %4269 = vsyncpa [#allocation11], 1 }
0x1056   :  { %4271 = vsyncpa [#allocation11 + $0x1], 1 }
0x1057   :  { %4272 = vsyncpa [#allocation14], 1 }
0x1058   :  { %4274 = vsyncpa [#allocation14 + $0x1], 1 }
0x1059   :  { %4275 = vsyncpa [#allocation17], 1 }
0x105a   :  { %4277 = vsyncpa [#allocation17 + $0x1], 1 }
0x105b   :  { %4278 = vsyncpa [#allocation20], 1 }
0x105c   :  { %4280 = vsyncpa [#allocation20 + $0x1], 1 }
0x105d   :  { %4281 = vsyncpa [#allocation23], 1 }
0x105e   :  { %4283 = vsyncpa [#allocation23 + $0x1], 1 }
0x105f   :  { %4284 = vsyncpa [#allocation26], 1 }
0x1060   :  { %4286 = vsyncpa [#allocation26 + $0x1], 1 }
0x1061   :  { %4287 = vsyncpa [#allocation6], 1 }
0x1062   :  { %4289 = vsyncpa [#allocation6 + $0x1], 1 }

</bundles_post_ra>
